<compile_context>
chip_gen: v5e
topology: v5e:2x2
jax: 0.10.0
libtpu: 0.0.40
codegen_flags: <defaults>
</compile_context>

<pallas_src>
import math

import jax
import jax.numpy as jnp
from jax.experimental import pallas as pl
from jax.experimental.pallas import tpu as pltpu  # noqa: F401  (TPU backend assumed)

# ----- static model config (small demo shapes) ------------------------------
N_EMBD = 32                 # config.n_embd
N_HEAD = 4                  # config.n_head
HEAD_DIM = N_EMBD // N_HEAD
BLOCK_SIZE = 8              # config.block_size (causal-mask buffer length)
N_LAYER = 1                 # config.n_layer -> 2*N_LAYER BlockGTrXL layers
N_BLOCKS = 2 * N_LAYER
MLP_HIDDEN = 2 * N_EMBD     # BlockGTrXL mlp hidden = 2*n_embd
INIT_GRU_GATE_BIAS = 2.0    # config.init_gru_gate_bias
LN_EPS = 1e-5
NEG_INF = -1e30             # stands in for float('-inf') in masked_fill

# Attention (C, C) weight pack indices (pre-transposed so the kernel does x@W).
W_Q, W_K, W_V, W_PROJ = 0, 1, 2, 3

# Packed (C,) vector indices.
(V_LN1_G, V_LN1_B, V_BQ, V_BK, V_BV, V_BPROJ, V_G1_BZ,
 V_LN2_G, V_LN2_B, V_MLP_B2, V_G2_BZ) = range(11)
N_VEC = 11


# ----- shared math -----------------------------------------------------------
def _layernorm(x, g, b):
    mu = jnp.mean(x, axis=-1, keepdims=True)
    xc = x - mu
    var = jnp.mean(xc * xc, axis=-1, keepdims=True)
    return xc * jax.lax.rsqrt(var + LN_EPS) * g + b


def _sigmoid(x):
    # Numerically stable and mathematically identical to 1/(1+exp(-x)); tanh
    # runs on the EUP.
    return 0.5 * (jnp.tanh(0.5 * x) + 1.0)


def _gelu_tanh(x):
    # TODO(synk): nn.GELU() default is the exact erf form; tanh approximation
    # is used because erf has no guaranteed Mosaic lowering (max diff ~1e-3).
    c = math.sqrt(2.0 / math.pi)
    return 0.5 * x * (1.0 + jnp.tanh(c * (x + 0.044715 * x * x * x)))


# ----- fused whole-stack kernel ----------------------------------------------
def _blockseq_kernel(q_ref, k_ref, v_ref, bias_ref,
                     w_attn_ref, w_rzh_ref, w_urz_ref, w_uh_ref,
                     w_m1_ref, b_m1_ref, w_m2_ref, vecs_ref, o_ref):
    x = q_ref[...]                     # (B*T, C)  carried q
    k = k_ref[...]                     # (B*T, C)  fixed across layers
    v = v_ref[...]
    _, C = x.shape
    scale = 1.0 / math.sqrt(HEAD_DIM)
    lane = jax.lax.broadcasted_iota(jnp.int32, (1, C), 1)

    def gru(h, xin, w_rzh, u_rz, u_h, bz):
        # fused GRU gate: 3 matmuls instead of 6
        xw = jnp.dot(xin, w_rzh, preferred_element_type=jnp.float32)   # (N, 3C)
        hu = jnp.dot(h, u_rz, preferred_element_type=jnp.float32)      # (N, 2C)
        r = _sigmoid(xw[:, 0:C] + hu[:, 0:C])
        z = _sigmoid(xw[:, C:2 * C] + hu[:, C:2 * C] - bz)
        h_hat = jnp.tanh(xw[:, 2 * C:3 * C]
                         + jnp.dot(h * r, u_h, preferred_element_type=jnp.float32))
        return (1.0 - z) * h + z * h_hat

    for l in range(N_BLOCKS):          # static unroll over the layer stack
        vl = vecs_ref[l]               # (N_VEC, C)

        def vec(i, _vl=vl):
            return _vl[i:i + 1, :]     # (1, C), broadcasts over rows

        # ln1 + QKV projections (shared ln1, per-layer weights) over the whole
        # folded batch.
        ln1_g, ln1_b = vec(V_LN1_G), vec(V_LN1_B)
        qn = _layernorm(x, ln1_g, ln1_b)
        kn = _layernorm(k, ln1_g, ln1_b)
        vn = _layernorm(v, ln1_g, ln1_b)

        qp = jnp.dot(qn, w_attn_ref[l, W_Q], preferred_element_type=jnp.float32) + vec(V_BQ)
        kp = jnp.dot(kn, w_attn_ref[l, W_K], preferred_element_type=jnp.float32) + vec(V_BK)
        vp = jnp.dot(vn, w_attn_ref[l, W_V], preferred_element_type=jnp.float32) + vec(V_BV)

        # Multi-head attention with lane-masked full-width operands (no 8-lane
        # slicing, no lane concat).  bias_ref already encodes causal mask,
        # cross-batch masking and attn_bias.
        y = jnp.zeros_like(qp)
        for h in range(N_HEAD):
            hm = (lane >= h * HEAD_DIM) & (lane < (h + 1) * HEAD_DIM)   # (1, C)
            kh = jnp.where(hm, kp, 0.0)
            vh = jnp.where(hm, vp, 0.0)
            att = jax.lax.dot_general(qp, kh, (((1,), (1,)), ((), ())),
                                      preferred_element_type=jnp.float32) * scale
            att = att + bias_ref[h]
            att = att - jnp.max(att, axis=-1, keepdims=True)
            p = jnp.exp(att)
            p = p * pl.reciprocal(jnp.sum(p, axis=-1, keepdims=True), approx=True)
            y = y + jnp.dot(p, vh, preferred_element_type=jnp.float32)
        y = jnp.dot(y, w_attn_ref[l, W_PROJ], preferred_element_type=jnp.float32) + vec(V_BPROJ)

        # gate1: GRU(h=q, X=attention output)
        x = gru(x, y, w_rzh_ref[l, 0], w_urz_ref[l, 0], w_uh_ref[l, 0], vec(V_G1_BZ))

        # mlp(ln2(x)):  Linear(C, 2C) -> GELU -> Linear(2C, C)
        xl = _layernorm(x, vec(V_LN2_G), vec(V_LN2_B))
        hmid = _gelu_tanh(jnp.dot(xl, w_m1_ref[l], preferred_element_type=jnp.float32)
                          + b_m1_ref[l])
        m = jnp.dot(hmid, w_m2_ref[l], preferred_element_type=jnp.float32) + vec(V_MLP_B2)

        # gate2: GRU(h=x, X=mlp out)
        x = gru(x, m, w_rzh_ref[l, 1], w_urz_ref[l, 1], w_uh_ref[l, 1], vec(V_G2_BZ))

    o_ref[...] = x                     # single full-width store


def _build_combined_bias(attn_bias):
    """Merge causal mask, cross-batch block masking and attn_bias into one
    additive (H, B*T, B*T) tensor.  Pure layout plumbing; the bias add itself
    happens inside the kernel."""
    B, H, Tq, Tk = attn_bias.shape
    row = jnp.arange(Tq)[:, None] + (BLOCK_SIZE - Tq)
    col = jnp.arange(Tk)[None, :]
    causal = row >= col                               # tril(block_size)[-Tq:, :Tk]
    per_batch = jnp.where(causal[None, None, :, :], attn_bias, NEG_INF)  # (B,H,Tq,Tk)
    full = jnp.full((H, B * Tq, B * Tk), NEG_INF, dtype=jnp.float32)
    for b in range(B):
        full = full.at[:, b * Tq:(b + 1) * Tq, b * Tk:(b + 1) * Tk].set(per_batch[b])
    return full


@jax.jit
def block_seq_forward(q, k, v, attn_bias_list, params):
    """BlockSeq.forward for use_GTrXL=True, use_TS=False (stack of BlockGTrXL)."""
    attn_bias = attn_bias_list[0]                     # use_TS == False path
    B, T, C = q.shape
    bias_full = _build_combined_bias(attn_bias)       # (H, B*T, B*T)
    out = pl.pallas_call(
        _blockseq_kernel,
        out_shape=jax.ShapeDtypeStruct((B * T, C), jnp.float32),
        # No grid: everything (activations + all layers' weights, < 1 MiB)
        # lives in VMEM for the single invocation.
    )(q.reshape(B * T, C), k.reshape(B * T, C), v.reshape(B * T, C), bias_full,
      params["w_attn"], params["w_rzh"], params["w_urz"], params["w_uh"],
      params["w_mlp1"], params["b_mlp1"], params["w_mlp2"], params["vecs"])
    return out.reshape(B, T, C)


# ----- pure-JAX reference (mirrors the PyTorch module, batched) ---------------
def _reference_block_seq(q, k, v, attn_bias_list, params):
    attn_bias = attn_bias_list[0]
    B, T, C = q.shape
    H, D = N_HEAD, HEAD_DIM
    row = jnp.arange(T)[:, None] + (BLOCK_SIZE - T)
    col = jnp.arange(T)[None, :]
    causal = row >= col

    def gru(h, X, w_rzh, u_rz, u_h, bz):
        wr, wz, wh = w_rzh[:, :C], w_rzh[:, C:2 * C], w_rzh[:, 2 * C:]
        ur, uz = u_rz[:, :C], u_rz[:, C:]
        r = jax.nn.sigmoid(X @ wr + h @ ur)
        z = jax.nn.sigmoid(X @ wz + h @ uz - bz)
        h_next = jnp.tanh(X @ wh + (h * r) @ u_h)
        return (1.0 - z) * h + z * h_next

    x = q
    for l in range(N_BLOCKS):
        vecs = params["vecs"][l]
        w_attn = params["w_attn"][l]
        ln1_g, ln1_b = vecs[V_LN1_G], vecs[V_LN1_B]
        xn = _layernorm(x, ln1_g, ln1_b)
        kn = _layernorm(k, ln1_g, ln1_b)
        vn = _layernorm(v, ln1_g, ln1_b)
        Q = (xn @ w_attn[W_Q] + vecs[V_BQ]).reshape(B, T, H, D).transpose(0, 2, 1, 3)
        K = (kn @ w_attn[W_K] + vecs[V_BK]).reshape(B, T, H, D).transpose(0, 2, 1, 3)
        Vh = (vn @ w_attn[W_V] + vecs[V_BV]).reshape(B, T, H, D).transpose(0, 2, 1, 3)
        att = jnp.einsum("bhqd,bhkd->bhqk", Q, K) / math.sqrt(D)
        att = jnp.where(causal[None, None], att, NEG_INF) + attn_bias
        p = jax.nn.softmax(att, axis=-1)
        y = jnp.einsum("bhqk,bhkd->bhqd", p, Vh).transpose(0, 2, 1, 3).reshape(B, T, C)
        y = y @ w_attn[W_PROJ] + vecs[V_BPROJ]

        x = gru(x, y, params["w_rzh"][l, 0], params["w_urz"][l, 0],
                params["w_uh"][l, 0], vecs[V_G1_BZ])
        xl = _layernorm(x, vecs[V_LN2_G], vecs[V_LN2_B])
        m = (_gelu_tanh(xl @ params["w_mlp1"][l] + params["b_mlp1"][l])
             @ params["w_mlp2"][l] + vecs[V_MLP_B2])
        x = gru(x, m, params["w_rzh"][l, 1], params["w_urz"][l, 1],
                params["w_uh"][l, 1], vecs[V_G2_BZ])
    return x


if __name__ == "__main__":
    B, T, C = 2, BLOCK_SIZE, N_EMBD
    key = jax.random.PRNGKey(0)
    kq, kk, kv, kb, kp = jax.random.split(key, 5)

    q = jax.random.normal(kq, (B, T, C), dtype=jnp.float32)
    k = jax.random.normal(kk, (B, T, C), dtype=jnp.float32)
    v = jax.random.normal(kv, (B, T, C), dtype=jnp.float32)
    # BlockSeq receives a tuple of biases; the use_TS=False path uses [0].
    attn_bias = (0.1 * jax.random.normal(kb, (B, N_HEAD, T, T), jnp.float32),)

    # Per-layer weights, stacked along a leading layer axis.
    w_attn, w_rzh, w_urz, w_uh, w_m1, b_m1, w_m2, vecs_all = ([] for _ in range(8))
    for lk in jax.random.split(kp, N_BLOCKS):
        k1, k2, k3, k4, k5, k6, k7, k8 = jax.random.split(lk, 8)
        w_attn.append(0.1 * jax.random.normal(k1, (4, C, C), jnp.float32))        # Q,K,V,proj
        w_rzh.append(0.1 * jax.random.normal(k2, (2, C, 3 * C), jnp.float32))     # gate{1,2} [wr|wz|wh]
        w_urz.append(0.1 * jax.random.normal(k3, (2, C, 2 * C), jnp.float32))     # gate{1,2} [ur|uz]
        w_uh.append(0.1 * jax.random.normal(k4, (2, C, C), jnp.float32))          # gate{1,2} uh
        w_m1.append(0.1 * jax.random.normal(k5, (C, MLP_HIDDEN), jnp.float32))
        b_m1.append(0.1 * jax.random.normal(k6, (1, MLP_HIDDEN), jnp.float32))
        w_m2.append(0.1 * jax.random.normal(k7, (MLP_HIDDEN, C), jnp.float32))
        vv = 0.1 * jax.random.normal(k8, (N_VEC, C), jnp.float32)
        # LayerNorm gains ~1, GRU z-gate bias = init_gru_gate_bias (PyTorch init).
        vv = vv.at[V_LN1_G].add(1.0).at[V_LN2_G].add(1.0)
        vv = vv.at[V_G1_BZ].set(INIT_GRU_GATE_BIAS).at[V_G2_BZ].set(INIT_GRU_GATE_BIAS)
        vecs_all.append(vv)

    params = {
        "w_attn": jnp.stack(w_attn), "w_rzh": jnp.stack(w_rzh),
        "w_urz": jnp.stack(w_urz), "w_uh": jnp.stack(w_uh),
        "w_mlp1": jnp.stack(w_m1), "b_mlp1": jnp.stack(b_m1),
        "w_mlp2": jnp.stack(w_m2), "vecs": jnp.stack(vecs_all),
    }

    out = jax.block_until_ready(block_seq_forward(q, k, v, attn_bias, params))
    ref = _reference_block_seq(q, k, v, attn_bias, params)

    assert out.shape == (B, T, C), out.shape
    max_err = float(jnp.max(jnp.abs(out - ref)))
    assert jnp.allclose(out, ref, atol=1e-3, rtol=1e-3), f"mismatch, max_err={max_err}"

    print("KERNEL_OK")
</pallas_src>

<mosaic_0001>
module attributes {stable_mosaic.version = 11 : i64} {
  func.func @_blockseq_kernel(%arg0: memref<16x32xf32, #tpu.memory_space<vmem>>, %arg1: memref<16x32xf32, #tpu.memory_space<vmem>>, %arg2: memref<16x32xf32, #tpu.memory_space<vmem>>, %arg3: memref<4x16x16xf32, #tpu.memory_space<vmem>>, %arg4: memref<2x4x32x32xf32, #tpu.memory_space<vmem>>, %arg5: memref<2x2x32x96xf32, #tpu.memory_space<vmem>>, %arg6: memref<2x2x32x64xf32, #tpu.memory_space<vmem>>, %arg7: memref<2x2x32x32xf32, #tpu.memory_space<vmem>>, %arg8: memref<2x32x64xf32, #tpu.memory_space<vmem>>, %arg9: memref<2x1x64xf32, #tpu.memory_space<vmem>>, %arg10: memref<2x64x32xf32, #tpu.memory_space<vmem>>, %arg11: memref<2x11x32xf32, #tpu.memory_space<vmem>>, %arg12: memref<16x32xf32, #tpu.memory_space<vmem>>) attributes {dimension_semantics = [], scalar_prefetch = 0 : i64, scratch_operands = 0 : i64, tpu.core_type = #tpu.core_type<tc>} {
    %c0 = arith.constant 0 : index
    %c0_0 = arith.constant 0 : index
    %0 = vector.load %arg0[%c0, %c0_0] : memref<16x32xf32, #tpu.memory_space<vmem>>, vector<16x32xf32>
    %c0_1 = arith.constant 0 : index
    %c0_2 = arith.constant 0 : index
    %1 = vector.load %arg1[%c0_1, %c0_2] : memref<16x32xf32, #tpu.memory_space<vmem>>, vector<16x32xf32>
    %c0_3 = arith.constant 0 : index
    %c0_4 = arith.constant 0 : index
    %2 = vector.load %arg2[%c0_3, %c0_4] : memref<16x32xf32, #tpu.memory_space<vmem>>, vector<16x32xf32>
    %3 = tpu.iota {dimensions = array<i32: 1>} : vector<1x32xi32>
    %c0_5 = arith.constant 0 : index
    %c0_6 = arith.constant 0 : index
    %c0_7 = arith.constant 0 : index
    %4 = vector.load %arg11[%c0_5, %c0_6, %c0_7] : memref<2x11x32xf32, #tpu.memory_space<vmem>>, vector<1x11x32xf32>
    %5 = vector.shape_cast %4 : vector<1x11x32xf32> to vector<11x32xf32>
    %6 = vector.extract_strided_slice %5 {offsets = [0, 0], sizes = [1, 32], strides = [1, 1]} : vector<11x32xf32> to vector<1x32xf32>
    %7 = vector.extract_strided_slice %5 {offsets = [1, 0], sizes = [1, 32], strides = [1, 1]} : vector<11x32xf32> to vector<1x32xf32>
    %cst = arith.constant dense<0.000000e+00> : vector<16xf32>
    %8 = vector.multi_reduction <add>, %0, %cst [1] : vector<16x32xf32> to vector<16xf32>
    %9 = vector.shape_cast %8 : vector<16xf32> to vector<16x1xf32>
    %cst_8 = arith.constant 3.200000e+01 : f32
    %10 = vector.broadcast %cst_8 : f32 to vector<16x1xf32>
    %11 = arith.divf %9, %10 : vector<16x1xf32>
    %12 = vector.broadcast %11 : vector<16x1xf32> to vector<16x32xf32>
    %13 = arith.subf %0, %12 : vector<16x32xf32>
    %14 = arith.mulf %13, %13 : vector<16x32xf32>
    %cst_9 = arith.constant dense<0.000000e+00> : vector<16xf32>
    %15 = vector.multi_reduction <add>, %14, %cst_9 [1] : vector<16x32xf32> to vector<16xf32>
    %16 = vector.shape_cast %15 : vector<16xf32> to vector<16x1xf32>
    %cst_10 = arith.constant 3.200000e+01 : f32
    %17 = vector.broadcast %cst_10 : f32 to vector<16x1xf32>
    %18 = arith.divf %16, %17 : vector<16x1xf32>
    %cst_11 = arith.constant 9.99999974E-6 : f32
    %19 = vector.broadcast %cst_11 : f32 to vector<16x1xf32>
    %20 = arith.addf %18, %19 : vector<16x1xf32>
    %21 = math.rsqrt %20 : vector<16x1xf32>
    %22 = vector.broadcast %21 : vector<16x1xf32> to vector<16x32xf32>
    %23 = arith.mulf %13, %22 : vector<16x32xf32>
    %24 = vector.broadcast %6 : vector<1x32xf32> to vector<16x32xf32>
    %25 = arith.mulf %23, %24 : vector<16x32xf32>
    %26 = vector.broadcast %7 : vector<1x32xf32> to vector<16x32xf32>
    %27 = arith.addf %25, %26 : vector<16x32xf32>
    %cst_12 = arith.constant dense<0.000000e+00> : vector<16xf32>
    %28 = vector.multi_reduction <add>, %1, %cst_12 [1] : vector<16x32xf32> to vector<16xf32>
    %29 = vector.shape_cast %28 : vector<16xf32> to vector<16x1xf32>
    %cst_13 = arith.constant 3.200000e+01 : f32
    %30 = vector.broadcast %cst_13 : f32 to vector<16x1xf32>
    %31 = arith.divf %29, %30 : vector<16x1xf32>
    %32 = vector.broadcast %31 : vector<16x1xf32> to vector<16x32xf32>
    %33 = arith.subf %1, %32 : vector<16x32xf32>
    %34 = arith.mulf %33, %33 : vector<16x32xf32>
    %cst_14 = arith.constant dense<0.000000e+00> : vector<16xf32>
    %35 = vector.multi_reduction <add>, %34, %cst_14 [1] : vector<16x32xf32> to vector<16xf32>
    %36 = vector.shape_cast %35 : vector<16xf32> to vector<16x1xf32>
    %cst_15 = arith.constant 3.200000e+01 : f32
    %37 = vector.broadcast %cst_15 : f32 to vector<16x1xf32>
    %38 = arith.divf %36, %37 : vector<16x1xf32>
    %cst_16 = arith.constant 9.99999974E-6 : f32
    %39 = vector.broadcast %cst_16 : f32 to vector<16x1xf32>
    %40 = arith.addf %38, %39 : vector<16x1xf32>
    %41 = math.rsqrt %40 : vector<16x1xf32>
    %42 = vector.broadcast %41 : vector<16x1xf32> to vector<16x32xf32>
    %43 = arith.mulf %33, %42 : vector<16x32xf32>
    %44 = vector.broadcast %6 : vector<1x32xf32> to vector<16x32xf32>
    %45 = arith.mulf %43, %44 : vector<16x32xf32>
    %46 = vector.broadcast %7 : vector<1x32xf32> to vector<16x32xf32>
    %47 = arith.addf %45, %46 : vector<16x32xf32>
    %cst_17 = arith.constant dense<0.000000e+00> : vector<16xf32>
    %48 = vector.multi_reduction <add>, %2, %cst_17 [1] : vector<16x32xf32> to vector<16xf32>
    %49 = vector.shape_cast %48 : vector<16xf32> to vector<16x1xf32>
    %cst_18 = arith.constant 3.200000e+01 : f32
    %50 = vector.broadcast %cst_18 : f32 to vector<16x1xf32>
    %51 = arith.divf %49, %50 : vector<16x1xf32>
    %52 = vector.broadcast %51 : vector<16x1xf32> to vector<16x32xf32>
    %53 = arith.subf %2, %52 : vector<16x32xf32>
    %54 = arith.mulf %53, %53 : vector<16x32xf32>
    %cst_19 = arith.constant dense<0.000000e+00> : vector<16xf32>
    %55 = vector.multi_reduction <add>, %54, %cst_19 [1] : vector<16x32xf32> to vector<16xf32>
    %56 = vector.shape_cast %55 : vector<16xf32> to vector<16x1xf32>
    %cst_20 = arith.constant 3.200000e+01 : f32
    %57 = vector.broadcast %cst_20 : f32 to vector<16x1xf32>
    %58 = arith.divf %56, %57 : vector<16x1xf32>
    %cst_21 = arith.constant 9.99999974E-6 : f32
    %59 = vector.broadcast %cst_21 : f32 to vector<16x1xf32>
    %60 = arith.addf %58, %59 : vector<16x1xf32>
    %61 = math.rsqrt %60 : vector<16x1xf32>
    %62 = vector.broadcast %61 : vector<16x1xf32> to vector<16x32xf32>
    %63 = arith.mulf %53, %62 : vector<16x32xf32>
    %64 = vector.broadcast %6 : vector<1x32xf32> to vector<16x32xf32>
    %65 = arith.mulf %63, %64 : vector<16x32xf32>
    %66 = vector.broadcast %7 : vector<1x32xf32> to vector<16x32xf32>
    %67 = arith.addf %65, %66 : vector<16x32xf32>
    %c0_22 = arith.constant 0 : index
    %c0_23 = arith.constant 0 : index
    %c0_24 = arith.constant 0 : index
    %c0_25 = arith.constant 0 : index
    %68 = vector.load %arg4[%c0_22, %c0_23, %c0_24, %c0_25] : memref<2x4x32x32xf32, #tpu.memory_space<vmem>>, vector<1x1x32x32xf32>
    %69 = vector.shape_cast %68 : vector<1x1x32x32xf32> to vector<32x32xf32>
    %cst_26 = arith.constant dense<0.000000e+00> : vector<16x32xf32>
    %70 = tpu.matmul %27, %69, %cst_26 {dimension_numbers = #tpu.dot_dimension_numbers<[1], [0], [0], [1], [0, 0, 1, 1], [], []>} : vector<16x32xf32>, vector<32x32xf32>, vector<16x32xf32> -> vector<16x32xf32>
    %71 = vector.extract_strided_slice %5 {offsets = [2, 0], sizes = [1, 32], strides = [1, 1]} : vector<11x32xf32> to vector<1x32xf32>
    %72 = vector.broadcast %71 : vector<1x32xf32> to vector<16x32xf32>
    %73 = arith.addf %70, %72 : vector<16x32xf32>
    %c0_27 = arith.constant 0 : index
    %c1 = arith.constant 1 : index
    %c0_28 = arith.constant 0 : index
    %c0_29 = arith.constant 0 : index
    %74 = vector.load %arg4[%c0_27, %c1, %c0_28, %c0_29] : memref<2x4x32x32xf32, #tpu.memory_space<vmem>>, vector<1x1x32x32xf32>
    %75 = vector.shape_cast %74 : vector<1x1x32x32xf32> to vector<32x32xf32>
    %cst_30 = arith.constant dense<0.000000e+00> : vector<16x32xf32>
    %76 = tpu.matmul %47, %75, %cst_30 {dimension_numbers = #tpu.dot_dimension_numbers<[1], [0], [0], [1], [0, 0, 1, 1], [], []>} : vector<16x32xf32>, vector<32x32xf32>, vector<16x32xf32> -> vector<16x32xf32>
    %77 = vector.extract_strided_slice %5 {offsets = [3, 0], sizes = [1, 32], strides = [1, 1]} : vector<11x32xf32> to vector<1x32xf32>
    %78 = vector.broadcast %77 : vector<1x32xf32> to vector<16x32xf32>
    %79 = arith.addf %76, %78 : vector<16x32xf32>
    %c0_31 = arith.constant 0 : index
    %c2 = arith.constant 2 : index
    %c0_32 = arith.constant 0 : index
    %c0_33 = arith.constant 0 : index
    %80 = vector.load %arg4[%c0_31, %c2, %c0_32, %c0_33] : memref<2x4x32x32xf32, #tpu.memory_space<vmem>>, vector<1x1x32x32xf32>
    %81 = vector.shape_cast %80 : vector<1x1x32x32xf32> to vector<32x32xf32>
    %cst_34 = arith.constant dense<0.000000e+00> : vector<16x32xf32>
    %82 = tpu.matmul %67, %81, %cst_34 {dimension_numbers = #tpu.dot_dimension_numbers<[1], [0], [0], [1], [0, 0, 1, 1], [], []>} : vector<16x32xf32>, vector<32x32xf32>, vector<16x32xf32> -> vector<16x32xf32>
    %83 = vector.extract_strided_slice %5 {offsets = [4, 0], sizes = [1, 32], strides = [1, 1]} : vector<11x32xf32> to vector<1x32xf32>
    %84 = vector.broadcast %83 : vector<1x32xf32> to vector<16x32xf32>
    %85 = arith.addf %82, %84 : vector<16x32xf32>
    %cst_35 = arith.constant 0.000000e+00 : f32
    %86 = vector.broadcast %cst_35 : f32 to vector<16x32xf32>
    %c0_i32 = arith.constant 0 : i32
    %87 = vector.broadcast %c0_i32 : i32 to vector<1x32xi32>
    %88 = arith.cmpi sge, %3, %87 : vector<1x32xi32>
    %c8_i32 = arith.constant 8 : i32
    %89 = vector.broadcast %c8_i32 : i32 to vector<1x32xi32>
    %90 = arith.cmpi slt, %3, %89 : vector<1x32xi32>
    %91 = arith.andi %88, %90 : vector<1x32xi1>
    %cst_36 = arith.constant 0.000000e+00 : f32
    %92 = vector.shape_cast %91 : vector<1x32xi1> to vector<1x32xi1>
    %93 = vector.broadcast %92 : vector<1x32xi1> to vector<16x32xi1>
    %94 = vector.broadcast %cst_36 : f32 to vector<16x32xf32>
    %95 = arith.select %93, %79, %94 : vector<16x32xi1>, vector<16x32xf32>
    %cst_37 = arith.constant 0.000000e+00 : f32
    %96 = vector.shape_cast %91 : vector<1x32xi1> to vector<1x32xi1>
    %97 = vector.broadcast %96 : vector<1x32xi1> to vector<16x32xi1>
    %98 = vector.broadcast %cst_37 : f32 to vector<16x32xf32>
    %99 = arith.select %97, %85, %98 : vector<16x32xi1>, vector<16x32xf32>
    %cst_38 = arith.constant dense<0.000000e+00> : vector<16x16xf32>
    %100 = tpu.matmul %73, %95, %cst_38 {dimension_numbers = #tpu.dot_dimension_numbers<[1], [1], [0], [0], [0, 0, 1, 0], [], []>} : vector<16x32xf32>, vector<16x32xf32>, vector<16x16xf32> -> vector<16x16xf32>
    %cst_39 = arith.constant 0.353553385 : f32
    %101 = vector.broadcast %cst_39 : f32 to vector<16x16xf32>
    %102 = arith.mulf %100, %101 : vector<16x16xf32>
    %c0_40 = arith.constant 0 : index
    %c0_41 = arith.constant 0 : index
    %c0_42 = arith.constant 0 : index
    %103 = vector.load %arg3[%c0_40, %c0_41, %c0_42] : memref<4x16x16xf32, #tpu.memory_space<vmem>>, vector<1x16x16xf32>
    %104 = vector.shape_cast %103 : vector<1x16x16xf32> to vector<16x16xf32>
    %105 = arith.addf %102, %104 : vector<16x16xf32>
    %cst_43 = arith.constant dense<0xFF800000> : vector<16xf32>
    %106 = vector.multi_reduction <maximumf>, %105, %cst_43 [1] : vector<16x16xf32> to vector<16xf32>
    %107 = vector.shape_cast %106 : vector<16xf32> to vector<16x1xf32>
    %108 = vector.broadcast %107 : vector<16x1xf32> to vector<16x16xf32>
    %109 = arith.subf %105, %108 : vector<16x16xf32>
    %110 = math.exp %109 : vector<16x16xf32>
    %cst_44 = arith.constant dense<0.000000e+00> : vector<16xf32>
    %111 = vector.multi_reduction <add>, %110, %cst_44 [1] : vector<16x16xf32> to vector<16xf32>
    %112 = vector.shape_cast %111 : vector<16xf32> to vector<16x1xf32>
    %113 = tpu.reciprocal %112 {approx = true} : vector<16x1xf32> -> vector<16x1xf32>
    %114 = vector.broadcast %113 : vector<16x1xf32> to vector<16x16xf32>
    %115 = arith.mulf %110, %114 : vector<16x16xf32>
    %cst_45 = arith.constant dense<0.000000e+00> : vector<16x32xf32>
    %116 = tpu.matmul %115, %99, %cst_45 {dimension_numbers = #tpu.dot_dimension_numbers<[1], [0], [0], [1], [0, 0, 1, 1], [], []>} : vector<16x16xf32>, vector<16x32xf32>, vector<16x32xf32> -> vector<16x32xf32>
    %117 = arith.addf %86, %116 : vector<16x32xf32>
    %c8_i32_46 = arith.constant 8 : i32
    %118 = vector.broadcast %c8_i32_46 : i32 to vector<1x32xi32>
    %119 = arith.cmpi sge, %3, %118 : vector<1x32xi32>
    %c16_i32 = arith.constant 16 : i32
    %120 = vector.broadcast %c16_i32 : i32 to vector<1x32xi32>
    %121 = arith.cmpi slt, %3, %120 : vector<1x32xi32>
    %122 = arith.andi %119, %121 : vector<1x32xi1>
    %cst_47 = arith.constant 0.000000e+00 : f32
    %123 = vector.shape_cast %122 : vector<1x32xi1> to vector<1x32xi1>
    %124 = vector.broadcast %123 : vector<1x32xi1> to vector<16x32xi1>
    %125 = vector.broadcast %cst_47 : f32 to vector<16x32xf32>
    %126 = arith.select %124, %79, %125 : vector<16x32xi1>, vector<16x32xf32>
    %cst_48 = arith.constant 0.000000e+00 : f32
    %127 = vector.shape_cast %122 : vector<1x32xi1> to vector<1x32xi1>
    %128 = vector.broadcast %127 : vector<1x32xi1> to vector<16x32xi1>
    %129 = vector.broadcast %cst_48 : f32 to vector<16x32xf32>
    %130 = arith.select %128, %85, %129 : vector<16x32xi1>, vector<16x32xf32>
    %cst_49 = arith.constant dense<0.000000e+00> : vector<16x16xf32>
    %131 = tpu.matmul %73, %126, %cst_49 {dimension_numbers = #tpu.dot_dimension_numbers<[1], [1], [0], [0], [0, 0, 1, 0], [], []>} : vector<16x32xf32>, vector<16x32xf32>, vector<16x16xf32> -> vector<16x16xf32>
    %cst_50 = arith.constant 0.353553385 : f32
    %132 = vector.broadcast %cst_50 : f32 to vector<16x16xf32>
    %133 = arith.mulf %131, %132 : vector<16x16xf32>
    %c1_51 = arith.constant 1 : index
    %c0_52 = arith.constant 0 : index
    %c0_53 = arith.constant 0 : index
    %134 = vector.load %arg3[%c1_51, %c0_52, %c0_53] : memref<4x16x16xf32, #tpu.memory_space<vmem>>, vector<1x16x16xf32>
    %135 = vector.shape_cast %134 : vector<1x16x16xf32> to vector<16x16xf32>
    %136 = arith.addf %133, %135 : vector<16x16xf32>
    %cst_54 = arith.constant dense<0xFF800000> : vector<16xf32>
    %137 = vector.multi_reduction <maximumf>, %136, %cst_54 [1] : vector<16x16xf32> to vector<16xf32>
    %138 = vector.shape_cast %137 : vector<16xf32> to vector<16x1xf32>
    %139 = vector.broadcast %138 : vector<16x1xf32> to vector<16x16xf32>
    %140 = arith.subf %136, %139 : vector<16x16xf32>
    %141 = math.exp %140 : vector<16x16xf32>
    %cst_55 = arith.constant dense<0.000000e+00> : vector<16xf32>
    %142 = vector.multi_reduction <add>, %141, %cst_55 [1] : vector<16x16xf32> to vector<16xf32>
    %143 = vector.shape_cast %142 : vector<16xf32> to vector<16x1xf32>
    %144 = tpu.reciprocal %143 {approx = true} : vector<16x1xf32> -> vector<16x1xf32>
    %145 = vector.broadcast %144 : vector<16x1xf32> to vector<16x16xf32>
    %146 = arith.mulf %141, %145 : vector<16x16xf32>
    %cst_56 = arith.constant dense<0.000000e+00> : vector<16x32xf32>
    %147 = tpu.matmul %146, %130, %cst_56 {dimension_numbers = #tpu.dot_dimension_numbers<[1], [0], [0], [1], [0, 0, 1, 1], [], []>} : vector<16x16xf32>, vector<16x32xf32>, vector<16x32xf32> -> vector<16x32xf32>
    %148 = arith.addf %117, %147 : vector<16x32xf32>
    %c16_i32_57 = arith.constant 16 : i32
    %149 = vector.broadcast %c16_i32_57 : i32 to vector<1x32xi32>
    %150 = arith.cmpi sge, %3, %149 : vector<1x32xi32>
    %c24_i32 = arith.constant 24 : i32
    %151 = vector.broadcast %c24_i32 : i32 to vector<1x32xi32>
    %152 = arith.cmpi slt, %3, %151 : vector<1x32xi32>
    %153 = arith.andi %150, %152 : vector<1x32xi1>
    %cst_58 = arith.constant 0.000000e+00 : f32
    %154 = vector.shape_cast %153 : vector<1x32xi1> to vector<1x32xi1>
    %155 = vector.broadcast %154 : vector<1x32xi1> to vector<16x32xi1>
    %156 = vector.broadcast %cst_58 : f32 to vector<16x32xf32>
    %157 = arith.select %155, %79, %156 : vector<16x32xi1>, vector<16x32xf32>
    %cst_59 = arith.constant 0.000000e+00 : f32
    %158 = vector.shape_cast %153 : vector<1x32xi1> to vector<1x32xi1>
    %159 = vector.broadcast %158 : vector<1x32xi1> to vector<16x32xi1>
    %160 = vector.broadcast %cst_59 : f32 to vector<16x32xf32>
    %161 = arith.select %159, %85, %160 : vector<16x32xi1>, vector<16x32xf32>
    %cst_60 = arith.constant dense<0.000000e+00> : vector<16x16xf32>
    %162 = tpu.matmul %73, %157, %cst_60 {dimension_numbers = #tpu.dot_dimension_numbers<[1], [1], [0], [0], [0, 0, 1, 0], [], []>} : vector<16x32xf32>, vector<16x32xf32>, vector<16x16xf32> -> vector<16x16xf32>
    %cst_61 = arith.constant 0.353553385 : f32
    %163 = vector.broadcast %cst_61 : f32 to vector<16x16xf32>
    %164 = arith.mulf %162, %163 : vector<16x16xf32>
    %c2_62 = arith.constant 2 : index
    %c0_63 = arith.constant 0 : index
    %c0_64 = arith.constant 0 : index
    %165 = vector.load %arg3[%c2_62, %c0_63, %c0_64] : memref<4x16x16xf32, #tpu.memory_space<vmem>>, vector<1x16x16xf32>
    %166 = vector.shape_cast %165 : vector<1x16x16xf32> to vector<16x16xf32>
    %167 = arith.addf %164, %166 : vector<16x16xf32>
    %cst_65 = arith.constant dense<0xFF800000> : vector<16xf32>
    %168 = vector.multi_reduction <maximumf>, %167, %cst_65 [1] : vector<16x16xf32> to vector<16xf32>
    %169 = vector.shape_cast %168 : vector<16xf32> to vector<16x1xf32>
    %170 = vector.broadcast %169 : vector<16x1xf32> to vector<16x16xf32>
    %171 = arith.subf %167, %170 : vector<16x16xf32>
    %172 = math.exp %171 : vector<16x16xf32>
    %cst_66 = arith.constant dense<0.000000e+00> : vector<16xf32>
    %173 = vector.multi_reduction <add>, %172, %cst_66 [1] : vector<16x16xf32> to vector<16xf32>
    %174 = vector.shape_cast %173 : vector<16xf32> to vector<16x1xf32>
    %175 = tpu.reciprocal %174 {approx = true} : vector<16x1xf32> -> vector<16x1xf32>
    %176 = vector.broadcast %175 : vector<16x1xf32> to vector<16x16xf32>
    %177 = arith.mulf %172, %176 : vector<16x16xf32>
    %cst_67 = arith.constant dense<0.000000e+00> : vector<16x32xf32>
    %178 = tpu.matmul %177, %161, %cst_67 {dimension_numbers = #tpu.dot_dimension_numbers<[1], [0], [0], [1], [0, 0, 1, 1], [], []>} : vector<16x16xf32>, vector<16x32xf32>, vector<16x32xf32> -> vector<16x32xf32>
    %179 = arith.addf %148, %178 : vector<16x32xf32>
    %c24_i32_68 = arith.constant 24 : i32
    %180 = vector.broadcast %c24_i32_68 : i32 to vector<1x32xi32>
    %181 = arith.cmpi sge, %3, %180 : vector<1x32xi32>
    %c32_i32 = arith.constant 32 : i32
    %182 = vector.broadcast %c32_i32 : i32 to vector<1x32xi32>
    %183 = arith.cmpi slt, %3, %182 : vector<1x32xi32>
    %184 = arith.andi %181, %183 : vector<1x32xi1>
    %cst_69 = arith.constant 0.000000e+00 : f32
    %185 = vector.shape_cast %184 : vector<1x32xi1> to vector<1x32xi1>
    %186 = vector.broadcast %185 : vector<1x32xi1> to vector<16x32xi1>
    %187 = vector.broadcast %cst_69 : f32 to vector<16x32xf32>
    %188 = arith.select %186, %79, %187 : vector<16x32xi1>, vector<16x32xf32>
    %cst_70 = arith.constant 0.000000e+00 : f32
    %189 = vector.shape_cast %184 : vector<1x32xi1> to vector<1x32xi1>
    %190 = vector.broadcast %189 : vector<1x32xi1> to vector<16x32xi1>
    %191 = vector.broadcast %cst_70 : f32 to vector<16x32xf32>
    %192 = arith.select %190, %85, %191 : vector<16x32xi1>, vector<16x32xf32>
    %cst_71 = arith.constant dense<0.000000e+00> : vector<16x16xf32>
    %193 = tpu.matmul %73, %188, %cst_71 {dimension_numbers = #tpu.dot_dimension_numbers<[1], [1], [0], [0], [0, 0, 1, 0], [], []>} : vector<16x32xf32>, vector<16x32xf32>, vector<16x16xf32> -> vector<16x16xf32>
    %cst_72 = arith.constant 0.353553385 : f32
    %194 = vector.broadcast %cst_72 : f32 to vector<16x16xf32>
    %195 = arith.mulf %193, %194 : vector<16x16xf32>
    %c3 = arith.constant 3 : index
    %c0_73 = arith.constant 0 : index
    %c0_74 = arith.constant 0 : index
    %196 = vector.load %arg3[%c3, %c0_73, %c0_74] : memref<4x16x16xf32, #tpu.memory_space<vmem>>, vector<1x16x16xf32>
    %197 = vector.shape_cast %196 : vector<1x16x16xf32> to vector<16x16xf32>
    %198 = arith.addf %195, %197 : vector<16x16xf32>
    %cst_75 = arith.constant dense<0xFF800000> : vector<16xf32>
    %199 = vector.multi_reduction <maximumf>, %198, %cst_75 [1] : vector<16x16xf32> to vector<16xf32>
    %200 = vector.shape_cast %199 : vector<16xf32> to vector<16x1xf32>
    %201 = vector.broadcast %200 : vector<16x1xf32> to vector<16x16xf32>
    %202 = arith.subf %198, %201 : vector<16x16xf32>
    %203 = math.exp %202 : vector<16x16xf32>
    %cst_76 = arith.constant dense<0.000000e+00> : vector<16xf32>
    %204 = vector.multi_reduction <add>, %203, %cst_76 [1] : vector<16x16xf32> to vector<16xf32>
    %205 = vector.shape_cast %204 : vector<16xf32> to vector<16x1xf32>
    %206 = tpu.reciprocal %205 {approx = true} : vector<16x1xf32> -> vector<16x1xf32>
    %207 = vector.broadcast %206 : vector<16x1xf32> to vector<16x16xf32>
    %208 = arith.mulf %203, %207 : vector<16x16xf32>
    %cst_77 = arith.constant dense<0.000000e+00> : vector<16x32xf32>
    %209 = tpu.matmul %208, %192, %cst_77 {dimension_numbers = #tpu.dot_dimension_numbers<[1], [0], [0], [1], [0, 0, 1, 1], [], []>} : vector<16x16xf32>, vector<16x32xf32>, vector<16x32xf32> -> vector<16x32xf32>
    %210 = arith.addf %179, %209 : vector<16x32xf32>
    %c0_78 = arith.constant 0 : index
    %c3_79 = arith.constant 3 : index
    %c0_80 = arith.constant 0 : index
    %c0_81 = arith.constant 0 : index
    %211 = vector.load %arg4[%c0_78, %c3_79, %c0_80, %c0_81] : memref<2x4x32x32xf32, #tpu.memory_space<vmem>>, vector<1x1x32x32xf32>
    %212 = vector.shape_cast %211 : vector<1x1x32x32xf32> to vector<32x32xf32>
    %cst_82 = arith.constant dense<0.000000e+00> : vector<16x32xf32>
    %213 = tpu.matmul %210, %212, %cst_82 {dimension_numbers = #tpu.dot_dimension_numbers<[1], [0], [0], [1], [0, 0, 1, 1], [], []>} : vector<16x32xf32>, vector<32x32xf32>, vector<16x32xf32> -> vector<16x32xf32>
    %214 = vector.extract_strided_slice %5 {offsets = [5, 0], sizes = [1, 32], strides = [1, 1]} : vector<11x32xf32> to vector<1x32xf32>
    %215 = vector.broadcast %214 : vector<1x32xf32> to vector<16x32xf32>
    %216 = arith.addf %213, %215 : vector<16x32xf32>
    %c0_83 = arith.constant 0 : index
    %c0_84 = arith.constant 0 : index
    %c0_85 = arith.constant 0 : index
    %c0_86 = arith.constant 0 : index
    %217 = vector.load %arg5[%c0_83, %c0_84, %c0_85, %c0_86] : memref<2x2x32x96xf32, #tpu.memory_space<vmem>>, vector<1x1x32x96xf32>
    %218 = vector.shape_cast %217 : vector<1x1x32x96xf32> to vector<32x96xf32>
    %c0_87 = arith.constant 0 : index
    %c0_88 = arith.constant 0 : index
    %c0_89 = arith.constant 0 : index
    %c0_90 = arith.constant 0 : index
    %219 = vector.load %arg6[%c0_87, %c0_88, %c0_89, %c0_90] : memref<2x2x32x64xf32, #tpu.memory_space<vmem>>, vector<1x1x32x64xf32>
    %220 = vector.shape_cast %219 : vector<1x1x32x64xf32> to vector<32x64xf32>
    %c0_91 = arith.constant 0 : index
    %c0_92 = arith.constant 0 : index
    %c0_93 = arith.constant 0 : index
    %c0_94 = arith.constant 0 : index
    %221 = vector.load %arg7[%c0_91, %c0_92, %c0_93, %c0_94] : memref<2x2x32x32xf32, #tpu.memory_space<vmem>>, vector<1x1x32x32xf32>
    %222 = vector.shape_cast %221 : vector<1x1x32x32xf32> to vector<32x32xf32>
    %223 = vector.extract_strided_slice %5 {offsets = [6, 0], sizes = [1, 32], strides = [1, 1]} : vector<11x32xf32> to vector<1x32xf32>
    %cst_95 = arith.constant dense<0.000000e+00> : vector<16x96xf32>
    %224 = tpu.matmul %216, %218, %cst_95 {dimension_numbers = #tpu.dot_dimension_numbers<[1], [0], [0], [1], [0, 0, 1, 1], [], []>} : vector<16x32xf32>, vector<32x96xf32>, vector<16x96xf32> -> vector<16x96xf32>
    %cst_96 = arith.constant dense<0.000000e+00> : vector<16x64xf32>
    %225 = tpu.matmul %0, %220, %cst_96 {dimension_numbers = #tpu.dot_dimension_numbers<[1], [0], [0], [1], [0, 0, 1, 1], [], []>} : vector<16x32xf32>, vector<32x64xf32>, vector<16x64xf32> -> vector<16x64xf32>
    %226 = vector.extract_strided_slice %224 {offsets = [0, 0], sizes = [16, 32], strides = [1, 1]} : vector<16x96xf32> to vector<16x32xf32>
    %227 = vector.extract_strided_slice %225 {offsets = [0, 0], sizes = [16, 32], strides = [1, 1]} : vector<16x64xf32> to vector<16x32xf32>
    %228 = arith.addf %226, %227 : vector<16x32xf32>
    %cst_97 = arith.constant 5.000000e-01 : f32
    %229 = vector.broadcast %cst_97 : f32 to vector<16x32xf32>
    %230 = arith.mulf %229, %228 : vector<16x32xf32>
    %231 = math.tanh %230 : vector<16x32xf32>
    %cst_98 = arith.constant 1.000000e+00 : f32
    %232 = vector.broadcast %cst_98 : f32 to vector<16x32xf32>
    %233 = arith.addf %231, %232 : vector<16x32xf32>
    %cst_99 = arith.constant 5.000000e-01 : f32
    %234 = vector.broadcast %cst_99 : f32 to vector<16x32xf32>
    %235 = arith.mulf %234, %233 : vector<16x32xf32>
    %236 = vector.extract_strided_slice %224 {offsets = [0, 32], sizes = [16, 32], strides = [1, 1]} : vector<16x96xf32> to vector<16x32xf32>
    %237 = vector.extract_strided_slice %225 {offsets = [0, 32], sizes = [16, 32], strides = [1, 1]} : vector<16x64xf32> to vector<16x32xf32>
    %238 = arith.addf %236, %237 : vector<16x32xf32>
    %239 = vector.broadcast %223 : vector<1x32xf32> to vector<16x32xf32>
    %240 = arith.subf %238, %239 : vector<16x32xf32>
    %cst_100 = arith.constant 5.000000e-01 : f32
    %241 = vector.broadcast %cst_100 : f32 to vector<16x32xf32>
    %242 = arith.mulf %241, %240 : vector<16x32xf32>
    %243 = math.tanh %242 : vector<16x32xf32>
    %cst_101 = arith.constant 1.000000e+00 : f32
    %244 = vector.broadcast %cst_101 : f32 to vector<16x32xf32>
    %245 = arith.addf %243, %244 : vector<16x32xf32>
    %cst_102 = arith.constant 5.000000e-01 : f32
    %246 = vector.broadcast %cst_102 : f32 to vector<16x32xf32>
    %247 = arith.mulf %246, %245 : vector<16x32xf32>
    %248 = vector.extract_strided_slice %224 {offsets = [0, 64], sizes = [16, 32], strides = [1, 1]} : vector<16x96xf32> to vector<16x32xf32>
    %249 = arith.mulf %0, %235 : vector<16x32xf32>
    %cst_103 = arith.constant dense<0.000000e+00> : vector<16x32xf32>
    %250 = tpu.matmul %249, %222, %cst_103 {dimension_numbers = #tpu.dot_dimension_numbers<[1], [0], [0], [1], [0, 0, 1, 1], [], []>} : vector<16x32xf32>, vector<32x32xf32>, vector<16x32xf32> -> vector<16x32xf32>
    %251 = arith.addf %248, %250 : vector<16x32xf32>
    %252 = math.tanh %251 : vector<16x32xf32>
    %cst_104 = arith.constant 1.000000e+00 : f32
    %253 = vector.broadcast %cst_104 : f32 to vector<16x32xf32>
    %254 = arith.subf %253, %247 : vector<16x32xf32>
    %255 = arith.mulf %254, %0 : vector<16x32xf32>
    %256 = arith.mulf %247, %252 : vector<16x32xf32>
    %257 = arith.addf %255, %256 : vector<16x32xf32>
    %258 = vector.extract_strided_slice %5 {offsets = [7, 0], sizes = [1, 32], strides = [1, 1]} : vector<11x32xf32> to vector<1x32xf32>
    %259 = vector.extract_strided_slice %5 {offsets = [8, 0], sizes = [1, 32], strides = [1, 1]} : vector<11x32xf32> to vector<1x32xf32>
    %cst_105 = arith.constant dense<0.000000e+00> : vector<16xf32>
    %260 = vector.multi_reduction <add>, %257, %cst_105 [1] : vector<16x32xf32> to vector<16xf32>
    %261 = vector.shape_cast %260 : vector<16xf32> to vector<16x1xf32>
    %cst_106 = arith.constant 3.200000e+01 : f32
    %262 = vector.broadcast %cst_106 : f32 to vector<16x1xf32>
    %263 = arith.divf %261, %262 : vector<16x1xf32>
    %264 = vector.broadcast %263 : vector<16x1xf32> to vector<16x32xf32>
    %265 = arith.subf %257, %264 : vector<16x32xf32>
    %266 = arith.mulf %265, %265 : vector<16x32xf32>
    %cst_107 = arith.constant dense<0.000000e+00> : vector<16xf32>
    %267 = vector.multi_reduction <add>, %266, %cst_107 [1] : vector<16x32xf32> to vector<16xf32>
    %268 = vector.shape_cast %267 : vector<16xf32> to vector<16x1xf32>
    %cst_108 = arith.constant 3.200000e+01 : f32
    %269 = vector.broadcast %cst_108 : f32 to vector<16x1xf32>
    %270 = arith.divf %268, %269 : vector<16x1xf32>
    %cst_109 = arith.constant 9.99999974E-6 : f32
    %271 = vector.broadcast %cst_109 : f32 to vector<16x1xf32>
    %272 = arith.addf %270, %271 : vector<16x1xf32>
    %273 = math.rsqrt %272 : vector<16x1xf32>
    %274 = vector.broadcast %273 : vector<16x1xf32> to vector<16x32xf32>
    %275 = arith.mulf %265, %274 : vector<16x32xf32>
    %276 = vector.broadcast %258 : vector<1x32xf32> to vector<16x32xf32>
    %277 = arith.mulf %275, %276 : vector<16x32xf32>
    %278 = vector.broadcast %259 : vector<1x32xf32> to vector<16x32xf32>
    %279 = arith.addf %277, %278 : vector<16x32xf32>
    %c0_110 = arith.constant 0 : index
    %c0_111 = arith.constant 0 : index
    %c0_112 = arith.constant 0 : index
    %280 = vector.load %arg8[%c0_110, %c0_111, %c0_112] : memref<2x32x64xf32, #tpu.memory_space<vmem>>, vector<1x32x64xf32>
    %281 = vector.shape_cast %280 : vector<1x32x64xf32> to vector<32x64xf32>
    %cst_113 = arith.constant dense<0.000000e+00> : vector<16x64xf32>
    %282 = tpu.matmul %279, %281, %cst_113 {dimension_numbers = #tpu.dot_dimension_numbers<[1], [0], [0], [1], [0, 0, 1, 1], [], []>} : vector<16x32xf32>, vector<32x64xf32>, vector<16x64xf32> -> vector<16x64xf32>
    %c0_114 = arith.constant 0 : index
    %c0_115 = arith.constant 0 : index
    %c0_116 = arith.constant 0 : index
    %283 = vector.load %arg9[%c0_114, %c0_115, %c0_116] : memref<2x1x64xf32, #tpu.memory_space<vmem>>, vector<1x1x64xf32>
    %284 = vector.shape_cast %283 : vector<1x1x64xf32> to vector<1x64xf32>
    %285 = vector.broadcast %284 : vector<1x64xf32> to vector<16x64xf32>
    %286 = arith.addf %282, %285 : vector<16x64xf32>
    %cst_117 = arith.constant 5.000000e-01 : f32
    %287 = vector.broadcast %cst_117 : f32 to vector<16x64xf32>
    %288 = arith.mulf %287, %286 : vector<16x64xf32>
    %cst_118 = arith.constant 4.471500e-02 : f32
    %289 = vector.broadcast %cst_118 : f32 to vector<16x64xf32>
    %290 = arith.mulf %289, %286 : vector<16x64xf32>
    %291 = arith.mulf %290, %286 : vector<16x64xf32>
    %292 = arith.mulf %291, %286 : vector<16x64xf32>
    %293 = arith.addf %286, %292 : vector<16x64xf32>
    %cst_119 = arith.constant 0.797884583 : f32
    %294 = vector.broadcast %cst_119 : f32 to vector<16x64xf32>
    %295 = arith.mulf %294, %293 : vector<16x64xf32>
    %296 = math.tanh %295 : vector<16x64xf32>
    %cst_120 = arith.constant 1.000000e+00 : f32
    %297 = vector.broadcast %cst_120 : f32 to vector<16x64xf32>
    %298 = arith.addf %297, %296 : vector<16x64xf32>
    %299 = arith.mulf %288, %298 : vector<16x64xf32>
    %c0_121 = arith.constant 0 : index
    %c0_122 = arith.constant 0 : index
    %c0_123 = arith.constant 0 : index
    %300 = vector.load %arg10[%c0_121, %c0_122, %c0_123] : memref<2x64x32xf32, #tpu.memory_space<vmem>>, vector<1x64x32xf32>
    %301 = vector.shape_cast %300 : vector<1x64x32xf32> to vector<64x32xf32>
    %cst_124 = arith.constant dense<0.000000e+00> : vector<16x32xf32>
    %302 = tpu.matmul %299, %301, %cst_124 {dimension_numbers = #tpu.dot_dimension_numbers<[1], [0], [0], [1], [0, 0, 1, 1], [], []>} : vector<16x64xf32>, vector<64x32xf32>, vector<16x32xf32> -> vector<16x32xf32>
    %303 = vector.extract_strided_slice %5 {offsets = [9, 0], sizes = [1, 32], strides = [1, 1]} : vector<11x32xf32> to vector<1x32xf32>
    %304 = vector.broadcast %303 : vector<1x32xf32> to vector<16x32xf32>
    %305 = arith.addf %302, %304 : vector<16x32xf32>
    %c0_125 = arith.constant 0 : index
    %c1_126 = arith.constant 1 : index
    %c0_127 = arith.constant 0 : index
    %c0_128 = arith.constant 0 : index
    %306 = vector.load %arg5[%c0_125, %c1_126, %c0_127, %c0_128] : memref<2x2x32x96xf32, #tpu.memory_space<vmem>>, vector<1x1x32x96xf32>
    %307 = vector.shape_cast %306 : vector<1x1x32x96xf32> to vector<32x96xf32>
    %c0_129 = arith.constant 0 : index
    %c1_130 = arith.constant 1 : index
    %c0_131 = arith.constant 0 : index
    %c0_132 = arith.constant 0 : index
    %308 = vector.load %arg6[%c0_129, %c1_130, %c0_131, %c0_132] : memref<2x2x32x64xf32, #tpu.memory_space<vmem>>, vector<1x1x32x64xf32>
    %309 = vector.shape_cast %308 : vector<1x1x32x64xf32> to vector<32x64xf32>
    %c0_133 = arith.constant 0 : index
    %c1_134 = arith.constant 1 : index
    %c0_135 = arith.constant 0 : index
    %c0_136 = arith.constant 0 : index
    %310 = vector.load %arg7[%c0_133, %c1_134, %c0_135, %c0_136] : memref<2x2x32x32xf32, #tpu.memory_space<vmem>>, vector<1x1x32x32xf32>
    %311 = vector.shape_cast %310 : vector<1x1x32x32xf32> to vector<32x32xf32>
    %312 = vector.extract_strided_slice %5 {offsets = [10, 0], sizes = [1, 32], strides = [1, 1]} : vector<11x32xf32> to vector<1x32xf32>
    %cst_137 = arith.constant dense<0.000000e+00> : vector<16x96xf32>
    %313 = tpu.matmul %305, %307, %cst_137 {dimension_numbers = #tpu.dot_dimension_numbers<[1], [0], [0], [1], [0, 0, 1, 1], [], []>} : vector<16x32xf32>, vector<32x96xf32>, vector<16x96xf32> -> vector<16x96xf32>
    %cst_138 = arith.constant dense<0.000000e+00> : vector<16x64xf32>
    %314 = tpu.matmul %257, %309, %cst_138 {dimension_numbers = #tpu.dot_dimension_numbers<[1], [0], [0], [1], [0, 0, 1, 1], [], []>} : vector<16x32xf32>, vector<32x64xf32>, vector<16x64xf32> -> vector<16x64xf32>
    %315 = vector.extract_strided_slice %313 {offsets = [0, 0], sizes = [16, 32], strides = [1, 1]} : vector<16x96xf32> to vector<16x32xf32>
    %316 = vector.extract_strided_slice %314 {offsets = [0, 0], sizes = [16, 32], strides = [1, 1]} : vector<16x64xf32> to vector<16x32xf32>
    %317 = arith.addf %315, %316 : vector<16x32xf32>
    %cst_139 = arith.constant 5.000000e-01 : f32
    %318 = vector.broadcast %cst_139 : f32 to vector<16x32xf32>
    %319 = arith.mulf %318, %317 : vector<16x32xf32>
    %320 = math.tanh %319 : vector<16x32xf32>
    %cst_140 = arith.constant 1.000000e+00 : f32
    %321 = vector.broadcast %cst_140 : f32 to vector<16x32xf32>
    %322 = arith.addf %320, %321 : vector<16x32xf32>
    %cst_141 = arith.constant 5.000000e-01 : f32
    %323 = vector.broadcast %cst_141 : f32 to vector<16x32xf32>
    %324 = arith.mulf %323, %322 : vector<16x32xf32>
    %325 = vector.extract_strided_slice %313 {offsets = [0, 32], sizes = [16, 32], strides = [1, 1]} : vector<16x96xf32> to vector<16x32xf32>
    %326 = vector.extract_strided_slice %314 {offsets = [0, 32], sizes = [16, 32], strides = [1, 1]} : vector<16x64xf32> to vector<16x32xf32>
    %327 = arith.addf %325, %326 : vector<16x32xf32>
    %328 = vector.broadcast %312 : vector<1x32xf32> to vector<16x32xf32>
    %329 = arith.subf %327, %328 : vector<16x32xf32>
    %cst_142 = arith.constant 5.000000e-01 : f32
    %330 = vector.broadcast %cst_142 : f32 to vector<16x32xf32>
    %331 = arith.mulf %330, %329 : vector<16x32xf32>
    %332 = math.tanh %331 : vector<16x32xf32>
    %cst_143 = arith.constant 1.000000e+00 : f32
    %333 = vector.broadcast %cst_143 : f32 to vector<16x32xf32>
    %334 = arith.addf %332, %333 : vector<16x32xf32>
    %cst_144 = arith.constant 5.000000e-01 : f32
    %335 = vector.broadcast %cst_144 : f32 to vector<16x32xf32>
    %336 = arith.mulf %335, %334 : vector<16x32xf32>
    %337 = vector.extract_strided_slice %313 {offsets = [0, 64], sizes = [16, 32], strides = [1, 1]} : vector<16x96xf32> to vector<16x32xf32>
    %338 = arith.mulf %257, %324 : vector<16x32xf32>
    %cst_145 = arith.constant dense<0.000000e+00> : vector<16x32xf32>
    %339 = tpu.matmul %338, %311, %cst_145 {dimension_numbers = #tpu.dot_dimension_numbers<[1], [0], [0], [1], [0, 0, 1, 1], [], []>} : vector<16x32xf32>, vector<32x32xf32>, vector<16x32xf32> -> vector<16x32xf32>
    %340 = arith.addf %337, %339 : vector<16x32xf32>
    %341 = math.tanh %340 : vector<16x32xf32>
    %cst_146 = arith.constant 1.000000e+00 : f32
    %342 = vector.broadcast %cst_146 : f32 to vector<16x32xf32>
    %343 = arith.subf %342, %336 : vector<16x32xf32>
    %344 = arith.mulf %343, %257 : vector<16x32xf32>
    %345 = arith.mulf %336, %341 : vector<16x32xf32>
    %346 = arith.addf %344, %345 : vector<16x32xf32>
    %c1_147 = arith.constant 1 : index
    %c0_148 = arith.constant 0 : index
    %c0_149 = arith.constant 0 : index
    %347 = vector.load %arg11[%c1_147, %c0_148, %c0_149] : memref<2x11x32xf32, #tpu.memory_space<vmem>>, vector<1x11x32xf32>
    %348 = vector.shape_cast %347 : vector<1x11x32xf32> to vector<11x32xf32>
    %349 = vector.extract_strided_slice %348 {offsets = [0, 0], sizes = [1, 32], strides = [1, 1]} : vector<11x32xf32> to vector<1x32xf32>
    %350 = vector.extract_strided_slice %348 {offsets = [1, 0], sizes = [1, 32], strides = [1, 1]} : vector<11x32xf32> to vector<1x32xf32>
    %cst_150 = arith.constant dense<0.000000e+00> : vector<16xf32>
    %351 = vector.multi_reduction <add>, %346, %cst_150 [1] : vector<16x32xf32> to vector<16xf32>
    %352 = vector.shape_cast %351 : vector<16xf32> to vector<16x1xf32>
    %cst_151 = arith.constant 3.200000e+01 : f32
    %353 = vector.broadcast %cst_151 : f32 to vector<16x1xf32>
    %354 = arith.divf %352, %353 : vector<16x1xf32>
    %355 = vector.broadcast %354 : vector<16x1xf32> to vector<16x32xf32>
    %356 = arith.subf %346, %355 : vector<16x32xf32>
    %357 = arith.mulf %356, %356 : vector<16x32xf32>
    %cst_152 = arith.constant dense<0.000000e+00> : vector<16xf32>
    %358 = vector.multi_reduction <add>, %357, %cst_152 [1] : vector<16x32xf32> to vector<16xf32>
    %359 = vector.shape_cast %358 : vector<16xf32> to vector<16x1xf32>
    %cst_153 = arith.constant 3.200000e+01 : f32
    %360 = vector.broadcast %cst_153 : f32 to vector<16x1xf32>
    %361 = arith.divf %359, %360 : vector<16x1xf32>
    %cst_154 = arith.constant 9.99999974E-6 : f32
    %362 = vector.broadcast %cst_154 : f32 to vector<16x1xf32>
    %363 = arith.addf %361, %362 : vector<16x1xf32>
    %364 = math.rsqrt %363 : vector<16x1xf32>
    %365 = vector.broadcast %364 : vector<16x1xf32> to vector<16x32xf32>
    %366 = arith.mulf %356, %365 : vector<16x32xf32>
    %367 = vector.broadcast %349 : vector<1x32xf32> to vector<16x32xf32>
    %368 = arith.mulf %366, %367 : vector<16x32xf32>
    %369 = vector.broadcast %350 : vector<1x32xf32> to vector<16x32xf32>
    %370 = arith.addf %368, %369 : vector<16x32xf32>
    %cst_155 = arith.constant dense<0.000000e+00> : vector<16xf32>
    %371 = vector.multi_reduction <add>, %1, %cst_155 [1] : vector<16x32xf32> to vector<16xf32>
    %372 = vector.shape_cast %371 : vector<16xf32> to vector<16x1xf32>
    %cst_156 = arith.constant 3.200000e+01 : f32
    %373 = vector.broadcast %cst_156 : f32 to vector<16x1xf32>
    %374 = arith.divf %372, %373 : vector<16x1xf32>
    %375 = vector.broadcast %374 : vector<16x1xf32> to vector<16x32xf32>
    %376 = arith.subf %1, %375 : vector<16x32xf32>
    %377 = arith.mulf %376, %376 : vector<16x32xf32>
    %cst_157 = arith.constant dense<0.000000e+00> : vector<16xf32>
    %378 = vector.multi_reduction <add>, %377, %cst_157 [1] : vector<16x32xf32> to vector<16xf32>
    %379 = vector.shape_cast %378 : vector<16xf32> to vector<16x1xf32>
    %cst_158 = arith.constant 3.200000e+01 : f32
    %380 = vector.broadcast %cst_158 : f32 to vector<16x1xf32>
    %381 = arith.divf %379, %380 : vector<16x1xf32>
    %cst_159 = arith.constant 9.99999974E-6 : f32
    %382 = vector.broadcast %cst_159 : f32 to vector<16x1xf32>
    %383 = arith.addf %381, %382 : vector<16x1xf32>
    %384 = math.rsqrt %383 : vector<16x1xf32>
    %385 = vector.broadcast %384 : vector<16x1xf32> to vector<16x32xf32>
    %386 = arith.mulf %376, %385 : vector<16x32xf32>
    %387 = vector.broadcast %349 : vector<1x32xf32> to vector<16x32xf32>
    %388 = arith.mulf %386, %387 : vector<16x32xf32>
    %389 = vector.broadcast %350 : vector<1x32xf32> to vector<16x32xf32>
    %390 = arith.addf %388, %389 : vector<16x32xf32>
    %cst_160 = arith.constant dense<0.000000e+00> : vector<16xf32>
    %391 = vector.multi_reduction <add>, %2, %cst_160 [1] : vector<16x32xf32> to vector<16xf32>
    %392 = vector.shape_cast %391 : vector<16xf32> to vector<16x1xf32>
    %cst_161 = arith.constant 3.200000e+01 : f32
    %393 = vector.broadcast %cst_161 : f32 to vector<16x1xf32>
    %394 = arith.divf %392, %393 : vector<16x1xf32>
    %395 = vector.broadcast %394 : vector<16x1xf32> to vector<16x32xf32>
    %396 = arith.subf %2, %395 : vector<16x32xf32>
    %397 = arith.mulf %396, %396 : vector<16x32xf32>
    %cst_162 = arith.constant dense<0.000000e+00> : vector<16xf32>
    %398 = vector.multi_reduction <add>, %397, %cst_162 [1] : vector<16x32xf32> to vector<16xf32>
    %399 = vector.shape_cast %398 : vector<16xf32> to vector<16x1xf32>
    %cst_163 = arith.constant 3.200000e+01 : f32
    %400 = vector.broadcast %cst_163 : f32 to vector<16x1xf32>
    %401 = arith.divf %399, %400 : vector<16x1xf32>
    %cst_164 = arith.constant 9.99999974E-6 : f32
    %402 = vector.broadcast %cst_164 : f32 to vector<16x1xf32>
    %403 = arith.addf %401, %402 : vector<16x1xf32>
    %404 = math.rsqrt %403 : vector<16x1xf32>
    %405 = vector.broadcast %404 : vector<16x1xf32> to vector<16x32xf32>
    %406 = arith.mulf %396, %405 : vector<16x32xf32>
    %407 = vector.broadcast %349 : vector<1x32xf32> to vector<16x32xf32>
    %408 = arith.mulf %406, %407 : vector<16x32xf32>
    %409 = vector.broadcast %350 : vector<1x32xf32> to vector<16x32xf32>
    %410 = arith.addf %408, %409 : vector<16x32xf32>
    %c1_165 = arith.constant 1 : index
    %c0_166 = arith.constant 0 : index
    %c0_167 = arith.constant 0 : index
    %c0_168 = arith.constant 0 : index
    %411 = vector.load %arg4[%c1_165, %c0_166, %c0_167, %c0_168] : memref<2x4x32x32xf32, #tpu.memory_space<vmem>>, vector<1x1x32x32xf32>
    %412 = vector.shape_cast %411 : vector<1x1x32x32xf32> to vector<32x32xf32>
    %cst_169 = arith.constant dense<0.000000e+00> : vector<16x32xf32>
    %413 = tpu.matmul %370, %412, %cst_169 {dimension_numbers = #tpu.dot_dimension_numbers<[1], [0], [0], [1], [0, 0, 1, 1], [], []>} : vector<16x32xf32>, vector<32x32xf32>, vector<16x32xf32> -> vector<16x32xf32>
    %414 = vector.extract_strided_slice %348 {offsets = [2, 0], sizes = [1, 32], strides = [1, 1]} : vector<11x32xf32> to vector<1x32xf32>
    %415 = vector.broadcast %414 : vector<1x32xf32> to vector<16x32xf32>
    %416 = arith.addf %413, %415 : vector<16x32xf32>
    %c1_170 = arith.constant 1 : index
    %c1_171 = arith.constant 1 : index
    %c0_172 = arith.constant 0 : index
    %c0_173 = arith.constant 0 : index
    %417 = vector.load %arg4[%c1_170, %c1_171, %c0_172, %c0_173] : memref<2x4x32x32xf32, #tpu.memory_space<vmem>>, vector<1x1x32x32xf32>
    %418 = vector.shape_cast %417 : vector<1x1x32x32xf32> to vector<32x32xf32>
    %cst_174 = arith.constant dense<0.000000e+00> : vector<16x32xf32>
    %419 = tpu.matmul %390, %418, %cst_174 {dimension_numbers = #tpu.dot_dimension_numbers<[1], [0], [0], [1], [0, 0, 1, 1], [], []>} : vector<16x32xf32>, vector<32x32xf32>, vector<16x32xf32> -> vector<16x32xf32>
    %420 = vector.extract_strided_slice %348 {offsets = [3, 0], sizes = [1, 32], strides = [1, 1]} : vector<11x32xf32> to vector<1x32xf32>
    %421 = vector.broadcast %420 : vector<1x32xf32> to vector<16x32xf32>
    %422 = arith.addf %419, %421 : vector<16x32xf32>
    %c1_175 = arith.constant 1 : index
    %c2_176 = arith.constant 2 : index
    %c0_177 = arith.constant 0 : index
    %c0_178 = arith.constant 0 : index
    %423 = vector.load %arg4[%c1_175, %c2_176, %c0_177, %c0_178] : memref<2x4x32x32xf32, #tpu.memory_space<vmem>>, vector<1x1x32x32xf32>
    %424 = vector.shape_cast %423 : vector<1x1x32x32xf32> to vector<32x32xf32>
    %cst_179 = arith.constant dense<0.000000e+00> : vector<16x32xf32>
    %425 = tpu.matmul %410, %424, %cst_179 {dimension_numbers = #tpu.dot_dimension_numbers<[1], [0], [0], [1], [0, 0, 1, 1], [], []>} : vector<16x32xf32>, vector<32x32xf32>, vector<16x32xf32> -> vector<16x32xf32>
    %426 = vector.extract_strided_slice %348 {offsets = [4, 0], sizes = [1, 32], strides = [1, 1]} : vector<11x32xf32> to vector<1x32xf32>
    %427 = vector.broadcast %426 : vector<1x32xf32> to vector<16x32xf32>
    %428 = arith.addf %425, %427 : vector<16x32xf32>
    %cst_180 = arith.constant 0.000000e+00 : f32
    %429 = vector.broadcast %cst_180 : f32 to vector<16x32xf32>
    %c0_i32_181 = arith.constant 0 : i32
    %430 = vector.broadcast %c0_i32_181 : i32 to vector<1x32xi32>
    %431 = arith.cmpi sge, %3, %430 : vector<1x32xi32>
    %c8_i32_182 = arith.constant 8 : i32
    %432 = vector.broadcast %c8_i32_182 : i32 to vector<1x32xi32>
    %433 = arith.cmpi slt, %3, %432 : vector<1x32xi32>
    %434 = arith.andi %431, %433 : vector<1x32xi1>
    %cst_183 = arith.constant 0.000000e+00 : f32
    %435 = vector.shape_cast %434 : vector<1x32xi1> to vector<1x32xi1>
    %436 = vector.broadcast %435 : vector<1x32xi1> to vector<16x32xi1>
    %437 = vector.broadcast %cst_183 : f32 to vector<16x32xf32>
    %438 = arith.select %436, %422, %437 : vector<16x32xi1>, vector<16x32xf32>
    %cst_184 = arith.constant 0.000000e+00 : f32
    %439 = vector.shape_cast %434 : vector<1x32xi1> to vector<1x32xi1>
    %440 = vector.broadcast %439 : vector<1x32xi1> to vector<16x32xi1>
    %441 = vector.broadcast %cst_184 : f32 to vector<16x32xf32>
    %442 = arith.select %440, %428, %441 : vector<16x32xi1>, vector<16x32xf32>
    %cst_185 = arith.constant dense<0.000000e+00> : vector<16x16xf32>
    %443 = tpu.matmul %416, %438, %cst_185 {dimension_numbers = #tpu.dot_dimension_numbers<[1], [1], [0], [0], [0, 0, 1, 0], [], []>} : vector<16x32xf32>, vector<16x32xf32>, vector<16x16xf32> -> vector<16x16xf32>
    %cst_186 = arith.constant 0.353553385 : f32
    %444 = vector.broadcast %cst_186 : f32 to vector<16x16xf32>
    %445 = arith.mulf %443, %444 : vector<16x16xf32>
    %c0_187 = arith.constant 0 : index
    %c0_188 = arith.constant 0 : index
    %c0_189 = arith.constant 0 : index
    %446 = vector.load %arg3[%c0_187, %c0_188, %c0_189] : memref<4x16x16xf32, #tpu.memory_space<vmem>>, vector<1x16x16xf32>
    %447 = vector.shape_cast %446 : vector<1x16x16xf32> to vector<16x16xf32>
    %448 = arith.addf %445, %447 : vector<16x16xf32>
    %cst_190 = arith.constant dense<0xFF800000> : vector<16xf32>
    %449 = vector.multi_reduction <maximumf>, %448, %cst_190 [1] : vector<16x16xf32> to vector<16xf32>
    %450 = vector.shape_cast %449 : vector<16xf32> to vector<16x1xf32>
    %451 = vector.broadcast %450 : vector<16x1xf32> to vector<16x16xf32>
    %452 = arith.subf %448, %451 : vector<16x16xf32>
    %453 = math.exp %452 : vector<16x16xf32>
    %cst_191 = arith.constant dense<0.000000e+00> : vector<16xf32>
    %454 = vector.multi_reduction <add>, %453, %cst_191 [1] : vector<16x16xf32> to vector<16xf32>
    %455 = vector.shape_cast %454 : vector<16xf32> to vector<16x1xf32>
    %456 = tpu.reciprocal %455 {approx = true} : vector<16x1xf32> -> vector<16x1xf32>
    %457 = vector.broadcast %456 : vector<16x1xf32> to vector<16x16xf32>
    %458 = arith.mulf %453, %457 : vector<16x16xf32>
    %cst_192 = arith.constant dense<0.000000e+00> : vector<16x32xf32>
    %459 = tpu.matmul %458, %442, %cst_192 {dimension_numbers = #tpu.dot_dimension_numbers<[1], [0], [0], [1], [0, 0, 1, 1], [], []>} : vector<16x16xf32>, vector<16x32xf32>, vector<16x32xf32> -> vector<16x32xf32>
    %460 = arith.addf %429, %459 : vector<16x32xf32>
    %c8_i32_193 = arith.constant 8 : i32
    %461 = vector.broadcast %c8_i32_193 : i32 to vector<1x32xi32>
    %462 = arith.cmpi sge, %3, %461 : vector<1x32xi32>
    %c16_i32_194 = arith.constant 16 : i32
    %463 = vector.broadcast %c16_i32_194 : i32 to vector<1x32xi32>
    %464 = arith.cmpi slt, %3, %463 : vector<1x32xi32>
    %465 = arith.andi %462, %464 : vector<1x32xi1>
    %cst_195 = arith.constant 0.000000e+00 : f32
    %466 = vector.shape_cast %465 : vector<1x32xi1> to vector<1x32xi1>
    %467 = vector.broadcast %466 : vector<1x32xi1> to vector<16x32xi1>
    %468 = vector.broadcast %cst_195 : f32 to vector<16x32xf32>
    %469 = arith.select %467, %422, %468 : vector<16x32xi1>, vector<16x32xf32>
    %cst_196 = arith.constant 0.000000e+00 : f32
    %470 = vector.shape_cast %465 : vector<1x32xi1> to vector<1x32xi1>
    %471 = vector.broadcast %470 : vector<1x32xi1> to vector<16x32xi1>
    %472 = vector.broadcast %cst_196 : f32 to vector<16x32xf32>
    %473 = arith.select %471, %428, %472 : vector<16x32xi1>, vector<16x32xf32>
    %cst_197 = arith.constant dense<0.000000e+00> : vector<16x16xf32>
    %474 = tpu.matmul %416, %469, %cst_197 {dimension_numbers = #tpu.dot_dimension_numbers<[1], [1], [0], [0], [0, 0, 1, 0], [], []>} : vector<16x32xf32>, vector<16x32xf32>, vector<16x16xf32> -> vector<16x16xf32>
    %cst_198 = arith.constant 0.353553385 : f32
    %475 = vector.broadcast %cst_198 : f32 to vector<16x16xf32>
    %476 = arith.mulf %474, %475 : vector<16x16xf32>
    %c1_199 = arith.constant 1 : index
    %c0_200 = arith.constant 0 : index
    %c0_201 = arith.constant 0 : index
    %477 = vector.load %arg3[%c1_199, %c0_200, %c0_201] : memref<4x16x16xf32, #tpu.memory_space<vmem>>, vector<1x16x16xf32>
    %478 = vector.shape_cast %477 : vector<1x16x16xf32> to vector<16x16xf32>
    %479 = arith.addf %476, %478 : vector<16x16xf32>
    %cst_202 = arith.constant dense<0xFF800000> : vector<16xf32>
    %480 = vector.multi_reduction <maximumf>, %479, %cst_202 [1] : vector<16x16xf32> to vector<16xf32>
    %481 = vector.shape_cast %480 : vector<16xf32> to vector<16x1xf32>
    %482 = vector.broadcast %481 : vector<16x1xf32> to vector<16x16xf32>
    %483 = arith.subf %479, %482 : vector<16x16xf32>
    %484 = math.exp %483 : vector<16x16xf32>
    %cst_203 = arith.constant dense<0.000000e+00> : vector<16xf32>
    %485 = vector.multi_reduction <add>, %484, %cst_203 [1] : vector<16x16xf32> to vector<16xf32>
    %486 = vector.shape_cast %485 : vector<16xf32> to vector<16x1xf32>
    %487 = tpu.reciprocal %486 {approx = true} : vector<16x1xf32> -> vector<16x1xf32>
    %488 = vector.broadcast %487 : vector<16x1xf32> to vector<16x16xf32>
    %489 = arith.mulf %484, %488 : vector<16x16xf32>
    %cst_204 = arith.constant dense<0.000000e+00> : vector<16x32xf32>
    %490 = tpu.matmul %489, %473, %cst_204 {dimension_numbers = #tpu.dot_dimension_numbers<[1], [0], [0], [1], [0, 0, 1, 1], [], []>} : vector<16x16xf32>, vector<16x32xf32>, vector<16x32xf32> -> vector<16x32xf32>
    %491 = arith.addf %460, %490 : vector<16x32xf32>
    %c16_i32_205 = arith.constant 16 : i32
    %492 = vector.broadcast %c16_i32_205 : i32 to vector<1x32xi32>
    %493 = arith.cmpi sge, %3, %492 : vector<1x32xi32>
    %c24_i32_206 = arith.constant 24 : i32
    %494 = vector.broadcast %c24_i32_206 : i32 to vector<1x32xi32>
    %495 = arith.cmpi slt, %3, %494 : vector<1x32xi32>
    %496 = arith.andi %493, %495 : vector<1x32xi1>
    %cst_207 = arith.constant 0.000000e+00 : f32
    %497 = vector.shape_cast %496 : vector<1x32xi1> to vector<1x32xi1>
    %498 = vector.broadcast %497 : vector<1x32xi1> to vector<16x32xi1>
    %499 = vector.broadcast %cst_207 : f32 to vector<16x32xf32>
    %500 = arith.select %498, %422, %499 : vector<16x32xi1>, vector<16x32xf32>
    %cst_208 = arith.constant 0.000000e+00 : f32
    %501 = vector.shape_cast %496 : vector<1x32xi1> to vector<1x32xi1>
    %502 = vector.broadcast %501 : vector<1x32xi1> to vector<16x32xi1>
    %503 = vector.broadcast %cst_208 : f32 to vector<16x32xf32>
    %504 = arith.select %502, %428, %503 : vector<16x32xi1>, vector<16x32xf32>
    %cst_209 = arith.constant dense<0.000000e+00> : vector<16x16xf32>
    %505 = tpu.matmul %416, %500, %cst_209 {dimension_numbers = #tpu.dot_dimension_numbers<[1], [1], [0], [0], [0, 0, 1, 0], [], []>} : vector<16x32xf32>, vector<16x32xf32>, vector<16x16xf32> -> vector<16x16xf32>
    %cst_210 = arith.constant 0.353553385 : f32
    %506 = vector.broadcast %cst_210 : f32 to vector<16x16xf32>
    %507 = arith.mulf %505, %506 : vector<16x16xf32>
    %c2_211 = arith.constant 2 : index
    %c0_212 = arith.constant 0 : index
    %c0_213 = arith.constant 0 : index
    %508 = vector.load %arg3[%c2_211, %c0_212, %c0_213] : memref<4x16x16xf32, #tpu.memory_space<vmem>>, vector<1x16x16xf32>
    %509 = vector.shape_cast %508 : vector<1x16x16xf32> to vector<16x16xf32>
    %510 = arith.addf %507, %509 : vector<16x16xf32>
    %cst_214 = arith.constant dense<0xFF800000> : vector<16xf32>
    %511 = vector.multi_reduction <maximumf>, %510, %cst_214 [1] : vector<16x16xf32> to vector<16xf32>
    %512 = vector.shape_cast %511 : vector<16xf32> to vector<16x1xf32>
    %513 = vector.broadcast %512 : vector<16x1xf32> to vector<16x16xf32>
    %514 = arith.subf %510, %513 : vector<16x16xf32>
    %515 = math.exp %514 : vector<16x16xf32>
    %cst_215 = arith.constant dense<0.000000e+00> : vector<16xf32>
    %516 = vector.multi_reduction <add>, %515, %cst_215 [1] : vector<16x16xf32> to vector<16xf32>
    %517 = vector.shape_cast %516 : vector<16xf32> to vector<16x1xf32>
    %518 = tpu.reciprocal %517 {approx = true} : vector<16x1xf32> -> vector<16x1xf32>
    %519 = vector.broadcast %518 : vector<16x1xf32> to vector<16x16xf32>
    %520 = arith.mulf %515, %519 : vector<16x16xf32>
    %cst_216 = arith.constant dense<0.000000e+00> : vector<16x32xf32>
    %521 = tpu.matmul %520, %504, %cst_216 {dimension_numbers = #tpu.dot_dimension_numbers<[1], [0], [0], [1], [0, 0, 1, 1], [], []>} : vector<16x16xf32>, vector<16x32xf32>, vector<16x32xf32> -> vector<16x32xf32>
    %522 = arith.addf %491, %521 : vector<16x32xf32>
    %c24_i32_217 = arith.constant 24 : i32
    %523 = vector.broadcast %c24_i32_217 : i32 to vector<1x32xi32>
    %524 = arith.cmpi sge, %3, %523 : vector<1x32xi32>
    %c32_i32_218 = arith.constant 32 : i32
    %525 = vector.broadcast %c32_i32_218 : i32 to vector<1x32xi32>
    %526 = arith.cmpi slt, %3, %525 : vector<1x32xi32>
    %527 = arith.andi %524, %526 : vector<1x32xi1>
    %cst_219 = arith.constant 0.000000e+00 : f32
    %528 = vector.shape_cast %527 : vector<1x32xi1> to vector<1x32xi1>
    %529 = vector.broadcast %528 : vector<1x32xi1> to vector<16x32xi1>
    %530 = vector.broadcast %cst_219 : f32 to vector<16x32xf32>
    %531 = arith.select %529, %422, %530 : vector<16x32xi1>, vector<16x32xf32>
    %cst_220 = arith.constant 0.000000e+00 : f32
    %532 = vector.shape_cast %527 : vector<1x32xi1> to vector<1x32xi1>
    %533 = vector.broadcast %532 : vector<1x32xi1> to vector<16x32xi1>
    %534 = vector.broadcast %cst_220 : f32 to vector<16x32xf32>
    %535 = arith.select %533, %428, %534 : vector<16x32xi1>, vector<16x32xf32>
    %cst_221 = arith.constant dense<0.000000e+00> : vector<16x16xf32>
    %536 = tpu.matmul %416, %531, %cst_221 {dimension_numbers = #tpu.dot_dimension_numbers<[1], [1], [0], [0], [0, 0, 1, 0], [], []>} : vector<16x32xf32>, vector<16x32xf32>, vector<16x16xf32> -> vector<16x16xf32>
    %cst_222 = arith.constant 0.353553385 : f32
    %537 = vector.broadcast %cst_222 : f32 to vector<16x16xf32>
    %538 = arith.mulf %536, %537 : vector<16x16xf32>
    %c3_223 = arith.constant 3 : index
    %c0_224 = arith.constant 0 : index
    %c0_225 = arith.constant 0 : index
    %539 = vector.load %arg3[%c3_223, %c0_224, %c0_225] : memref<4x16x16xf32, #tpu.memory_space<vmem>>, vector<1x16x16xf32>
    %540 = vector.shape_cast %539 : vector<1x16x16xf32> to vector<16x16xf32>
    %541 = arith.addf %538, %540 : vector<16x16xf32>
    %cst_226 = arith.constant dense<0xFF800000> : vector<16xf32>
    %542 = vector.multi_reduction <maximumf>, %541, %cst_226 [1] : vector<16x16xf32> to vector<16xf32>
    %543 = vector.shape_cast %542 : vector<16xf32> to vector<16x1xf32>
    %544 = vector.broadcast %543 : vector<16x1xf32> to vector<16x16xf32>
    %545 = arith.subf %541, %544 : vector<16x16xf32>
    %546 = math.exp %545 : vector<16x16xf32>
    %cst_227 = arith.constant dense<0.000000e+00> : vector<16xf32>
    %547 = vector.multi_reduction <add>, %546, %cst_227 [1] : vector<16x16xf32> to vector<16xf32>
    %548 = vector.shape_cast %547 : vector<16xf32> to vector<16x1xf32>
    %549 = tpu.reciprocal %548 {approx = true} : vector<16x1xf32> -> vector<16x1xf32>
    %550 = vector.broadcast %549 : vector<16x1xf32> to vector<16x16xf32>
    %551 = arith.mulf %546, %550 : vector<16x16xf32>
    %cst_228 = arith.constant dense<0.000000e+00> : vector<16x32xf32>
    %552 = tpu.matmul %551, %535, %cst_228 {dimension_numbers = #tpu.dot_dimension_numbers<[1], [0], [0], [1], [0, 0, 1, 1], [], []>} : vector<16x16xf32>, vector<16x32xf32>, vector<16x32xf32> -> vector<16x32xf32>
    %553 = arith.addf %522, %552 : vector<16x32xf32>
    %c1_229 = arith.constant 1 : index
    %c3_230 = arith.constant 3 : index
    %c0_231 = arith.constant 0 : index
    %c0_232 = arith.constant 0 : index
    %554 = vector.load %arg4[%c1_229, %c3_230, %c0_231, %c0_232] : memref<2x4x32x32xf32, #tpu.memory_space<vmem>>, vector<1x1x32x32xf32>
    %555 = vector.shape_cast %554 : vector<1x1x32x32xf32> to vector<32x32xf32>
    %cst_233 = arith.constant dense<0.000000e+00> : vector<16x32xf32>
    %556 = tpu.matmul %553, %555, %cst_233 {dimension_numbers = #tpu.dot_dimension_numbers<[1], [0], [0], [1], [0, 0, 1, 1], [], []>} : vector<16x32xf32>, vector<32x32xf32>, vector<16x32xf32> -> vector<16x32xf32>
    %557 = vector.extract_strided_slice %348 {offsets = [5, 0], sizes = [1, 32], strides = [1, 1]} : vector<11x32xf32> to vector<1x32xf32>
    %558 = vector.broadcast %557 : vector<1x32xf32> to vector<16x32xf32>
    %559 = arith.addf %556, %558 : vector<16x32xf32>
    %c1_234 = arith.constant 1 : index
    %c0_235 = arith.constant 0 : index
    %c0_236 = arith.constant 0 : index
    %c0_237 = arith.constant 0 : index
    %560 = vector.load %arg5[%c1_234, %c0_235, %c0_236, %c0_237] : memref<2x2x32x96xf32, #tpu.memory_space<vmem>>, vector<1x1x32x96xf32>
    %561 = vector.shape_cast %560 : vector<1x1x32x96xf32> to vector<32x96xf32>
    %c1_238 = arith.constant 1 : index
    %c0_239 = arith.constant 0 : index
    %c0_240 = arith.constant 0 : index
    %c0_241 = arith.constant 0 : index
    %562 = vector.load %arg6[%c1_238, %c0_239, %c0_240, %c0_241] : memref<2x2x32x64xf32, #tpu.memory_space<vmem>>, vector<1x1x32x64xf32>
    %563 = vector.shape_cast %562 : vector<1x1x32x64xf32> to vector<32x64xf32>
    %c1_242 = arith.constant 1 : index
    %c0_243 = arith.constant 0 : index
    %c0_244 = arith.constant 0 : index
    %c0_245 = arith.constant 0 : index
    %564 = vector.load %arg7[%c1_242, %c0_243, %c0_244, %c0_245] : memref<2x2x32x32xf32, #tpu.memory_space<vmem>>, vector<1x1x32x32xf32>
    %565 = vector.shape_cast %564 : vector<1x1x32x32xf32> to vector<32x32xf32>
    %566 = vector.extract_strided_slice %348 {offsets = [6, 0], sizes = [1, 32], strides = [1, 1]} : vector<11x32xf32> to vector<1x32xf32>
    %cst_246 = arith.constant dense<0.000000e+00> : vector<16x96xf32>
    %567 = tpu.matmul %559, %561, %cst_246 {dimension_numbers = #tpu.dot_dimension_numbers<[1], [0], [0], [1], [0, 0, 1, 1], [], []>} : vector<16x32xf32>, vector<32x96xf32>, vector<16x96xf32> -> vector<16x96xf32>
    %cst_247 = arith.constant dense<0.000000e+00> : vector<16x64xf32>
    %568 = tpu.matmul %346, %563, %cst_247 {dimension_numbers = #tpu.dot_dimension_numbers<[1], [0], [0], [1], [0, 0, 1, 1], [], []>} : vector<16x32xf32>, vector<32x64xf32>, vector<16x64xf32> -> vector<16x64xf32>
    %569 = vector.extract_strided_slice %567 {offsets = [0, 0], sizes = [16, 32], strides = [1, 1]} : vector<16x96xf32> to vector<16x32xf32>
    %570 = vector.extract_strided_slice %568 {offsets = [0, 0], sizes = [16, 32], strides = [1, 1]} : vector<16x64xf32> to vector<16x32xf32>
    %571 = arith.addf %569, %570 : vector<16x32xf32>
    %cst_248 = arith.constant 5.000000e-01 : f32
    %572 = vector.broadcast %cst_248 : f32 to vector<16x32xf32>
    %573 = arith.mulf %572, %571 : vector<16x32xf32>
    %574 = math.tanh %573 : vector<16x32xf32>
    %cst_249 = arith.constant 1.000000e+00 : f32
    %575 = vector.broadcast %cst_249 : f32 to vector<16x32xf32>
    %576 = arith.addf %574, %575 : vector<16x32xf32>
    %cst_250 = arith.constant 5.000000e-01 : f32
    %577 = vector.broadcast %cst_250 : f32 to vector<16x32xf32>
    %578 = arith.mulf %577, %576 : vector<16x32xf32>
    %579 = vector.extract_strided_slice %567 {offsets = [0, 32], sizes = [16, 32], strides = [1, 1]} : vector<16x96xf32> to vector<16x32xf32>
    %580 = vector.extract_strided_slice %568 {offsets = [0, 32], sizes = [16, 32], strides = [1, 1]} : vector<16x64xf32> to vector<16x32xf32>
    %581 = arith.addf %579, %580 : vector<16x32xf32>
    %582 = vector.broadcast %566 : vector<1x32xf32> to vector<16x32xf32>
    %583 = arith.subf %581, %582 : vector<16x32xf32>
    %cst_251 = arith.constant 5.000000e-01 : f32
    %584 = vector.broadcast %cst_251 : f32 to vector<16x32xf32>
    %585 = arith.mulf %584, %583 : vector<16x32xf32>
    %586 = math.tanh %585 : vector<16x32xf32>
    %cst_252 = arith.constant 1.000000e+00 : f32
    %587 = vector.broadcast %cst_252 : f32 to vector<16x32xf32>
    %588 = arith.addf %586, %587 : vector<16x32xf32>
    %cst_253 = arith.constant 5.000000e-01 : f32
    %589 = vector.broadcast %cst_253 : f32 to vector<16x32xf32>
    %590 = arith.mulf %589, %588 : vector<16x32xf32>
    %591 = vector.extract_strided_slice %567 {offsets = [0, 64], sizes = [16, 32], strides = [1, 1]} : vector<16x96xf32> to vector<16x32xf32>
    %592 = arith.mulf %346, %578 : vector<16x32xf32>
    %cst_254 = arith.constant dense<0.000000e+00> : vector<16x32xf32>
    %593 = tpu.matmul %592, %565, %cst_254 {dimension_numbers = #tpu.dot_dimension_numbers<[1], [0], [0], [1], [0, 0, 1, 1], [], []>} : vector<16x32xf32>, vector<32x32xf32>, vector<16x32xf32> -> vector<16x32xf32>
    %594 = arith.addf %591, %593 : vector<16x32xf32>
    %595 = math.tanh %594 : vector<16x32xf32>
    %cst_255 = arith.constant 1.000000e+00 : f32
    %596 = vector.broadcast %cst_255 : f32 to vector<16x32xf32>
    %597 = arith.subf %596, %590 : vector<16x32xf32>
    %598 = arith.mulf %597, %346 : vector<16x32xf32>
    %599 = arith.mulf %590, %595 : vector<16x32xf32>
    %600 = arith.addf %598, %599 : vector<16x32xf32>
    %601 = vector.extract_strided_slice %348 {offsets = [7, 0], sizes = [1, 32], strides = [1, 1]} : vector<11x32xf32> to vector<1x32xf32>
    %602 = vector.extract_strided_slice %348 {offsets = [8, 0], sizes = [1, 32], strides = [1, 1]} : vector<11x32xf32> to vector<1x32xf32>
    %cst_256 = arith.constant dense<0.000000e+00> : vector<16xf32>
    %603 = vector.multi_reduction <add>, %600, %cst_256 [1] : vector<16x32xf32> to vector<16xf32>
    %604 = vector.shape_cast %603 : vector<16xf32> to vector<16x1xf32>
    %cst_257 = arith.constant 3.200000e+01 : f32
    %605 = vector.broadcast %cst_257 : f32 to vector<16x1xf32>
    %606 = arith.divf %604, %605 : vector<16x1xf32>
    %607 = vector.broadcast %606 : vector<16x1xf32> to vector<16x32xf32>
    %608 = arith.subf %600, %607 : vector<16x32xf32>
    %609 = arith.mulf %608, %608 : vector<16x32xf32>
    %cst_258 = arith.constant dense<0.000000e+00> : vector<16xf32>
    %610 = vector.multi_reduction <add>, %609, %cst_258 [1] : vector<16x32xf32> to vector<16xf32>
    %611 = vector.shape_cast %610 : vector<16xf32> to vector<16x1xf32>
    %cst_259 = arith.constant 3.200000e+01 : f32
    %612 = vector.broadcast %cst_259 : f32 to vector<16x1xf32>
    %613 = arith.divf %611, %612 : vector<16x1xf32>
    %cst_260 = arith.constant 9.99999974E-6 : f32
    %614 = vector.broadcast %cst_260 : f32 to vector<16x1xf32>
    %615 = arith.addf %613, %614 : vector<16x1xf32>
    %616 = math.rsqrt %615 : vector<16x1xf32>
    %617 = vector.broadcast %616 : vector<16x1xf32> to vector<16x32xf32>
    %618 = arith.mulf %608, %617 : vector<16x32xf32>
    %619 = vector.broadcast %601 : vector<1x32xf32> to vector<16x32xf32>
    %620 = arith.mulf %618, %619 : vector<16x32xf32>
    %621 = vector.broadcast %602 : vector<1x32xf32> to vector<16x32xf32>
    %622 = arith.addf %620, %621 : vector<16x32xf32>
    %c1_261 = arith.constant 1 : index
    %c0_262 = arith.constant 0 : index
    %c0_263 = arith.constant 0 : index
    %623 = vector.load %arg8[%c1_261, %c0_262, %c0_263] : memref<2x32x64xf32, #tpu.memory_space<vmem>>, vector<1x32x64xf32>
    %624 = vector.shape_cast %623 : vector<1x32x64xf32> to vector<32x64xf32>
    %cst_264 = arith.constant dense<0.000000e+00> : vector<16x64xf32>
    %625 = tpu.matmul %622, %624, %cst_264 {dimension_numbers = #tpu.dot_dimension_numbers<[1], [0], [0], [1], [0, 0, 1, 1], [], []>} : vector<16x32xf32>, vector<32x64xf32>, vector<16x64xf32> -> vector<16x64xf32>
    %c1_265 = arith.constant 1 : index
    %c0_266 = arith.constant 0 : index
    %c0_267 = arith.constant 0 : index
    %626 = vector.load %arg9[%c1_265, %c0_266, %c0_267] : memref<2x1x64xf32, #tpu.memory_space<vmem>>, vector<1x1x64xf32>
    %627 = vector.shape_cast %626 : vector<1x1x64xf32> to vector<1x64xf32>
    %628 = vector.broadcast %627 : vector<1x64xf32> to vector<16x64xf32>
    %629 = arith.addf %625, %628 : vector<16x64xf32>
    %cst_268 = arith.constant 5.000000e-01 : f32
    %630 = vector.broadcast %cst_268 : f32 to vector<16x64xf32>
    %631 = arith.mulf %630, %629 : vector<16x64xf32>
    %cst_269 = arith.constant 4.471500e-02 : f32
    %632 = vector.broadcast %cst_269 : f32 to vector<16x64xf32>
    %633 = arith.mulf %632, %629 : vector<16x64xf32>
    %634 = arith.mulf %633, %629 : vector<16x64xf32>
    %635 = arith.mulf %634, %629 : vector<16x64xf32>
    %636 = arith.addf %629, %635 : vector<16x64xf32>
    %cst_270 = arith.constant 0.797884583 : f32
    %637 = vector.broadcast %cst_270 : f32 to vector<16x64xf32>
    %638 = arith.mulf %637, %636 : vector<16x64xf32>
    %639 = math.tanh %638 : vector<16x64xf32>
    %cst_271 = arith.constant 1.000000e+00 : f32
    %640 = vector.broadcast %cst_271 : f32 to vector<16x64xf32>
    %641 = arith.addf %640, %639 : vector<16x64xf32>
    %642 = arith.mulf %631, %641 : vector<16x64xf32>
    %c1_272 = arith.constant 1 : index
    %c0_273 = arith.constant 0 : index
    %c0_274 = arith.constant 0 : index
    %643 = vector.load %arg10[%c1_272, %c0_273, %c0_274] : memref<2x64x32xf32, #tpu.memory_space<vmem>>, vector<1x64x32xf32>
    %644 = vector.shape_cast %643 : vector<1x64x32xf32> to vector<64x32xf32>
    %cst_275 = arith.constant dense<0.000000e+00> : vector<16x32xf32>
    %645 = tpu.matmul %642, %644, %cst_275 {dimension_numbers = #tpu.dot_dimension_numbers<[1], [0], [0], [1], [0, 0, 1, 1], [], []>} : vector<16x64xf32>, vector<64x32xf32>, vector<16x32xf32> -> vector<16x32xf32>
    %646 = vector.extract_strided_slice %348 {offsets = [9, 0], sizes = [1, 32], strides = [1, 1]} : vector<11x32xf32> to vector<1x32xf32>
    %647 = vector.broadcast %646 : vector<1x32xf32> to vector<16x32xf32>
    %648 = arith.addf %645, %647 : vector<16x32xf32>
    %c1_276 = arith.constant 1 : index
    %c1_277 = arith.constant 1 : index
    %c0_278 = arith.constant 0 : index
    %c0_279 = arith.constant 0 : index
    %649 = vector.load %arg5[%c1_276, %c1_277, %c0_278, %c0_279] : memref<2x2x32x96xf32, #tpu.memory_space<vmem>>, vector<1x1x32x96xf32>
    %650 = vector.shape_cast %649 : vector<1x1x32x96xf32> to vector<32x96xf32>
    %c1_280 = arith.constant 1 : index
    %c1_281 = arith.constant 1 : index
    %c0_282 = arith.constant 0 : index
    %c0_283 = arith.constant 0 : index
    %651 = vector.load %arg6[%c1_280, %c1_281, %c0_282, %c0_283] : memref<2x2x32x64xf32, #tpu.memory_space<vmem>>, vector<1x1x32x64xf32>
    %652 = vector.shape_cast %651 : vector<1x1x32x64xf32> to vector<32x64xf32>
    %c1_284 = arith.constant 1 : index
    %c1_285 = arith.constant 1 : index
    %c0_286 = arith.constant 0 : index
    %c0_287 = arith.constant 0 : index
    %653 = vector.load %arg7[%c1_284, %c1_285, %c0_286, %c0_287] : memref<2x2x32x32xf32, #tpu.memory_space<vmem>>, vector<1x1x32x32xf32>
    %654 = vector.shape_cast %653 : vector<1x1x32x32xf32> to vector<32x32xf32>
    %655 = vector.extract_strided_slice %348 {offsets = [10, 0], sizes = [1, 32], strides = [1, 1]} : vector<11x32xf32> to vector<1x32xf32>
    %cst_288 = arith.constant dense<0.000000e+00> : vector<16x96xf32>
    %656 = tpu.matmul %648, %650, %cst_288 {dimension_numbers = #tpu.dot_dimension_numbers<[1], [0], [0], [1], [0, 0, 1, 1], [], []>} : vector<16x32xf32>, vector<32x96xf32>, vector<16x96xf32> -> vector<16x96xf32>
    %cst_289 = arith.constant dense<0.000000e+00> : vector<16x64xf32>
    %657 = tpu.matmul %600, %652, %cst_289 {dimension_numbers = #tpu.dot_dimension_numbers<[1], [0], [0], [1], [0, 0, 1, 1], [], []>} : vector<16x32xf32>, vector<32x64xf32>, vector<16x64xf32> -> vector<16x64xf32>
    %658 = vector.extract_strided_slice %656 {offsets = [0, 0], sizes = [16, 32], strides = [1, 1]} : vector<16x96xf32> to vector<16x32xf32>
    %659 = vector.extract_strided_slice %657 {offsets = [0, 0], sizes = [16, 32], strides = [1, 1]} : vector<16x64xf32> to vector<16x32xf32>
    %660 = arith.addf %658, %659 : vector<16x32xf32>
    %cst_290 = arith.constant 5.000000e-01 : f32
    %661 = vector.broadcast %cst_290 : f32 to vector<16x32xf32>
    %662 = arith.mulf %661, %660 : vector<16x32xf32>
    %663 = math.tanh %662 : vector<16x32xf32>
    %cst_291 = arith.constant 1.000000e+00 : f32
    %664 = vector.broadcast %cst_291 : f32 to vector<16x32xf32>
    %665 = arith.addf %663, %664 : vector<16x32xf32>
    %cst_292 = arith.constant 5.000000e-01 : f32
    %666 = vector.broadcast %cst_292 : f32 to vector<16x32xf32>
    %667 = arith.mulf %666, %665 : vector<16x32xf32>
    %668 = vector.extract_strided_slice %656 {offsets = [0, 32], sizes = [16, 32], strides = [1, 1]} : vector<16x96xf32> to vector<16x32xf32>
    %669 = vector.extract_strided_slice %657 {offsets = [0, 32], sizes = [16, 32], strides = [1, 1]} : vector<16x64xf32> to vector<16x32xf32>
    %670 = arith.addf %668, %669 : vector<16x32xf32>
    %671 = vector.broadcast %655 : vector<1x32xf32> to vector<16x32xf32>
    %672 = arith.subf %670, %671 : vector<16x32xf32>
    %cst_293 = arith.constant 5.000000e-01 : f32
    %673 = vector.broadcast %cst_293 : f32 to vector<16x32xf32>
    %674 = arith.mulf %673, %672 : vector<16x32xf32>
    %675 = math.tanh %674 : vector<16x32xf32>
    %cst_294 = arith.constant 1.000000e+00 : f32
    %676 = vector.broadcast %cst_294 : f32 to vector<16x32xf32>
    %677 = arith.addf %675, %676 : vector<16x32xf32>
    %cst_295 = arith.constant 5.000000e-01 : f32
    %678 = vector.broadcast %cst_295 : f32 to vector<16x32xf32>
    %679 = arith.mulf %678, %677 : vector<16x32xf32>
    %680 = vector.extract_strided_slice %656 {offsets = [0, 64], sizes = [16, 32], strides = [1, 1]} : vector<16x96xf32> to vector<16x32xf32>
    %681 = arith.mulf %600, %667 : vector<16x32xf32>
    %cst_296 = arith.constant dense<0.000000e+00> : vector<16x32xf32>
    %682 = tpu.matmul %681, %654, %cst_296 {dimension_numbers = #tpu.dot_dimension_numbers<[1], [0], [0], [1], [0, 0, 1, 1], [], []>} : vector<16x32xf32>, vector<32x32xf32>, vector<16x32xf32> -> vector<16x32xf32>
    %683 = arith.addf %680, %682 : vector<16x32xf32>
    %684 = math.tanh %683 : vector<16x32xf32>
    %cst_297 = arith.constant 1.000000e+00 : f32
    %685 = vector.broadcast %cst_297 : f32 to vector<16x32xf32>
    %686 = arith.subf %685, %679 : vector<16x32xf32>
    %687 = arith.mulf %686, %600 : vector<16x32xf32>
    %688 = arith.mulf %679, %684 : vector<16x32xf32>
    %689 = arith.addf %687, %688 : vector<16x32xf32>
    %c0_298 = arith.constant 0 : index
    %c0_299 = arith.constant 0 : index
    %690 = vector.load %arg12[%c0_298, %c0_299] : memref<16x32xf32, #tpu.memory_space<vmem>>, vector<16x32xf32>
    tpu.vector_store %arg12[%c0_298, %c0_299], %689 {strides = array<i32>} : memref<16x32xf32, #tpu.memory_space<vmem>>, vector<16x32xf32>,
    return
  }
}

</mosaic_0001>

<bundles_post_ra>
// kernel: block_seq_forward.1
= control target key start
LH: loop header
LB: loop body
LE: loop exit
PB: predicated region body
PF: predicated region fallthrough
CT: control target
= control target key end

     0   :  { %17 = vsyncpa [#allocation3], 0  ;;  %s3841_s0 = inlined_call_operand.vmem [shape: f32[16,32], index: 0, kind: input, shape index: {}]   ;;  %s3842_s1 = inlined_call_operand.hbm [shape: f32[16,32], index: 1, kind: input, shape index: {}]   ;;  %s3843_s2 = inlined_call_operand.vmem [shape: f32[16,32], index: 2, kind: input, shape index: {}]   ;;  %s3844_s3 = inlined_call_operand.vmem [shape: f32[4,16,16], index: 3, kind: input, shape index: {}]   ;;  %s3845_s4 = inlined_call_operand.vmem [shape: f32[2,4,32,32], index: 4, kind: input, shape index: {}]   ;;  %s3846_s5 = inlined_call_operand.vmem [shape: f32[2,2,32,96], index: 5, kind: input, shape index: {}]   ;;  %s3847_s6 = inlined_call_operand.vmem [shape: f32[2,2,32,64], index: 6, kind: input, shape index: {}]   ;;  %s3848_s7 = inlined_call_operand.hbm [shape: f32[2,2,32,32], index: 7, kind: input, shape index: {}]   ;;  %s3849_s8 = inlined_call_operand.vmem [shape: f32[2,32,64], index: 8, kind: input, shape index: {}]   ;;  %s3850_s9 = inlined_call_operand.vmem [shape: f32[2,1,64], index: 9, kind: input, shape index: {}]   ;;  %s3851_s10 = inlined_call_operand.vmem [shape: f32[2,64,32], index: 10, kind: input, shape index: {}]   ;;  %s3852_s11 = inlined_call_operand.vmem [shape: f32[2,11,32], index: 11, kind: input, shape index: {}]   ;;  %s3853_s12 = inlined_call_operand.hbm [shape: f32[16,32], index: 12, kind: output, shape index: {}]  }
   0x1   :  { %18 = vsyncpa [#allocation6], 0 }
   0x2   :  { %19 = vsyncpa [#allocation4], 0  ;;  %s26_s23 = sshll.u32 %s3842_s1, 4  ;;  %s2828_s24 = smov [#allocation2]   ;;  %s27_s23 = int_to_ptr.hbm [resolvable:$true] %s26_s23 }
   0x3   :  { %s28_s25 = sshll.u32 %s2828_s24, 4  ;;  %s49_s28 = sshll.u32 %s3848_s7, 4  ;;  %s29_s25 = int_to_ptr.vmem [resolvable:$true] %s28_s25  ;;  %s50_s28 = int_to_ptr.hbm [resolvable:$true] %s49_s28 }
   0x4   :  { %s2829_s29 = smov 128   ;;  %s2830_s30 = smov 8  }
   0x5   :  { %34 = dma.hbm_to_vmem [thread:$0]  %s27_s23, 256, %s29_s25, [#allocation3], %s2829_s29, %s2829_s29, %s2830_s30  }
   0x6   :  { %s2831_s13 = smov [#allocation5]  }
   0x7   :  { %s51_s14 = sshll.u32 %s2831_s13, 4  ;;  %s52_s14 = int_to_ptr.vmem [resolvable:$true] %s51_s14 }
   0x8   :  { %57 = dma.hbm_to_vmem [thread:$0]  %s50_s28, 2048, %s52_s14, [#allocation6], %s2829_s29, %s2829_s29, %s2830_s30  }
   0x9   :  { %2822 = dma.done.wait [#allocation3], 256  }
   0xa   :  { %2823 = vsyncadd [#allocation3], 4294967040 }
   0xb   :  { %2824 = dma.done.wait [#allocation6], 2048  }
   0xc   :  { %2825 = vsyncadd [#allocation6], 4294965248  ;;  %vm84_vm0 = vcmask 261120   ;;  %v76_v0 = vld [vmem:[#allocation2] sm:$0xff]  ;;  %v77_v4 = vld [vmem:[#allocation2 + $0x8] sm:$0xff]  ;;  %v2832_v8 = vmov 32.0  }
   0xd   :  { %v2917_v1 = vld [vmem:[%s3841_s0] sm:$0xff]  ;;  %v142_v2 = vsel %vm84_vm0, %v76_v0, 0.0  ;;  %v2925_v5 = vld [vmem:[%s3841_s0 + $0x8] sm:$0xff]  ;;  %v145_v6 = vsel %vm84_vm0, %v77_v4, 0.0  ;;  %2595 = vrcp.f32 %v2832_v8  ;;  %v241_v39 = vld [vmem:[%s3845_s4 + $0x18] sm:$0xff]  ;;  %s2833_s26 = smov 32  }
   0xe   :  { %v85_v3 = vsel %vm84_vm0, %v2917_v1, 0.0  ;;  %143 = vadd.xlane.f32.xlu0 %v142_v2  ;;  %v88_v7 = vsel %vm84_vm0, %v2925_v5, 0.0  ;;  %v79_v31 = vld [vmem:[%s3843_s2 + $0x8] sm:$0xff]  ;;  %v78_v37 = vld [vmem:[%s3843_s2] sm:$0xff]  ;;  %v2404_v40 = vld [vmem:[%s3845_s4 + $0x38] sm:$0xff]  ;;  %261 = vmatpush.msra.mxu0 %v241_v39  ;;  %s2834_s27 = smov 64  }
   0xf   :  { %86 = vadd.xlane.f32.xlu1 %v85_v3  ;;  %v193_v34 = vsel %vm84_vm0, %v79_v31, 0.0  ;;  %v190_v38 = vsel %vm84_vm0, %v78_v37, 0.0  ;;  %296 = vmatpush.msra.mxu1 %v2404_v40  ;;  %v240_v41 = vld [vmem:[%s3845_s4 + $0x10] sm:$0xff]  ;;  %v239_v43 = vld [vmem:[%s3845_s4 + $0x8] sm:$0xff]  ;;  %v238_v45 = vld [vmem:[%s3845_s4] sm:$0xff]  ;;  %s2835_s2 = smov 96  }
  0x10   :  { %v2403_v42 = vld [vmem:[%s3845_s4 + $0x30] sm:$0xff]  ;;  %262 = vmatpush.msra.mxu0 %v240_v41  ;;  %v2402_v44 = vld [vmem:[%s3845_s4 + $0x28] sm:$0xff]  ;;  %v2401_v46 = vld [vmem:[%s3845_s4 + $0x20] sm:$0xff]  ;;  %s2385_s0 = sshll.u32 %s3853_s12, 4  ;;  %s2386_s0 = int_to_ptr.hbm [resolvable:$true] %s2385_s0 }
  0x11   :  { %297 = vmatpush.msra.mxu1 %v2403_v42 }
  0x12   :  { %263 = vmatpush.msra.mxu0 %v239_v43 }
  0x13   :  { %v2596_v9 = vpop.eup %2595  ;;  %298 = vmatpush.msra.mxu1 %v2402_v44 }
  0x14   :  { %v92_v10 = vmul.f32 32.0, %v2596_v9  ;;  %vm96_vm1 = vweird.f32 %v2596_v9  ;;  %264 = vmatpush.msra.mxu0 %v238_v45 }
  0x15   :  { %299 = vmatpush.msra.mxu1 %v2401_v46 }
  0x16   :  { %146 = vadd.xlane.f32.xlu0 %v145_v6  ;;  %v93_v11 = vsub.f32 1.0, %v92_v10 }
  0x17   :  { %89 = vadd.xlane.f32.xlu1 %v88_v7 }
  0x18   :  { %v94_v12 = vmul.f32 %v2596_v9, %v93_v11 }
  0x1a   :  { %v95_v13 = vadd.f32 %v2596_v9, %v94_v12 }
  0x1c   :  { %v2930_v14 = vsel %vm96_vm1, %v2596_v9, %v95_v13  ;;  %v3004_v13 = vld [vmem:[%s3852_s11] sm:$0xff] }
  0x81   :  { %v144_v15 = vpop.xlane.xlu0 %143 }
  0x82   :  { %v87_v16 = vpop.xlane.xlu1 %86  ;;  %v148_v17 = vmul.f32 %v144_v15, %v2930_v14 }
  0x83   :  { %v98_v18 = vmul.f32 %v2930_v14, %v87_v16 }
  0x84   :  { %v2934_v19 = vsub.f32 %v76_v0, %v148_v17 }
  0x85   :  { %v2937_v20 = vsub.f32 %v2917_v1, %v98_v18 }
  0x86   :  { %v152_v21 = vmul.f32 %v2934_v19, %v2934_v19 }
  0x87   :  { %v102_v22 = vmul.f32 %v2937_v20, %v2937_v20 }
  0x88   :  { %v154_v23 = vsel %vm84_vm0, %v152_v21, 0.0 }
  0x89   :  { %v104_v24 = vsel %vm84_vm0, %v102_v22, 0.0  ;;  %155 = vadd.xlane.f32.xlu2 %v154_v23  ;;  %v147_v25 = vpop.xlane.xlu0 %146 }
  0x8a   :  { %105 = vadd.xlane.f32.xlu0 %v104_v24  ;;  %v90_v26 = vpop.xlane.xlu1 %89  ;;  %v149_v27 = vmul.f32 %v147_v25, %v2930_v14 }
  0x8b   :  { %v99_v28 = vmul.f32 %v2930_v14, %v90_v26 }
  0x8c   :  { %v2947_v29 = vsub.f32 %v77_v4, %v149_v27  ;;  %v3015_v27 = vperm.slane %v3004_v13, 0 }
  0x8d   :  { %v2950_v30 = vsub.f32 %v2925_v5, %v99_v28 }
  0x8e   :  { %v153_v32 = vmul.f32 %v2947_v29, %v2947_v29 }
  0x8f   :  { %v103_v33 = vmul.f32 %v2950_v30, %v2950_v30 }
  0x90   :  { %v157_v35 = vsel %vm84_vm0, %v153_v32, 0.0  ;;  %v3018_v32 = vperm.slane %v3004_v13, 1 }
  0x91   :  { %v107_v36 = vsel %vm84_vm0, %v103_v33, 0.0  ;;  %158 = vadd.xlane.f32.xlu2 %v157_v35 }
  0x92   :  { %108 = vadd.xlane.f32.xlu1 %v107_v36  ;;  %194 = vadd.xlane.f32.xlu0 %v193_v34 }
  0x99   :  { %191 = vadd.xlane.f32.xlu2 %v190_v38 }
  0xfc   :  { %v156_v47 = vpop.xlane.xlu2 %155 }
  0xfd   :  { %v106_v48 = vpop.xlane.xlu0 %105  ;;  %v160_v49 = vmul.f32 %v156_v47, %v2930_v14 }
  0xfe   :  { %v110_v50 = vmul.f32 %v106_v48, %v2930_v14 }
  0xff   :  { %v162_v51 = vadd.f32 1e-05, %v160_v49 }
 0x100   :  { %v112_v52 = vadd.f32 1e-05, %v110_v50 }
 0x101   :  { %2597 = vrsqrt.f32 %v162_v51  ;;  %vm170_vm5 = vweird.f32 %v162_v51 }
 0x102   :  { %2599 = vrsqrt.f32 %v112_v52  ;;  %vm120_vm2 = vweird.f32 %v112_v52 }
 0x104   :  { %v159_v53 = vpop.xlane.xlu2 %158 }
 0x105   :  { %v109_v54 = vpop.xlane.xlu1 %108  ;;  %v161_v55 = vmul.f32 %v159_v53, %v2930_v14  ;;  %v195_v57 = vpop.xlane.xlu0 %194 }
 0x106   :  { %v111_v56 = vmul.f32 %v109_v54, %v2930_v14  ;;  %v197_v58 = vmul.f32 %v195_v57, %v2930_v14  ;;  %v2407_v57 = vld [vmem:[%s3845_s4 + $0x40] sm:$0xff] }
 0x107   :  { %v2598_v59 = vpop.eup %2597  ;;  %v163_v60 = vadd.f32 1e-05, %v161_v55  ;;  %v2408_v55 = vld [vmem:[%s3845_s4 + $0x48] sm:$0xff] }
 0x108   :  { %v113_v61 = vadd.f32 1e-05, %v111_v56  ;;  %v2600_v62 = vpop.eup %2599  ;;  %v165_v63 = vmul.f32 %v2598_v59, %v162_v51  ;;  %v2995_v0 = vsub.f32 %v79_v31, %v197_v58  ;;  %vm171_vm4 = vweird.f32 %v2598_v59 }
 0x109   :  { %v115_v2 = vmul.f32 %v2600_v62, %v112_v52  ;;  %2601 = vrsqrt.f32 %v163_v60  ;;  %vm121_vm3 = vweird.f32 %v2600_v62  ;;  %vm172_vm7 = vmor %vm170_vm5, %vm171_vm4  ;;  %vm180_vm11 = vweird.f32 %v163_v60 }
 0x10a   :  { %v166_v3 = vmul.f32 %v2598_v59, %v165_v63  ;;  %2603 = vrsqrt.f32 %v113_v61  ;;  %v201_v4 = vmul.f32 %v2995_v0, %v2995_v0  ;;  %vm3008_vm6 = vmor %vm120_vm2, %vm121_vm3  ;;  %vm130_vm8 = vweird.f32 %v113_v61 }
 0x10b   :  { %v116_v6 = vmul.f32 %v2600_v62, %v115_v2 }
 0x10c   :  { %v167_v7 = vmul.f32 0.5, %v166_v3  ;;  %v192_v8 = vpop.xlane.xlu2 %191  ;;  %v205_v9 = vsel %vm84_vm0, %v201_v4, 0.0 }
 0x10d   :  { %v117_v10 = vmul.f32 0.5, %v116_v6  ;;  %v196_v11 = vmul.f32 %v192_v8, %v2930_v14  ;;  %206 = vadd.xlane.f32.xlu2 %v205_v9  ;;  %v80_v9 = vlaneseq }
 0x10e   :  { %v168_v12 = vsub.f32 1.5, %v167_v7 }
 0x10f   :  { %v2602_v15 = vpop.eup %2601  ;;  %v118_v16 = vsub.f32 1.5, %v117_v10  ;;  %v3006_v17 = vsub.f32 %v78_v37, %v196_v11 }
 0x110   :  { %v2604_v18 = vpop.eup %2603  ;;  %v169_v21 = vmul.f32 %v2598_v59, %v168_v12  ;;  %v175_v23 = vmul.f32 %v2602_v15, %v163_v60  ;;  %vm181_vm10 = vweird.f32 %v2602_v15 }
 0x111   :  { %v119_v24 = vmul.f32 %v2600_v62, %v118_v16  ;;  %v125_v25 = vmul.f32 %v2604_v18, %v113_v61  ;;  %v200_v26 = vmul.f32 %v3006_v17, %v3006_v17  ;;  %vm131_vm9 = vweird.f32 %v2604_v18  ;;  %vm182_vm13 = vmor %vm180_vm11, %vm181_vm10 }
 0x112   :  { %v173_v28 = vsel %vm172_vm7, %v2598_v59, %v169_v21  ;;  %v176_v31 = vmul.f32 %v2602_v15, %v175_v23  ;;  %vm132_vm12 = vmor %vm130_vm8, %vm131_vm9  ;;  %v3059_v16 = vand.u32 127, %v80_v9  ;;  %v277_v21 = vperm.slane %v3004_v13, 3 }
 0x113   :  { %v123_v33 = vsel %vm3008_vm6, %v2600_v62, %v119_v24  ;;  %v126_v34 = vmul.f32 %v2604_v18, %v125_v25  ;;  %v202_v35 = vsel %vm84_vm0, %v200_v26, 0.0  ;;  %v3024_v36 = vmul.f32 %v173_v28, %v2934_v19 }
 0x114   :  { %v177_v37 = vmul.f32 0.5, %v176_v31  ;;  %203 = vadd.xlane.f32.xlu1 %v202_v35  ;;  %v134_v38 = vmul.f32 %v123_v33, %v2937_v20  ;;  %vm415_vm5 = vcmp.ge.s32.totalorder %v3059_v16, 8  ;;  %vm416_vm6 = vcmp.lt.s32.totalorder %v3059_v16, 16 }
 0x115   :  { %v127_v39 = vmul.f32 0.5, %v126_v34  ;;  %v186_v40 = vmul.f32 %v3024_v36, %v3015_v27  ;;  %vm343_vm7 = vcmp.lt.s32.totalorder %v3059_v16, 8  ;;  %vm3070_vm8 = vmand %vm415_vm5, %vm416_vm6  ;;  %vm540_vm9 = vcmp.ge.s32.totalorder %v3059_v16, 16 }
 0x116   :  { %v178_v41 = vsub.f32 1.5, %v177_v37  ;;  %v137_v42 = vmul.f32 %v3015_v27, %v134_v38  ;;  %vm541_vm10 = vcmp.lt.s32.totalorder %v3059_v16, 24 }
 0x117   :  { %v128_v43 = vsub.f32 1.5, %v127_v39  ;;  %v188_v44 = vadd.f32 %v186_v40, %v3018_v32  ;;  %vm3102_vm11 = vmand %vm540_vm9, %vm541_vm10  ;;  %vm1073_vm9 = vcmask 523264  }
 0x118   :  { %v179_v45 = vmul.f32 %v2602_v15, %v178_v41  ;;  %v140_v19 = vadd.f32 %v3018_v32, %v137_v42 }
 0x119   :  { %v129_v20 = vmul.f32 %v2604_v18, %v128_v43  ;;  %2405 = vmatmul.msk.f32.vlgmr.msra.gmra.mxu1 %vm84_vm0, %v188_v44 }
 0x11a   :  { %v183_v46 = vsel %vm182_vm13, %v2602_v15, %v179_v45  ;;  %2399 = vmatmul.msk.f32.vlgmr.msra.gmra.mxu0 %vm84_vm0, %v140_v19  ;;  %vm638_vm13 = vcmp.ge.s32.totalorder %v3059_v16, 24 }
 0x11b   :  { %v133_v47 = vsel %vm132_vm12, %v2604_v18, %v129_v20  ;;  %v3035_v48 = vmul.f32 %v183_v46, %v2947_v29  ;;  %v2410_v29 = vld [vmem:[%s3845_s4 + $0x58] sm:$0xff]  ;;  %v2421_v46 = vld [vmem:[%s3844_s3 + $0x10] sm:$0xff]  ;;  %vm392_vm12 = vcmask 130048  }
 0x11c   :  { %v135_v49 = vmul.f32 %v133_v47, %v2950_v30  ;;  %331 = vmatpush.msra.mxu2 %v2410_v29  ;;  %v2409_v30 = vld [vmem:[%s3845_s4 + $0x50] sm:$0xff] }
 0x11d   :  { %v187_v50 = vmul.f32 %v3035_v48, %v3015_v27 }
 0x11e   :  { %v138_v51 = vmul.f32 %v3015_v27, %v135_v49  ;;  %332 = vmatpush.msra.mxu2 %v2409_v30  ;;  %v2422_v30 = vld [vmem:[%s3844_s3 + $0x18] sm:$0xff] }
 0x11f   :  { %v189_v52 = vadd.f32 %v187_v50, %v3018_v32 }
 0x120   :  { %v141_v53 = vadd.f32 %v3018_v32, %v138_v51  ;;  %333 = vmatpush.msra.mxu2 %v2408_v55 }
 0x121   :  { %2406 = vmatmul.msk.f32.gmra.mxu1 %vm84_vm0, %v189_v52  ;;  %v312_v52 = vperm.slane %v3004_v13, 4 }
 0x122   :  { %2400 = vmatmul.msk.f32.gmra.mxu0 %vm84_vm0, %v141_v53  ;;  %334 = vmatpush.msra.mxu2 %v2407_v57 }
 0x180   :  { %v207_v54 = vpop.xlane.xlu2 %206 }
 0x181   :  { %v209_v56 = vmul.f32 %v207_v54, %v2930_v14 }
 0x183   :  { %v211_v58 = vadd.f32 1e-05, %v209_v56 }
 0x185   :  { %2605 = vrsqrt.f32 %v211_v58  ;;  %vm228_vm14 = vweird.f32 %v211_v58 }
 0x187   :  { %v204_v59 = vpop.xlane.xlu1 %203 }
 0x188   :  { %v208_v60 = vmul.f32 %v204_v59, %v2930_v14 }
 0x18a   :  { %v210_v61 = vadd.f32 1e-05, %v208_v60 }
 0x18b   :  { %v2606_v62 = vpop.eup %2605 }
 0x18c   :  { %2607 = vrsqrt.f32 %v210_v61  ;;  %v223_v63 = vmul.f32 %v2606_v62, %v211_v58  ;;  %vm229_vm15 = vweird.f32 %v2606_v62  ;;  %vm218_vm1 = vweird.f32 %v210_v61 }
 0x18d   :  { %vm230_vm3 = vmor %vm228_vm14, %vm229_vm15  ;;  %vm639_vm14 = vcmp.lt.s32.totalorder %v3059_v16, 32 }
 0x18e   :  { %v224_v2 = vmul.f32 %v2606_v62, %v223_v63  ;;  %vm3149_vm15 = vmand %vm638_vm13, %vm639_vm14 }
 0x190   :  { %v225_v3 = vmul.f32 0.5, %v224_v2  ;;  %v388_v2 = vld [vmem:[%s3844_s3] sm:$0xff] }
 0x192   :  { %v2608_v4 = vpop.eup %2607  ;;  %v226_v8 = vsub.f32 1.5, %v225_v3 }
 0x193   :  { %v213_v6 = vmul.f32 %v2608_v4, %v210_v61  ;;  %vm219_vm2 = vweird.f32 %v2608_v4 }
 0x194   :  { %v227_v15 = vmul.f32 %v2606_v62, %v226_v8  ;;  %vm220_vm4 = vmor %vm218_vm1, %vm219_vm2  ;;  %v2435_v8 = vld [vmem:[%s3844_s3 + $0x20] sm:$0xff] }
 0x195   :  { %v214_v7 = vmul.f32 %v2608_v4, %v213_v6 }
 0x196   :  { %v301_v10 = vpop.f32.mrf.mxu1  ;;  %v231_v23 = vsel %vm230_vm3, %v2606_v62, %v227_v15 }
 0x197   :  { %v215_v11 = vmul.f32 0.5, %v214_v7  ;;  %v3077_v33 = vmul.f32 %v231_v23, %v2995_v0  ;;  %v3079_v34 = vadd.f32 %v301_v10, %v277_v21  ;;  %v266_v37 = vpop.f32.mrf.mxu0  ;;  %v242_v0 = vperm.slane %v3004_v13, 2 }
 0x199   :  { %v216_v12 = vsub.f32 1.5, %v215_v11  ;;  %v235_v39 = vmul.f32 %v3077_v33, %v3015_v27  ;;  %v347_v40 = vsel %vm343_vm7, %v3079_v34, 0.0  ;;  %v420_v41 = vsel %vm3070_vm8, %v3079_v34, 0.0 }
 0x19a   :  { %v3111_v43 = vadd.f32 %v266_v37, %v242_v0  ;;  %v545_v45 = vsel %vm3102_vm11, %v3079_v34, 0.0 }
 0x19b   :  { %v217_v18 = vmul.f32 %v2608_v4, %v216_v12  ;;  %v237_v44 = vadd.f32 %v235_v39, %v3018_v32 }
 0x19d   :  { %v221_v22 = vsel %vm220_vm4, %v2608_v4, %v217_v18  ;;  %v643_v4 = vsel %vm3149_vm15, %v3079_v34, 0.0  ;;  %v389_v34 = vld [vmem:[%s3844_s3 + $0x8] sm:$0xff] }
 0x19e   :  { %v304_v24 = vpop.f32.mrf.mxu1  ;;  %v3065_v25 = vmul.f32 %v221_v22, %v3006_v17 }
 0x19f   :  { %v3067_v26 = vadd.f32 %v304_v24, %v277_v21  ;;  %v269_v19 = vpop.f32.mrf.mxu0 }
 0x1a0   :  { %v234_v31 = vmul.f32 %v3065_v25, %v3015_v27  ;;  %v3124_v20 = vadd.f32 %v269_v19, %v242_v0 }
 0x1a1   :  { %v348_v17 = vsel %vm343_vm7, %v3067_v26, 0.0  ;;  %v421_v35 = vsel %vm3070_vm8, %v3067_v26, 0.0  ;;  %v546_v27 = vsel %vm3102_vm11, %v3067_v26, 0.0  ;;  %v644_v63 = vsel %vm3149_vm15, %v3067_v26, 0.0 }
 0x1a2   :  { %2413 = vmatpush.xpose.msk.msra.mxu3 %vm84_vm0, %v348_v17  ;;  %2417 = vmatpush.xpose.msk.msrb.mxu0 %vm84_vm0, %v421_v35  ;;  %v236_v38 = vadd.f32 %v234_v31, %v3018_v32 }
 0x1a4   :  { %2411 = vmatmul.msk.f32.vlgmr.msra.gmra.mxu2 %vm84_vm0, %v236_v38 }
 0x1a6   :  { %2414 = vmatpush.xpose.msk.msra.mxu3 %vm84_vm0, %v347_v40  ;;  %2418 = vmatpush.xpose.msk.msrb.mxu0 %vm84_vm0, %v420_v41 }
 0x1a9   :  { %2415 = vmatmul.msk.f32.vlgmr.msra.gmra.mxu3 %vm84_vm0, %v3111_v43  ;;  %2419 = vmatmul.msk.f32.vlgmr.msrb.gmra.mxu0 %vm84_vm0, %v3111_v43 }
 0x1aa   :  { %2431 = vmatpush.xpose.msk.msrb.mxu3 %vm84_vm0, %v546_v27 }
 0x1ac   :  { %2412 = vmatmul.msk.f32.gmra.mxu2 %vm84_vm0, %v237_v44 }
 0x1ae   :  { %2432 = vmatpush.xpose.msk.msrb.mxu3 %vm84_vm0, %v545_v45 }
 0x1b1   :  { %2416 = vmatmul.msk.f32.gmra.mxu3 %vm84_vm0, %v3124_v20  ;;  %2420 = vmatmul.msk.f32.gmra.mxu0 %vm84_vm0, %v3124_v20 }
 0x1b9   :  { %2433 = vmatmul.msk.f32.vlgmr.msrb.gmra.mxu3 %vm84_vm0, %v3111_v43 }
 0x1c1   :  { %2434 = vmatmul.msk.f32.gmra.mxu3 %vm84_vm0, %v3124_v20 }
 0x226   :  { %v447_v32 = vpop.f32.mrf.mxu0 }
 0x227   :  { %v453_v47 = vmul.f32 0.35355338, %v447_v32  ;;  %v336_v49 = vpop.f32.mrf.mxu2 }
 0x228   :  { %v337_v56 = vadd.f32 %v336_v49, %v312_v52 }
 0x229   :  { %v458_v50 = vadd.f32 %v2421_v46, %v453_v47 }
 0x22b   :  { %v460_v51 = vsel %vm392_vm12, %v458_v50, -inf }
 0x22c   :  { %v380_v53 = vpop.f32.mrf.mxu3  ;;  %461 = vmax.xlane.f32.xlu0 %v460_v51 }
 0x22d   :  { %v386_v59 = vmul.f32 0.35355338, %v380_v53 }
 0x22e   :  { %v450_v29 = vpop.f32.mrf.mxu0 }
 0x22f   :  { %v454_v54 = vmul.f32 0.35355338, %v450_v29  ;;  %v339_v55 = vpop.f32.mrf.mxu2  ;;  %v390_v3 = vadd.f32 %v388_v2, %v386_v59 }
 0x230   :  { %v340_v57 = vadd.f32 %v339_v55, %v312_v52 }
 0x231   :  { %v459_v58 = vadd.f32 %v2422_v30, %v454_v54  ;;  %v393_v6 = vsel %vm392_vm12, %v390_v3, -inf }
 0x232   :  { %2423 = vmatpush.msk.msrb.mxu1 %vm3070_vm8, %v340_v57  ;;  %2427 = vmatpush.msk.msrb.mxu2 %vm343_vm7, %v340_v57 }
 0x233   :  { %v463_v60 = vsel %vm392_vm12, %v459_v58, -inf  ;;  %2437 = vmatpush.msk.msra.mxu0 %vm3102_vm11, %v340_v57 }
 0x234   :  { %464 = vmax.xlane.f32.xlu1 %v463_v60  ;;  %v383_v62 = vpop.f32.mrf.mxu3  ;;  %2424 = vmatpush.msk.msrb.mxu1 %vm3070_vm8, %v337_v56 }
 0x235   :  { %2428 = vmatpush.msk.msrb.mxu2 %vm343_vm7, %v337_v56  ;;  %2438 = vmatpush.msk.msra.mxu0 %vm3102_vm11, %v337_v56  ;;  %v387_v26 = vmul.f32 0.35355338, %v383_v62  ;;  %v2445_v62 = vld [vmem:[%s3844_s3 + $0x30] sm:$0xff] }
 0x236   :  { %2441 = vmatpush.xpose.msk.msra.mxu1 %vm84_vm0, %v644_v63 }
 0x237   :  { %2447 = vmatpush.msk.msra.mxu2 %vm3149_vm15, %v340_v57  ;;  %v391_v35 = vadd.f32 %v389_v34, %v387_v26 }
 0x239   :  { %2448 = vmatpush.msk.msra.mxu2 %vm3149_vm15, %v337_v56  ;;  %v396_v39 = vsel %vm392_vm12, %v391_v35, -inf }
 0x23a   :  { %2442 = vmatpush.xpose.msk.msra.mxu1 %vm84_vm0, %v643_v4 }
 0x23c   :  { %394 = vmax.xlane.f32.xlu1 %v393_v6  ;;  %v572_v7 = vpop.f32.mrf.mxu3 }
 0x23d   :  { %v578_v9 = vmul.f32 0.35355338, %v572_v7 }
 0x23f   :  { %v583_v10 = vadd.f32 %v2435_v8, %v578_v9 }
 0x241   :  { %v585_v11 = vsel %vm392_vm12, %v583_v10, -inf }
 0x244   :  { %586 = vmax.xlane.f32.xlu1 %v585_v11 }
 0x29f   :  { %v462_v12 = vpop.xlane.xlu0 %461 }
 0x2a0   :  { %v466_v15 = vsub.f32 %v458_v50, %v462_v12 }
 0x2a2   :  { %v468_v18 = vmul.f32 1.442695, %v466_v15 }
 0x2a4   :  { %2609 = vpow2.f32 %v468_v18 }
 0x2a7   :  { %v465_v21 = vpop.xlane.xlu1 %464 }
 0x2a8   :  { %v467_v22 = vsub.f32 %v459_v58, %v465_v21 }
 0x2aa   :  { %v2610_v23 = vpop.eup %2609  ;;  %v470_v24 = vmul.f32 1.442695, %v467_v22 }
 0x2ab   :  { %v472_v31 = vsel %vm392_vm12, %v2610_v23, 0.0 }
 0x2ac   :  { %2611 = vpow2.f32 %v470_v24  ;;  %473 = vadd.xlane.f32.xlu2 %v472_v31 }
 0x2af   :  { %v395_v17 = vpop.xlane.xlu1 %394 }
 0x2b0   :  { %v399_v37 = vsub.f32 %v390_v3, %v395_v17  ;;  %v575_v3 = vpop.f32.mrf.mxu3 }
 0x2b1   :  { %v579_v6 = vmul.f32 0.35355338, %v575_v3  ;;  %v777_v3 = vld [vmem:[%s3847_s6 + $0x10] sm:$0xff] }
 0x2b2   :  { %v2612_v38 = vpop.eup %2611  ;;  %v401_v0 = vmul.f32 1.442695, %v399_v37 }
 0x2b3   :  { %v475_v40 = vsel %vm392_vm12, %v2612_v38, 0.0 }
 0x2b4   :  { %2613 = vpow2.f32 %v401_v0  ;;  %397 = vmax.xlane.f32.xlu2 %v396_v39  ;;  %476 = vadd.xlane.f32.xlu0 %v475_v40 }
 0x2b7   :  { %v587_v41 = vpop.xlane.xlu1 %586 }
 0x2b8   :  { %v591_v27 = vsub.f32 %v583_v10, %v587_v41  ;;  %v2446_v10 = vld [vmem:[%s3844_s3 + $0x38] sm:$0xff] }
 0x2ba   :  { %v2614_v44 = vpop.eup %2613  ;;  %v593_v45 = vmul.f32 1.442695, %v591_v27 }
 0x2bb   :  { %v405_v19 = vsel %vm392_vm12, %v2614_v44, 0.0 }
 0x2bc   :  { %2615 = vpow2.f32 %v593_v45  ;;  %406 = vadd.xlane.f32.xlu1 %v405_v19 }
 0x2c2   :  { %v2616_v32 = vpop.eup %2615 }
 0x2c3   :  { %v597_v46 = vsel %vm392_vm12, %v2616_v32, 0.0 }
 0x2c4   :  { %598 = vadd.xlane.f32.xlu1 %v597_v46 }
 0x31f   :  { %v474_v47 = vpop.xlane.xlu2 %473 }
 0x320   :  { %2617 = vrcp.f32 %v474_v47  ;;  %v2454_v47 = vld [vmem:[%s3845_s4 + $0x78] sm:$0xff] }
 0x321   :  { %760 = vmatpush.msra.mxu3 %v2454_v47 }
 0x326   :  { %v2618_v49 = vpop.eup %2617 }
 0x327   :  { %v477_v50 = vpop.xlane.xlu0 %476  ;;  %v480_v51 = vmul.f32 %v2618_v49, %v2610_v23  ;;  %v398_v63 = vpop.xlane.xlu2 %397  ;;  %v2453_v49 = vld [vmem:[%s3845_s4 + $0x70] sm:$0xff] }
 0x328   :  { %2619 = vrcp.f32 %v477_v50  ;;  %v400_v4 = vsub.f32 %v391_v35, %v398_v63  ;;  %761 = vmatpush.msra.mxu3 %v2453_v49  ;;  %v778_v63 = vld [vmem:[%s3847_s6 + $0x18] sm:$0xff] }
 0x329   :  { %2425 = vmatmul.msk.f32.vlgmr.msrb.gmra.mxu1 %vm392_vm12, %v480_v51 }
 0x32a   :  { %v403_v8 = vmul.f32 1.442695, %v400_v4  ;;  %830 = vmatpush.msrb.mxu1 %v778_v63 }
 0x32c   :  { %831 = vmatpush.msrb.mxu1 %v777_v3 }
 0x32e   :  { %v2620_v52 = vpop.eup %2619 }
 0x32f   :  { %v407_v53 = vpop.xlane.xlu1 %406  ;;  %v481_v29 = vmul.f32 %v2620_v52, %v2612_v38 }
 0x330   :  { %2621 = vrcp.f32 %v407_v53 }
 0x331   :  { %2426 = vmatmul.msk.f32.gmra.mxu1 %vm392_vm12, %v481_v29 }
 0x336   :  { %v2622_v30 = vpop.eup %2621 }
 0x337   :  { %v599_v54 = vpop.xlane.xlu1 %598  ;;  %v413_v55 = vmul.f32 %v2622_v30, %v2614_v44 }
 0x338   :  { %2623 = vrcp.f32 %v599_v54 }
 0x339   :  { %2429 = vmatmul.msk.f32.vlgmr.msrb.gmra.mxu2 %vm392_vm12, %v413_v55  ;;  %2443 = vmatmul.msk.f32.vlgmr.msra.gmra.mxu1 %vm84_vm0, %v3111_v43  ;;  %2625 = vpow2.f32 %v403_v8 }
 0x33e   :  { %v2624_v56 = vpop.eup %2623 }
 0x33f   :  { %v605_v57 = vmul.f32 %v2624_v56, %v2616_v32  ;;  %v2626_v22 = vpop.eup %2625 }
 0x340   :  { %v408_v23 = vsel %vm392_vm12, %v2626_v22, 0.0 }
 0x341   :  { %2439 = vmatmul.msk.f32.vlgmr.msra.gmra.mxu0 %vm392_vm12, %v605_v57  ;;  %2444 = vmatmul.msk.f32.gmra.mxu1 %vm84_vm0, %v3124_v20  ;;  %v2436_v20 = vld [vmem:[%s3844_s3 + $0x28] sm:$0xff] }
 0x342   :  { %v584_v12 = vadd.f32 %v2436_v20, %v579_v6  ;;  %v2452_v57 = vld [vmem:[%s3845_s4 + $0x68] sm:$0xff] }
 0x343   :  { %762 = vmatpush.msra.mxu3 %v2452_v57 }
 0x344   :  { %v588_v18 = vsel %vm392_vm12, %v584_v12, -inf }
 0x3a6   :  { %v3197_v58 = vpop.f32.mrf.mxu1 }
 0x3ae   :  { %v3199_v59 = vpop.f32.mrf.mxu1 }
 0x3b6   :  { %v670_v60 = vpop.f32.mrf.mxu1 }
 0x3b7   :  { %v676_v2 = vmul.f32 0.35355338, %v670_v60  ;;  %v2451_v60 = vld [vmem:[%s3845_s4 + $0x60] sm:$0xff] }
 0x3b8   :  { %763 = vmatpush.msra.mxu3 %v2451_v60 }
 0x3b9   :  { %v681_v43 = vadd.f32 %v2445_v62, %v676_v2  ;;  %v774_v62 = vld [vmem:[%s3846_s5 + $0x18] sm:$0xff]  ;;  %v773_v2 = vld [vmem:[%s3846_s5 + $0x10] sm:$0xff] }
 0x3ba   :  { %801 = vmatpush.msrb.mxu0 %v774_v62 }
 0x3bb   :  { %v683_v7 = vsel %vm392_vm12, %v681_v43, -inf }
 0x3bc   :  { %684 = vmax.xlane.f32.xlu0 %v683_v7  ;;  %802 = vmatpush.msrb.mxu0 %v773_v2 }
 0x3be   :  { %v673_v9 = vpop.f32.mrf.mxu1  ;;  %v630_v7 = vpop.f32.mrf.mxu0 }
 0x3bf   :  { %v677_v11 = vmul.f32 0.35355338, %v673_v9 }
 0x3c1   :  { %v682_v15 = vadd.f32 %v2446_v10, %v677_v11 }
 0x3c3   :  { %v686_v21 = vsel %vm392_vm12, %v682_v15, -inf }
 0x3c4   :  { %589 = vmax.xlane.f32.xlu0 %v588_v18  ;;  %687 = vmax.xlane.f32.xlu2 %v686_v21  ;;  %v772_v21 = vld [vmem:[%s3846_s5 + $0x8] sm:$0xff] }
 0x3c5   :  { %803 = vmatpush.msrb.mxu0 %v772_v21 }
 0x3cc   :  { %409 = vadd.xlane.f32.xlu2 %v408_v23  ;;  %v851_v23 = vperm.slane %v3004_v13, 6 }
 0x42f   :  { %v685_v24 = vpop.xlane.xlu0 %684 }
 0x430   :  { %v689_v26 = vsub.f32 %v681_v43, %v685_v24  ;;  %v534_v43 = vpop.f32.mrf.mxu2  ;;  %v741_v24 = vperm.slane %v3004_v13, 5 }
 0x431   :  { %v535_v6 = vadd.f32 %v534_v43, %v3197_v58  ;;  %v776_v58 = vld [vmem:[%s3847_s6 + $0x8] sm:$0xff] }
 0x432   :  { %v691_v31 = vmul.f32 1.442695, %v689_v26  ;;  %832 = vmatpush.msrb.mxu1 %v776_v58 }
 0x433   :  { %v636_v20 = vadd.f32 %v630_v7, %v535_v6 }
 0x434   :  { %2627 = vpow2.f32 %v691_v31 }
 0x437   :  { %v590_v34 = vpop.xlane.xlu0 %589  ;;  %v688_v17 = vpop.xlane.xlu2 %687 }
 0x438   :  { %v592_v35 = vsub.f32 %v584_v12, %v590_v34  ;;  %v690_v37 = vsub.f32 %v682_v15, %v688_v17 }
 0x43a   :  { %v2628_v38 = vpop.eup %2627  ;;  %v595_v0 = vmul.f32 1.442695, %v592_v35  ;;  %v693_v39 = vmul.f32 1.442695, %v690_v37  ;;  %v782_v35 = vld [vmem:[#allocation5 + $0x18] sm:$0xff]  ;;  %v781_v37 = vld [vmem:[#allocation5 + $0x10] sm:$0xff] }
 0x43b   :  { %v695_v40 = vsel %vm392_vm12, %v2628_v38, 0.0  ;;  %886 = vmatpush.msrb.mxu2 %v782_v35  ;;  %v2471_v35 = vld [vmem:[%s3847_s6 + $0x20] sm:$0xff] }
 0x43c   :  { %2629 = vpow2.f32 %v595_v0  ;;  %696 = vadd.xlane.f32.xlu0 %v695_v40  ;;  %v779_v0 = vld [vmem:[#allocation5] sm:$0xff] }
 0x43d   :  { %2631 = vpow2.f32 %v693_v39  ;;  %887 = vmatpush.msrb.mxu2 %v781_v37 }
 0x43f   :  { %v410_v41 = vpop.xlane.xlu2 %409 }
 0x440   :  { %2633 = vrcp.f32 %v410_v41 }
 0x442   :  { %v2630_v27 = vpop.eup %2629 }
 0x443   :  { %v2632_v44 = vpop.eup %2631  ;;  %v600_v45 = vsel %vm392_vm12, %v2630_v27, 0.0 }
 0x444   :  { %601 = vadd.xlane.f32.xlu0 %v600_v45  ;;  %v698_v19 = vsel %vm392_vm12, %v2632_v44, 0.0 }
 0x445   :  { %699 = vadd.xlane.f32.xlu2 %v698_v19 }
 0x446   :  { %v2634_v32 = vpop.eup %2633 }
 0x447   :  { %v414_v46 = vmul.f32 %v2634_v32, %v2626_v22  ;;  %v771_v22 = vld [vmem:[%s3846_s5] sm:$0xff] }
 0x448   :  { %804 = vmatpush.msrb.mxu0 %v771_v22 }
 0x449   :  { %2430 = vmatmul.msk.f32.gmra.mxu2 %vm392_vm12, %v414_v46 }
 0x458   :  { %853 = vrot.lane.b32.xlu0 %v851_v23, %s2833_s26 }
 0x460   :  { %913 = vrot.lane.b32.xlu0 %v2925_v5, %s2833_s26 }
 0x4af   :  { %v697_v50 = vpop.xlane.xlu0 %696 }
 0x4b0   :  { %2635 = vrcp.f32 %v697_v50 }
 0x4b6   :  { %v2636_v51 = vpop.eup %2635 }
 0x4b7   :  { %v703_v52 = vmul.f32 %v2636_v51, %v2628_v38  ;;  %v602_v53 = vpop.xlane.xlu0 %601  ;;  %v780_v38 = vld [vmem:[#allocation5 + $0x8] sm:$0xff] }
 0x4b8   :  { %2637 = vrcp.f32 %v602_v53  ;;  %v700_v29 = vpop.xlane.xlu2 %699  ;;  %888 = vmatpush.msrb.mxu2 %v780_v38 }
 0x4b9   :  { %2639 = vrcp.f32 %v700_v29  ;;  %2449 = vmatmul.msk.f32.vlgmr.msra.gmra.mxu2 %vm392_vm12, %v703_v52 }
 0x4ba   :  { %889 = vmatpush.msrb.mxu2 %v779_v0  ;;  %v2498_v0 = vld [vmem:[%s3845_s4 + $0xd8] sm:$0xff] }
 0x4be   :  { %v2638_v30 = vpop.eup %2637 }
 0x4bf   :  { %v2640_v54 = vpop.eup %2639  ;;  %v606_v55 = vmul.f32 %v2638_v30, %v2630_v27 }
 0x4c0   :  { %v704_v56 = vmul.f32 %v2640_v54, %v2632_v44 }
 0x4c1   :  { %2440 = vmatmul.msk.f32.gmra.mxu0 %vm392_vm12, %v606_v55 }
 0x4c2   :  { %2450 = vmatmul.msk.f32.gmra.mxu2 %vm392_vm12, %v704_v56 }
 0x4ca   :  { %v854_v63 = vpop.permute.xlu0 %853 }
 0x4cc   :  { %v537_v4 = vpop.f32.mrf.mxu2 }
 0x4cd   :  { %v538_v11 = vadd.f32 %v537_v4, %v3199_v59  ;;  %v775_v59 = vld [vmem:[%s3847_s6] sm:$0xff] }
 0x4ce   :  { %833 = vmatpush.msrb.mxu1 %v775_v59 }
 0x4cf   :  { %2459 = vmatmul.msk.f32.vlgmr.msrb.gmra.mxu1 %vm84_vm0, %v2917_v1 }
 0x4d7   :  { %2460 = vmatmul.msk.f32.gmra.mxu1 %vm84_vm0, %v2925_v5 }
 0x53c   :  { %v728_v8 = vpop.f32.mrf.mxu2 }
 0x53d   :  { %v734_v9 = vadd.f32 %v728_v8, %v636_v20  ;;  %v914_v20 = vpop.permute.xlu0 %913 }
 0x53e   :  { %v633_v10 = vpop.f32.mrf.mxu0 }
 0x53f   :  { %2455 = vmatmul.msk.f32.vlgmr.msra.gmra.mxu3 %vm84_vm0, %v734_v9  ;;  %v637_v12 = vadd.f32 %v633_v10, %v538_v11 }
 0x545   :  { %v731_v15 = vpop.f32.mrf.mxu2 }
 0x546   :  { %v735_v18 = vadd.f32 %v731_v15, %v637_v12 }
 0x548   :  { %2456 = vmatmul.msk.f32.gmra.mxu3 %vm84_vm0, %v735_v18 }
 0x54c   :  { %v835_v39 = vpop.f32.mrf.mxu1 }
 0x554   :  { %v838_v44 = vpop.f32.mrf.mxu1 }
 0x5c2   :  { %v765_v26 = vpop.f32.mrf.mxu3 }
 0x5c3   :  { %v766_v31 = vadd.f32 %v765_v26, %v741_v24 }
 0x5c5   :  { %2457 = vmatmul.msk.f32.vlgmr.msrb.gmra.mxu0 %vm84_vm0, %v766_v31  ;;  %v2474_v31 = vld [vmem:[%s3847_s6 + $0x38] sm:$0xff] }
 0x5c6   :  { %1163 = vmatpush.msra.mxu2 %v2474_v31 }
 0x5cb   :  { %v768_v34 = vpop.f32.mrf.mxu3 }
 0x5cc   :  { %v769_v17 = vadd.f32 %v768_v34, %v741_v24  ;;  %v2473_v34 = vld [vmem:[%s3847_s6 + $0x30] sm:$0xff] }
 0x5cd   :  { %1164 = vmatpush.msra.mxu2 %v2473_v34 }
 0x5ce   :  { %2458 = vmatmul.msk.f32.gmra.mxu0 %vm84_vm0, %v769_v17  ;;  %v2472_v17 = vld [vmem:[%s3847_s6 + $0x28] sm:$0xff] }
 0x5cf   :  { %1165 = vmatpush.msra.mxu2 %v2472_v17 }
 0x5d1   :  { %1166 = vmatpush.msra.mxu2 %v2471_v35 }
 0x642   :  { %v806_v40 = vpop.f32.mrf.mxu0 }
 0x643   :  { %v841_v41 = vadd.f32 %v835_v39, %v806_v40  ;;  %v2497_v39 = vld [vmem:[%s3845_s4 + $0xd0] sm:$0xff] }
 0x645   :  { %v843_v27 = vmul.f32 0.5, %v841_v41  ;;  %v856_v12 = vsub.f32 %v841_v41, %v854_v63  ;;  %v2495_v41 = vld [vmem:[%s3845_s4 + $0xc0] sm:$0xff] }
 0x647   :  { %2641 = vtanh.f32 %v843_v27  ;;  %v858_v15 = vmul.f32 0.5, %v856_v12  ;;  %v1006_v12 = vld [vmem:[%s3849_s8 + $0x8] sm:$0xff] }
 0x64b   :  { %v809_v45 = vpop.f32.mrf.mxu0 }
 0x64c   :  { %v842_v19 = vadd.f32 %v838_v44, %v809_v45 }
 0x64d   :  { %v2642_v32 = vpop.eup %2641 }
 0x64e   :  { %v847_v46 = vadd.f32 1.0, %v2642_v32  ;;  %v844_v47 = vmul.f32 0.5, %v842_v19  ;;  %v857_v2 = vsub.f32 %v842_v19, %v854_v63 }
 0x650   :  { %v849_v49 = vmul.f32 0.5, %v847_v46  ;;  %2643 = vtanh.f32 %v844_v47  ;;  %v859_v3 = vmul.f32 0.5, %v857_v2  ;;  %v991_v2 = vperm.slane %v3004_v13, 7 }
 0x652   :  { %v866_v50 = vmul.f32 %v849_v49, %v2917_v1 }
 0x654   :  { %2461 = vmatmul.msk.f32.vlgmr.msrb.gmra.mxu2 %vm84_vm0, %v866_v50 }
 0x655   :  { %1453 = vmatpush.msrb.mxu2 %v2498_v0 }
 0x656   :  { %v2644_v51 = vpop.eup %2643 }
 0x657   :  { %v848_v52 = vadd.f32 1.0, %v2644_v51  ;;  %1454 = vmatpush.msrb.mxu2 %v2497_v39 }
 0x659   :  { %v850_v53 = vmul.f32 0.5, %v848_v52 }
 0x65b   :  { %v867_v29 = vmul.f32 %v850_v53, %v2925_v5 }
 0x65d   :  { %2462 = vmatmul.msk.f32.gmra.mxu2 %vm84_vm0, %v867_v29 }
 0x6d7   :  { %v891_v30 = vpop.f32.mrf.mxu2 }
 0x6d8   :  { %899 = vrot.lane.b32.xlu1 %v891_v30, %s2834_s27 }
 0x6e0   :  { %v894_v54 = vpop.f32.mrf.mxu2 }
 0x6e1   :  { %901 = vrot.lane.b32.xlu2 %v894_v54, %s2834_s27 }
 0x6e9   :  { %911 = vrot.lane.b32.xlu2 %v2917_v1, %s2833_s26 }
 0x73b   :  { %v902_v55 = vpop.permute.xlu2 %901 }
 0x73c   :  { %v906_v56 = vadd.f32 %v902_v55, %v809_v45  ;;  %v3320_v45 = vld [vmem:[%s3852_s11 + $0x10] sm:$0xff] }
 0x73d   :  { %v3323_v19 = vperm.slane %v3320_v45, 0  ;;  %v3329_v46 = vperm.slane %v3320_v45, 1 }
 0x73e   :  { %2645 = vtanh.f32 %v906_v56 }
 0x73f   :  { %v1351_v32 = vmul.f32 %v3323_v19, %v3065_v25  ;;  %v1352_v49 = vmul.f32 %v3323_v19, %v3077_v33 }
 0x741   :  { %v1353_v47 = vadd.f32 %v1351_v32, %v3329_v46  ;;  %v1354_v50 = vadd.f32 %v1352_v49, %v3329_v46 }
 0x743   :  { %v912_v1 = vpop.permute.xlu2 %911 }
 0x744   :  { %v2646_v57 = vpop.eup %2645 }
 0x745   :  { %923 = vrot.lane.b32.xlu2 %v2646_v57, %s2835_s2 }
 0x74a   :  { %v900_v5 = vpop.permute.xlu1 %899 }
 0x74b   :  { %v905_v60 = vadd.f32 %v900_v5, %v806_v40  ;;  %v2496_v40 = vld [vmem:[%s3845_s4 + $0xc8] sm:$0xff]  ;;  %v1434_v5 = vperm.slane %v3320_v45, 4 }
 0x74c   :  { %1455 = vmatpush.msrb.mxu2 %v2496_v40 }
 0x74d   :  { %2647 = vtanh.f32 %v905_v60 }
 0x74e   :  { %2649 = vtanh.f32 %v859_v3  ;;  %1456 = vmatpush.msrb.mxu2 %v2495_v41 }
 0x74f   :  { %2651 = vtanh.f32 %v858_v15 }
 0x753   :  { %v2648_v62 = vpop.eup %2647 }
 0x754   :  { %921 = vrot.lane.b32.xlu1 %v2648_v62, %s2835_s2  ;;  %v2650_v43 = vpop.eup %2649 }
 0x755   :  { %v863_v4 = vadd.f32 1.0, %v2650_v43  ;;  %v2652_v18 = vpop.eup %2651 }
 0x756   :  { %v862_v21 = vadd.f32 1.0, %v2652_v18 }
 0x757   :  { %v865_v6 = vmul.f32 0.5, %v863_v4 }
 0x758   :  { %v864_v58 = vmul.f32 0.5, %v862_v21  ;;  %v1005_v21 = vld [vmem:[%s3849_s8] sm:$0xff] }
 0x759   :  { %v910_v7 = vsub.f32 1.0, %v865_v6 }
 0x75a   :  { %v909_v22 = vsub.f32 1.0, %v864_v58 }
 0x75b   :  { %v918_v9 = vmul.f32 %v914_v20, %v910_v7 }
 0x75c   :  { %v917_v23 = vmul.f32 %v912_v1, %v909_v22 }
 0x79f   :  { %v924_v8 = vpop.permute.xlu2 %923 }
 0x7a0   :  { %v928_v10 = vmul.f32 %v924_v8, %v865_v6  ;;  %v3375_v6 = vld [vmem:[%s3852_s11 + $0x8] sm:$0x7] }
 0x7a1   :  { %v998_v7 = vperm.slane %v3375_v6, 0  ;;  %v1184_v28 = vperm.slane %v3375_v6, 2 }
 0x7a2   :  { %v3282_v11 = vadd.f32 %v928_v10, %v918_v9  ;;  %v1008_v9 = vld [vmem:[%s3849_s8 + $0x18] sm:$0xff]  ;;  %v1007_v10 = vld [vmem:[%s3849_s8 + $0x10] sm:$0xff] }
 0x7a3   :  { %1035 = vmatpush.msrb.mxu3 %v1008_v9 }
 0x7a4   :  { %935 = vrot.lane.b32.xlu0 %v3282_v11, %s2835_s2 }
 0x7a5   :  { %1036 = vmatpush.msrb.mxu3 %v1007_v10  ;;  %v2492_v10 = vld [vmem:[%s3845_s4 + $0xb8] sm:$0xff] }
 0x7a7   :  { %1037 = vmatpush.msrb.mxu3 %v1006_v12 }
 0x7a9   :  { %1038 = vmatpush.msrb.mxu3 %v1005_v21 }
 0x7c6   :  { %v922_v59 = vpop.permute.xlu1 %921 }
 0x7c7   :  { %v927_v24 = vmul.f32 %v922_v59, %v864_v58 }
 0x7c9   :  { %v3286_v26 = vadd.f32 %v927_v24, %v917_v23 }
 0x7cb   :  { %933 = vrot.lane.b32.xlu1 %v3286_v26, %s2835_s2 }
 0x816   :  { %v936_v37 = vpop.permute.xlu0 %935 }
 0x817   :  { %v942_v38 = vsel %vm84_vm0, %v936_v37, 0.0 }
 0x818   :  { %943 = vadd.xlane.f32.xlu1 %v942_v38 }
 0x831   :  { %993 = vrot.lane.b32.xlu1 %v991_v2, %s2833_s26  ;;  %v1064_v2 = vld [vmem:[%s3851_s10] sm:$0xff] }
 0x83d   :  { %v934_v27 = vpop.permute.xlu1 %933 }
 0x83e   :  { %2477 = vmatmul.msk.f32.vlgmr.msra.gmra.mxu2 %vm84_vm0, %v934_v27  ;;  %v939_v44 = vsel %vm84_vm0, %v934_v27, 0.0 }
 0x83f   :  { %940 = vadd.xlane.f32.xlu2 %v939_v44 }
 0x846   :  { %2478 = vmatmul.msk.f32.gmra.mxu2 %vm84_vm0, %v936_v37 }
 0x84e   :  { %2499 = vmatmul.msk.f32.vlgmr.msrb.gmra.mxu2 %vm84_vm0, %v1353_v47 }
 0x856   :  { %2500 = vmatmul.msk.f32.gmra.mxu2 %vm84_vm0, %v1354_v50 }
 0x88b   :  { %v944_v53 = vpop.xlane.xlu1 %943 }
 0x88c   :  { %v946_v29 = vmul.f32 %v944_v53, %v2930_v14 }
 0x88e   :  { %v3342_v54 = vsub.f32 %v3282_v11, %v946_v29  ;;  %v1071_v29 = vld [vmem:[%s3851_s10 + $0x38] sm:$0xff] }
 0x88f   :  { %1088 = vmatpush.msra.mxu0 %v1071_v29 }
 0x890   :  { %v950_v33 = vmul.f32 %v3342_v54, %v3342_v54 }
 0x8a3   :  { %v994_v38 = vpop.permute.xlu1 %993 }
 0x8b2   :  { %v941_v51 = vpop.xlane.xlu2 %940 }
 0x8b3   :  { %v945_v52 = vmul.f32 %v941_v51, %v2930_v14 }
 0x8b5   :  { %v947_v25 = vsub.f32 %v3286_v26, %v945_v52 }
 0x8b7   :  { %v949_v30 = vmul.f32 %v947_v25, %v947_v25 }
 0x8b9   :  { %953 = vrot.lane.b32.xlu0 %v949_v30, %s2835_s2  ;;  %v1070_v30 = vld [vmem:[%s3851_s10 + $0x30] sm:$0xff] }
 0x8ba   :  { %1089 = vmatpush.msra.mxu0 %v1070_v30  ;;  %v1117_v30 = vld [vmem:[#allocation5 + $0x38] sm:$0xff] }
 0x8bb   :  { %1231 = vmatpush.msra.mxu3 %v1117_v30 }
 0x8c1   :  { %v3346_v55 = vpop.f32.mrf.mxu2  ;;  %955 = vrot.lane.b32.xlu0 %v950_v33, %s2835_s2  ;;  %v1068_v33 = vld [vmem:[%s3851_s10 + $0x20] sm:$0xff] }
 0x8c9   :  { %v3349_v56 = vpop.f32.mrf.mxu2 }
 0x8d1   :  { %v1458_v57 = vpop.f32.mrf.mxu2 }
 0x8d2   :  { %v3354_v63 = vadd.f32 %v1458_v57, %v1434_v5  ;;  %v1067_v57 = vld [vmem:[%s3851_s10 + $0x18] sm:$0xff] }
 0x8d9   :  { %v1461_v60 = vpop.f32.mrf.mxu2 }
 0x8da   :  { %v3352_v62 = vadd.f32 %v1461_v60, %v1434_v5  ;;  %v1066_v5 = vld [vmem:[%s3851_s10 + $0x10] sm:$0xff]  ;;  %v1065_v60 = vld [vmem:[%s3851_s10 + $0x8] sm:$0xff] }
 0x8dc   :  { %2513 = vmatpush.msk.msra.mxu2 %vm343_vm7, %v3352_v62 }
 0x8de   :  { %2514 = vmatpush.msk.msra.mxu2 %vm343_vm7, %v3354_v63 }
 0x8e0   :  { %2529 = vmatpush.msk.msrb.mxu2 %vm3149_vm15, %v3352_v62 }
 0x8e2   :  { %2530 = vmatpush.msk.msrb.mxu2 %vm3149_vm15, %v3354_v63 }
 0x92b   :  { %v954_v3 = vpop.permute.xlu0 %953 }
 0x92c   :  { %v959_v43 = vsel %vm84_vm0, %v954_v3, 0.0  ;;  %v2593_v3 = vld [vmem:[%s3850_s9] ss:$0 sm:$0xff] }
 0x92d   :  { %960 = vadd.xlane.f32.xlu0 %v959_v43 }
 0x933   :  { %v956_v4 = vpop.permute.xlu0 %955 }
 0x934   :  { %v962_v1 = vsel %vm84_vm0, %v956_v4, 0.0  ;;  %v2470_v4 = vld [vmem:[%s3846_s5 + $0x38] sm:$0xff] }
 0x935   :  { %963 = vadd.xlane.f32.xlu2 %v962_v1  ;;  %v2469_v1 = vld [vmem:[%s3846_s5 + $0x30] sm:$0xff]  ;;  %1136 = vmatpush.msra.mxu1 %v2470_v4 }
 0x937   :  { %1137 = vmatpush.msra.mxu1 %v2469_v1 }
 0x94d   :  { %1000 = vrot.lane.b32.xlu2 %v998_v7, %s2833_s26 }
 0x9a0   :  { %v961_v13 = vpop.xlane.xlu0 %960 }
 0x9a1   :  { %v965_v20 = vmul.f32 %v961_v13, %v2930_v14  ;;  %v2468_v13 = vld [vmem:[%s3846_s5 + $0x28] sm:$0xff] }
 0x9a2   :  { %1138 = vmatpush.msra.mxu1 %v2468_v13 }
 0x9a3   :  { %v967_v8 = vadd.f32 1e-05, %v965_v20 }
 0x9a5   :  { %2653 = vrsqrt.f32 %v967_v8  ;;  %vm975_vm2 = vweird.f32 %v967_v8 }
 0x9a8   :  { %v964_v15 = vpop.xlane.xlu2 %963 }
 0x9a9   :  { %v966_v18 = vmul.f32 %v964_v15, %v2930_v14  ;;  %v2491_v15 = vld [vmem:[%s3845_s4 + $0xb0] sm:$0xff] }
 0x9ab   :  { %v2654_v58 = vpop.eup %2653  ;;  %v968_v22 = vadd.f32 1e-05, %v966_v18 }
 0x9ac   :  { %v970_v59 = vmul.f32 %v2654_v58, %v967_v8  ;;  %vm976_vm1 = vweird.f32 %v2654_v58  ;;  %v2467_v8 = vld [vmem:[%s3846_s5 + $0x20] sm:$0xff] }
 0x9ad   :  { %2655 = vrsqrt.f32 %v968_v22  ;;  %vm977_vm3 = vmor %vm975_vm2, %vm976_vm1  ;;  %vm985_vm5 = vweird.f32 %v968_v22  ;;  %1139 = vmatpush.msra.mxu1 %v2467_v8 }
 0x9ae   :  { %v971_v23 = vmul.f32 %v2654_v58, %v970_v59 }
 0x9af   :  { %1418 = vmatpush.msrb.mxu1 %v2492_v10 }
 0x9b0   :  { %v972_v24 = vmul.f32 0.5, %v971_v23  ;;  %v1001_v41 = vpop.permute.xlu2 %1000 }
 0x9b1   :  { %1419 = vmatpush.msrb.mxu1 %v2491_v15  ;;  %v1399_v15 = vperm.slane %v3320_v45, 3 }
 0x9b2   :  { %v973_v31 = vsub.f32 1.5, %v972_v24 }
 0x9b3   :  { %v2656_v34 = vpop.eup %2655 }
 0x9b4   :  { %v980_v17 = vmul.f32 %v2656_v34, %v968_v22  ;;  %v974_v35 = vmul.f32 %v2654_v58, %v973_v31  ;;  %vm986_vm4 = vweird.f32 %v2656_v34 }
 0x9b5   :  { %vm987_vm6 = vmor %vm985_vm5, %vm986_vm4 }
 0x9b6   :  { %v981_v37 = vmul.f32 %v2656_v34, %v980_v17  ;;  %v978_v0 = vsel %vm977_vm3, %v2654_v58, %v974_v35 }
 0x9b7   :  { %v989_v39 = vmul.f32 %v978_v0, %v947_v25 }
 0x9b8   :  { %v982_v40 = vmul.f32 0.5, %v981_v37 }
 0x9b9   :  { %v996_v27 = vmul.f32 %v994_v38, %v989_v39 }
 0x9ba   :  { %v983_v44 = vsub.f32 1.5, %v982_v40 }
 0x9bb   :  { %v1003_v32 = vadd.f32 %v1001_v41, %v996_v27  ;;  %v2490_v27 = vld [vmem:[%s3845_s4 + $0xa8] sm:$0xff] }
 0x9bc   :  { %v984_v47 = vmul.f32 %v2656_v34, %v983_v44  ;;  %1420 = vmatpush.msrb.mxu1 %v2490_v27  ;;  %v2489_v44 = vld [vmem:[%s3845_s4 + $0xa0] sm:$0xff] }
 0x9bd   :  { %1015 = vrot.lane.b32.xlu0 %v1003_v32, %s2835_s2  ;;  %v1072_v32 = vperm.slane %v3375_v6, 1 }
 0x9be   :  { %v988_v49 = vsel %vm987_vm6, %v2656_v34, %v984_v47  ;;  %1421 = vmatpush.msrb.mxu1 %v2489_v44 }
 0x9bf   :  { %v990_v50 = vmul.f32 %v988_v49, %v3342_v54  ;;  %v1069_v54 = vld [vmem:[%s3851_s10 + $0x28] sm:$0xff] }
 0x9c0   :  { %1090 = vmatpush.msra.mxu0 %v1069_v54  ;;  %v2486_v54 = vld [vmem:[%s3845_s4 + $0x98] sm:$0xff] }
 0x9c1   :  { %v997_v51 = vmul.f32 %v994_v38, %v990_v50 }
 0x9c2   :  { %1091 = vmatpush.msra.mxu0 %v1068_v33  ;;  %v1116_v33 = vld [vmem:[#allocation5 + $0x30] sm:$0xff] }
 0x9c3   :  { %v1004_v52 = vadd.f32 %v1001_v41, %v997_v51  ;;  %1232 = vmatpush.msra.mxu3 %v1116_v33 }
 0x9c4   :  { %1092 = vmatpush.msra.mxu0 %v1067_v57  ;;  %v1115_v57 = vld [vmem:[#allocation5 + $0x28] sm:$0xff] }
 0x9c5   :  { %1017 = vrot.lane.b32.xlu1 %v1004_v52, %s2835_s2  ;;  %v1347_v52 = vmul.f32 %v3323_v19, %v3024_v36  ;;  %v2485_v36 = vld [vmem:[%s3845_s4 + $0x90] sm:$0xff]  ;;  %1233 = vmatpush.msra.mxu3 %v1115_v57 }
 0x9c6   :  { %1093 = vmatpush.msra.mxu0 %v1066_v5  ;;  %v1114_v5 = vld [vmem:[#allocation5 + $0x20] sm:$0xff] }
 0x9c7   :  { %1234 = vmatpush.msra.mxu3 %v1114_v5 }
 0x9c8   :  { %1094 = vmatpush.msra.mxu0 %v1065_v60  ;;  %v2483_v60 = vld [vmem:[%s3845_s4 + $0x80] sm:$0xff] }
 0x9ca   :  { %1095 = vmatpush.msra.mxu0 %v1064_v2 }
 0x9cc   :  { %1383 = vmatpush.msrb.mxu0 %v2486_v54 }
 0x9ce   :  { %1384 = vmatpush.msrb.mxu0 %v2485_v36 }
 0xa2f   :  { %v1016_v53 = vpop.permute.xlu0 %1015 }
 0xa30   :  { %2463 = vmatmul.msk.f32.vlgmr.msrb.gmra.mxu3 %vm84_vm0, %v1016_v53  ;;  %v1349_v53 = vadd.f32 %v1347_v52, %v3329_v46 }
 0xa37   :  { %v1018_v25 = vpop.permute.xlu1 %1017 }
 0xa38   :  { %2464 = vmatmul.msk.f32.gmra.mxu3 %vm84_vm0, %v1018_v25  ;;  %v1348_v25 = vmul.f32 %v3323_v19, %v3035_v48  ;;  %v2484_v48 = vld [vmem:[%s3845_s4 + $0x88] sm:$0xff] }
 0xa39   :  { %1385 = vmatpush.msrb.mxu0 %v2484_v48 }
 0xa3a   :  { %v1350_v29 = vadd.f32 %v1348_v25, %v3329_v46 }
 0xa3b   :  { %1386 = vmatpush.msrb.mxu0 %v2483_v60 }
 0xab3   :  { %v1040_v43 = vpop.f32.mrf.mxu3 }
 0xab4   :  { %v1041_v7 = vadd.f32 %v2593_v3, %v1040_v43 }
 0xab6   :  { %v1048_v20 = vmul.f32 0.044715, %v1041_v7  ;;  %v1046_v35 = vmul.f32 0.5, %v1041_v7 }
 0xab8   :  { %v1050_v9 = vmul.f32 %v1048_v20, %v1041_v7 }
 0xaba   :  { %v1052_v12 = vmul.f32 %v1050_v9, %v1041_v7 }
 0xabb   :  { %v1043_v18 = vpop.f32.mrf.mxu3 }
 0xabc   :  { %v1054_v21 = vadd.f32 %v1052_v12, %v1041_v7  ;;  %v1044_v58 = vadd.f32 %v2593_v3, %v1043_v18 }
 0xabe   :  { %v1056_v22 = vmul.f32 0.7978846, %v1054_v21  ;;  %v1049_v59 = vmul.f32 0.044715, %v1044_v58  ;;  %v1047_v39 = vmul.f32 0.5, %v1044_v58 }
 0xac0   :  { %2657 = vtanh.f32 %v1056_v22  ;;  %v1051_v23 = vmul.f32 %v1049_v59, %v1044_v58 }
 0xac2   :  { %v1053_v24 = vmul.f32 %v1051_v23, %v1044_v58 }
 0xac4   :  { %v1055_v31 = vadd.f32 %v1053_v24, %v1044_v58 }
 0xac6   :  { %v2658_v34 = vpop.eup %2657  ;;  %v1057_v17 = vmul.f32 0.7978846, %v1055_v31 }
 0xac7   :  { %v1060_v37 = vadd.f32 1.0, %v2658_v34 }
 0xac8   :  { %2659 = vtanh.f32 %v1057_v17 }
 0xac9   :  { %v1062_v38 = vmul.f32 %v1060_v37, %v1046_v35 }
 0xacb   :  { %2465 = vmatmul.msk.f32.vlgmr.msra.gmra.mxu0 %vm1073_vm9, %v1062_v38 }
 0xace   :  { %v2660_v0 = vpop.eup %2659 }
 0xacf   :  { %v1061_v40 = vadd.f32 1.0, %v2660_v0 }
 0xad1   :  { %v1063_v41 = vmul.f32 %v1061_v40, %v1047_v39 }
 0xad3   :  { %2466 = vmatmul.msk.f32.gmra.mxu0 %vm1073_vm9, %v1063_v41 }
 0xb48   :  { %v1097_v47 = vpop.f32.mrf.mxu0 }
 0xb49   :  { %v1098_v49 = vadd.f32 %v1097_v47, %v1072_v32 }
 0xb4b   :  { %2475 = vmatmul.msk.f32.vlgmr.msra.gmra.mxu1 %vm84_vm0, %v1098_v49 }
 0xb4c   :  { %2509 = vmatpush.msk.msra.mxu1 %vm3070_vm8, %v3352_v62 }
 0xb4e   :  { %2510 = vmatpush.msk.msra.mxu1 %vm3070_vm8, %v3354_v63 }
 0xb50   :  { %v1100_v50 = vpop.f32.mrf.mxu0 }
 0xb51   :  { %v1101_v51 = vadd.f32 %v1100_v50, %v1072_v32 }
 0xb53   :  { %2476 = vmatmul.msk.f32.gmra.mxu1 %vm84_vm0, %v1101_v51 }
 0xb5b   :  { %2493 = vmatmul.msk.f32.vlgmr.msrb.gmra.mxu1 %vm84_vm0, %v1349_v53 }
 0xb63   :  { %2494 = vmatmul.msk.f32.gmra.mxu1 %vm84_vm0, %v1350_v29 }
 0xbc8   :  { %v1141_v2 = vpop.f32.mrf.mxu1 }
 0xbc9   :  { %v3481_v3 = vadd.f32 %v3346_v55, %v1141_v2 }
 0xbcb   :  { %v1176_v43 = vmul.f32 0.5, %v3481_v3 }
 0xbcd   :  { %2661 = vtanh.f32 %v1176_v43 }
 0xbd0   :  { %v1144_v4 = vpop.f32.mrf.mxu1 }
 0xbd1   :  { %v3485_v1 = vadd.f32 %v3349_v56, %v1144_v4 }
 0xbd3   :  { %v2662_v7 = vpop.eup %2661  ;;  %v1177_v13 = vmul.f32 0.5, %v3485_v1 }
 0xbd4   :  { %v1180_v20 = vadd.f32 1.0, %v2662_v7 }
 0xbd5   :  { %2663 = vtanh.f32 %v1177_v13 }
 0xbd6   :  { %v1182_v8 = vmul.f32 0.5, %v1180_v20 }
 0xbd8   :  { %1201 = vrot.lane.b32.xlu2 %v1182_v8, %s2833_s26  ;;  %v1423_v9 = vpop.f32.mrf.mxu1 }
 0xbd9   :  { %v1424_v56 = vadd.f32 %v1423_v9, %v1399_v15 }
 0xbdb   :  { %v2664_v10 = vpop.eup %2663  ;;  %v1464_v23 = vsel %vm343_vm7, %v1424_v56, 0.0  ;;  %v1529_v24 = vsel %vm3070_vm8, %v1424_v56, 0.0  ;;  %v1736_v31 = vsel %vm3149_vm15, %v1424_v56, 0.0  ;;  %v1646_v38 = vsel %vm3102_vm11, %v1424_v56, 0.0 }
 0xbdc   :  { %v1181_v12 = vadd.f32 1.0, %v2664_v10 }
 0xbde   :  { %v1183_v55 = vmul.f32 0.5, %v1181_v12 }
 0xbe0   :  { %v1426_v18 = vpop.f32.mrf.mxu1  ;;  %1203 = vrot.lane.b32.xlu1 %v1183_v55, %s2833_s26 }
 0xbe1   :  { %v1427_v21 = vadd.f32 %v1426_v18, %v1399_v15 }
 0xbe3   :  { %v1465_v58 = vsel %vm343_vm7, %v1427_v21, 0.0  ;;  %v1530_v22 = vsel %vm3070_vm8, %v1427_v21, 0.0  ;;  %v1737_v59 = vsel %vm3149_vm15, %v1427_v21, 0.0  ;;  %v1647_v61 = vsel %vm3102_vm11, %v1427_v21, 0.0 }
 0xbe4   :  { %2501 = vmatpush.xpose.msk.msrb.mxu3 %vm84_vm0, %v1465_v58  ;;  %2505 = vmatpush.xpose.msk.msra.mxu0 %vm84_vm0, %v1530_v22 }
 0xbe5   :  { %2525 = vmatpush.xpose.msk.msrb.mxu1 %vm84_vm0, %v1737_v59 }
 0xbe8   :  { %2502 = vmatpush.xpose.msk.msrb.mxu3 %vm84_vm0, %v1464_v23  ;;  %2506 = vmatpush.xpose.msk.msra.mxu0 %vm84_vm0, %v1529_v24 }
 0xbe9   :  { %2526 = vmatpush.xpose.msk.msrb.mxu1 %vm84_vm0, %v1736_v31 }
 0xc32   :  { %v1202_v34 = vpop.permute.xlu2 %1201 }
 0xc33   :  { %v1207_v17 = vmul.f32 %v1202_v34, %v3286_v26 }
 0xc35   :  { %1211 = vrot.lane.b32.xlu2 %v1207_v17, %s2835_s2 }
 0xc52   :  { %v1204_v35 = vpop.permute.xlu1 %1203 }
 0xc53   :  { %v1208_v16 = vmul.f32 %v1204_v35, %v3282_v11 }
 0xc55   :  { %1213 = vrot.lane.b32.xlu0 %v1208_v16, %s2835_s2 }
 0xc5d   :  { %1186 = vrot.lane.b32.xlu0 %v1184_v28, %s2833_s26 }
 0xc8f   :  { %v1212_v37 = vpop.permute.xlu2 %1211 }
 0xc90   :  { %2479 = vmatmul.msk.f32.vlgmr.msra.gmra.mxu3 %vm84_vm0, %v1212_v37 }
 0xc91   :  { %2517 = vmatpush.xpose.msk.msra.mxu3 %vm84_vm0, %v1647_v61 }
 0xc95   :  { %2518 = vmatpush.xpose.msk.msra.mxu3 %vm84_vm0, %v1646_v38 }
 0xcc7   :  { %v1214_v0 = vpop.permute.xlu0 %1213 }
 0xcc8   :  { %2480 = vmatmul.msk.f32.gmra.mxu3 %vm84_vm0, %v1214_v0 }
 0xccf   :  { %v1187_v49 = vpop.permute.xlu0 %1186 }
 0xcd0   :  { %v1189_v50 = vsub.f32 %v3481_v3, %v1187_v49  ;;  %v1190_v52 = vsub.f32 %v3485_v1, %v1187_v49 }
 0xcd2   :  { %v1191_v51 = vmul.f32 0.5, %v1189_v50  ;;  %v1192_v53 = vmul.f32 0.5, %v1190_v52 }
 0xd13   :  { %v1236_v39 = vpop.f32.mrf.mxu3 }
 0xd14   :  { %1244 = vrot.lane.b32.xlu1 %v1236_v39, %s2834_s27 }
 0xd4b   :  { %v1239_v6 = vpop.f32.mrf.mxu3 }
 0xd4c   :  { %1246 = vrot.lane.b32.xlu2 %v1239_v6, %s2834_s27 }
 0xd86   :  { %v1245_v40 = vpop.permute.xlu1 %1244 }
 0xd87   :  { %v1250_v41 = vadd.f32 %v1245_v40, %v1141_v2 }
 0xd89   :  { %2665 = vtanh.f32 %v1250_v41 }
 0xd8f   :  { %v2666_v27 = vpop.eup %2665 }
 0xd90   :  { %1260 = vrot.lane.b32.xlu1 %v2666_v27, %s2835_s2 }
 0xda6   :  { %v1247_v44 = vpop.permute.xlu2 %1246 }
 0xda7   :  { %v1251_v32 = vadd.f32 %v1247_v44, %v1144_v4 }
 0xda9   :  { %2667 = vtanh.f32 %v1251_v32 }
 0xdaa   :  { %2669 = vtanh.f32 %v1191_v51 }
 0xdab   :  { %2671 = vtanh.f32 %v1192_v53 }
 0xdaf   :  { %v2668_v47 = vpop.eup %2667 }
 0xdb0   :  { %1262 = vrot.lane.b32.xlu2 %v2668_v47, %s2835_s2  ;;  %v2670_v25 = vpop.eup %2669 }
 0xdb1   :  { %v1195_v29 = vadd.f32 1.0, %v2670_v25  ;;  %v2672_v54 = vpop.eup %2671 }
 0xdb2   :  { %v1196_v36 = vadd.f32 1.0, %v2672_v54  ;;  %v1360_v54 = vperm.slane %v3320_v45, 2 }
 0xdb3   :  { %v1197_v30 = vmul.f32 0.5, %v1195_v29 }
 0xdb4   :  { %v1198_v60 = vmul.f32 0.5, %v1196_v36 }
 0xdb5   :  { %v1254_v33 = vsub.f32 1.0, %v1197_v30 }
 0xdb6   :  { %v1255_v3 = vsub.f32 1.0, %v1198_v60 }
 0xdb7   :  { %v1256_v48 = vmul.f32 %v1254_v33, %v3286_v26 }
 0xdb8   :  { %v1257_v4 = vmul.f32 %v1255_v3, %v3282_v11 }
 0xe02   :  { %v1261_v57 = vpop.permute.xlu1 %1260 }
 0xe03   :  { %v1266_v5 = vmul.f32 %v1261_v57, %v1197_v30 }
 0xe05   :  { %v3530_v2 = vadd.f32 %v1266_v5, %v1256_v48 }
 0xe07   :  { %1275 = vrot.lane.b32.xlu0 %v3530_v2, %s2835_s2 }
 0xe0a   :  { %v1263_v43 = vpop.permute.xlu2 %1262 }
 0xe0b   :  { %v1267_v1 = vmul.f32 %v1263_v43, %v1198_v60 }
 0xe0d   :  { %v3535_v7 = vadd.f32 %v1267_v1, %v1257_v4  ;;  %v2742_v4 = vld [vmem:[%s3844_s3 + $0x18] sm:$0xff] }
 0xe0f   :  { %1277 = vrot.lane.b32.xlu1 %v3535_v7, %s2835_s2 }
 0xe79   :  { %v3539_v13 = vpop.permute.xlu0 %1275 }
 0xe7a   :  { %v1281_v26 = vsel %vm84_vm0, %v3539_v13, 0.0 }
 0xe7b   :  { %1282 = vadd.xlane.f32.xlu2 %v1281_v26 }
 0xe81   :  { %v3543_v20 = vpop.permute.xlu1 %1277 }
 0xe82   :  { %v1284_v8 = vsel %vm84_vm0, %v3543_v20, 0.0 }
 0xe83   :  { %1285 = vadd.xlane.f32.xlu0 %v1284_v8 }
 0xe97   :  { %1335 = vrot.lane.b32.xlu0 %v3323_v19, %s2833_s26 }
 0xeee   :  { %v1283_v11 = vpop.xlane.xlu2 %1282 }
 0xeef   :  { %v1287_v9 = vmul.f32 %v1283_v11, %v2930_v14  ;;  %v2743_v11 = vld [vmem:[%s3844_s3] sm:$0xff] }
 0xef1   :  { %v1289_v10 = vsub.f32 %v3530_v2, %v1287_v9 }
 0xef3   :  { %v1291_v12 = vmul.f32 %v1289_v10, %v1289_v10 }
 0xef5   :  { %1295 = vrot.lane.b32.xlu1 %v1291_v12, %s2835_s2 }
 0xef6   :  { %v1286_v55 = vpop.xlane.xlu0 %1285 }
 0xef7   :  { %v1288_v15 = vmul.f32 %v1286_v55, %v2930_v14 }
 0xef9   :  { %v1290_v18 = vsub.f32 %v3535_v7, %v1288_v15 }
 0xefb   :  { %v1292_v21 = vmul.f32 %v1290_v18, %v1290_v18 }
 0xefd   :  { %1297 = vrot.lane.b32.xlu1 %v1292_v21, %s2835_s2 }
 0xf09   :  { %v1336_v6 = vpop.permute.xlu0 %1335 }
 0xf67   :  { %v1296_v56 = vpop.permute.xlu1 %1295 }
 0xf68   :  { %v1301_v58 = vsel %vm84_vm0, %v1296_v56, 0.0 }
 0xf69   :  { %1302 = vadd.xlane.f32.xlu1 %v1301_v58 }
 0xf6f   :  { %v1298_v19 = vpop.permute.xlu1 %1297 }
 0xf70   :  { %v1304_v22 = vsel %vm84_vm0, %v1298_v19, 0.0 }
 0xf71   :  { %1305 = vadd.xlane.f32.xlu2 %v1304_v22 }
 0xf89   :  { %1342 = vrot.lane.b32.xlu2 %v3329_v46, %s2833_s26 }
 0xfdc   :  { %v1303_v59 = vpop.xlane.xlu1 %1302 }
 0xfdd   :  { %v1307_v23 = vmul.f32 %v1303_v59, %v2930_v14 }
 0xfdf   :  { %v1309_v24 = vadd.f32 1e-05, %v1307_v23 }
 0xfe1   :  { %2673 = vrsqrt.f32 %v1309_v24  ;;  %vm1317_vm8 = vweird.f32 %v1309_v24 }
 0xfe4   :  { %v1306_v31 = vpop.xlane.xlu2 %1305 }
 0xfe5   :  { %v1308_v34 = vmul.f32 %v1306_v31, %v2930_v14  ;;  %v2744_v31 = vld [vmem:[%s3844_s3 + $0x20] sm:$0xff] }
 0xfe7   :  { %v2674_v17 = vpop.eup %2673  ;;  %v1310_v35 = vadd.f32 1e-05, %v1308_v34 }
 0xfe8   :  { %v1312_v16 = vmul.f32 %v2674_v17, %v1309_v24  ;;  %vm1318_vm7 = vweird.f32 %v2674_v17 }
 0xfe9   :  { %2675 = vrsqrt.f32 %v1310_v35  ;;  %vm1319_vm10 = vmor %vm1317_vm8, %vm1318_vm7  ;;  %vm1327_vm14 = vweird.f32 %v1310_v35 }
 0xfea   :  { %v1313_v28 = vmul.f32 %v2674_v17, %v1312_v16 }
 0xfec   :  { %v1314_v37 = vmul.f32 0.5, %v1313_v28  ;;  %v1343_v44 = vpop.permute.xlu2 %1342 }
 0xfee   :  { %v1315_v61 = vsub.f32 1.5, %v1314_v37 }
 0xfef   :  { %v2676_v38 = vpop.eup %2675 }
 0xff0   :  { %v1322_v0 = vmul.f32 %v2676_v38, %v1310_v35  ;;  %v1316_v46 = vmul.f32 %v2674_v17, %v1315_v61  ;;  %vm1328_vm13 = vweird.f32 %v2676_v38 }
 0xff1   :  { %vm1329_vm15 = vmor %vm1327_vm14, %vm1328_vm13 }
 0xff2   :  { %v1323_v39 = vmul.f32 %v2676_v38, %v1322_v0  ;;  %v1320_v40 = vsel %vm1319_vm10, %v2674_v17, %v1316_v46 }
 0xff3   :  { %v1331_v41 = vmul.f32 %v1320_v40, %v1289_v10 }
 0xff4   :  { %v1324_v27 = vmul.f32 0.5, %v1323_v39 }
 0xff5   :  { %v1338_v32 = vmul.f32 %v1336_v6, %v1331_v41 }
 0xff6   :  { %v1325_v47 = vsub.f32 1.5, %v1324_v27 }
 0xff7   :  { %v1345_v49 = vadd.f32 %v1343_v44, %v1338_v32 }
 0xff8   :  { %v1326_v50 = vmul.f32 %v2676_v38, %v1325_v47  ;;  %v2546_v47 = vld [vmem:[%s3847_s6 + $0x58] sm:$0xff] }
 0xff9   :  { %1363 = vrot.lane.b32.xlu1 %v1345_v49, %s2835_s2 }
 0xffa   :  { %v1330_v51 = vsel %vm1329_vm15, %v2676_v38, %v1326_v50  ;;  %v2745_v38 = vld [vmem:[%s3844_s3 + $0x8] sm:$0xff]  ;;  %v2545_v50 = vld [vmem:[%s3847_s6 + $0x50] sm:$0xff] }
 0xffb   :  { %v1332_v52 = vmul.f32 %v1330_v51, %v1290_v18 }
 0xffd   :  { %v1339_v53 = vmul.f32 %v1336_v6, %v1332_v52  ;;  %v2544_v52 = vld [vmem:[%s3847_s6 + $0x48] sm:$0xff] }
 0xfff   :  { %v1346_v25 = vadd.f32 %v1343_v44, %v1339_v53  ;;  %v2543_v53 = vld [vmem:[%s3847_s6 + $0x40] sm:$0xff] }
0x1001   :  { %1365 = vrot.lane.b32.xlu0 %v1346_v25, %s2835_s2 }
0x106b   :  { %v1364_v29 = vpop.permute.xlu1 %1363 }
0x106c   :  { %2487 = vmatmul.msk.f32.vlgmr.msrb.gmra.mxu0 %vm84_vm0, %v1364_v29 }
0x106d   :  { %2521 = vmatpush.msk.msrb.mxu0 %vm3102_vm11, %v3352_v62 }
0x106f   :  { %2522 = vmatpush.msk.msrb.mxu0 %vm3102_vm11, %v3354_v63  ;;  %v2741_v63 = vld [vmem:[%s3844_s3 + $0x10] sm:$0xff] }
0x1073   :  { %v1366_v30 = vpop.permute.xlu0 %1365 }
0x1074   :  { %2488 = vmatmul.msk.f32.gmra.mxu0 %vm84_vm0, %v1366_v30 }
0x10e9   :  { %v1388_v33 = vpop.f32.mrf.mxu0 }
0x10ea   :  { %v3572_v36 = vadd.f32 %v1388_v33, %v1360_v54 }
0x10ec   :  { %2503 = vmatmul.msk.f32.vlgmr.msrb.gmra.mxu3 %vm84_vm0, %v3572_v36  ;;  %2507 = vmatmul.msk.f32.vlgmr.msra.gmra.mxu0 %vm84_vm0, %v3572_v36 }
0x10f1   :  { %v1391_v57 = vpop.f32.mrf.mxu0 }
0x10f2   :  { %v3578_v62 = vadd.f32 %v1391_v57, %v1360_v54 }
0x10f4   :  { %2504 = vmatmul.msk.f32.gmra.mxu3 %vm84_vm0, %v3578_v62  ;;  %2508 = vmatmul.msk.f32.gmra.mxu0 %vm84_vm0, %v3578_v62 }
0x10fc   :  { %2519 = vmatmul.msk.f32.vlgmr.msra.gmra.mxu3 %vm84_vm0, %v3572_v36 }
0x1104   :  { %2520 = vmatmul.msk.f32.gmra.mxu3 %vm84_vm0, %v3578_v62 }
0x1169   :  { %v1556_v42 = vpop.f32.mrf.mxu0 }
0x116a   :  { %v1562_v45 = vmul.f32 0.35355338, %v1556_v42 }
0x116c   :  { %v1564_v48 = vadd.f32 %v2741_v63, %v1562_v45 }
0x116e   :  { %v1566_v5 = vsel %vm392_vm12, %v1564_v48, -inf }
0x116f   :  { %1567 = vmax.xlane.f32.xlu0 %v1566_v5  ;;  %v1497_v43 = vpop.f32.mrf.mxu3 }
0x1170   :  { %v1503_v26 = vmul.f32 0.35355338, %v1497_v43 }
0x1171   :  { %v1559_v60 = vpop.f32.mrf.mxu0 }
0x1172   :  { %v1563_v3 = vmul.f32 0.35355338, %v1559_v60  ;;  %v1505_v9 = vadd.f32 %v2743_v11, %v1503_v26 }
0x1174   :  { %v1565_v1 = vadd.f32 %v2742_v4, %v1563_v3  ;;  %v1507_v10 = vsel %vm392_vm12, %v1505_v9, -inf }
0x1176   :  { %v1569_v8 = vsel %vm392_vm12, %v1565_v1, -inf }
0x1177   :  { %1570 = vmax.xlane.f32.xlu2 %v1569_v8  ;;  %v1500_v12 = vpop.f32.mrf.mxu3 }
0x1178   :  { %v1504_v28 = vmul.f32 0.35355338, %v1500_v12 }
0x117a   :  { %v1506_v0 = vadd.f32 %v2745_v38, %v1504_v28 }
0x117c   :  { %v1510_v6 = vsel %vm392_vm12, %v1506_v0, -inf }
0x117f   :  { %1508 = vmax.xlane.f32.xlu2 %v1507_v10  ;;  %v1673_v56 = vpop.f32.mrf.mxu3  ;;  %v2747_v10 = vld [vmem:[%s3844_s3 + $0x28] sm:$0xff] }
0x1180   :  { %v1679_v59 = vmul.f32 0.35355338, %v1673_v56 }
0x1182   :  { %v1681_v34 = vadd.f32 %v2744_v31, %v1679_v59 }
0x1184   :  { %v1683_v61 = vsel %vm392_vm12, %v1681_v34, -inf }
0x11e2   :  { %v1568_v55 = vpop.xlane.xlu0 %1567 }
0x11e3   :  { %v1572_v15 = vsub.f32 %v1564_v48, %v1568_v55  ;;  %v2748_v55 = vld [vmem:[%s3844_s3 + $0x38] sm:$0xff] }
0x11e5   :  { %v1574_v18 = vmul.f32 1.442695, %v1572_v15 }
0x11e7   :  { %2677 = vpow2.f32 %v1574_v18 }
0x11ea   :  { %v1571_v21 = vpop.xlane.xlu2 %1570 }
0x11eb   :  { %v1573_v58 = vsub.f32 %v1565_v1, %v1571_v21 }
0x11ed   :  { %v2678_v19 = vpop.eup %2677  ;;  %v1576_v22 = vmul.f32 1.442695, %v1573_v58 }
0x11ee   :  { %v1578_v23 = vsel %vm392_vm12, %v2678_v19, 0.0 }
0x11ef   :  { %2679 = vpow2.f32 %v1576_v22  ;;  %1579 = vadd.xlane.f32.xlu1 %v1578_v23 }
0x11f2   :  { %v1509_v24 = vpop.xlane.xlu2 %1508 }
0x11f3   :  { %v1513_v17 = vsub.f32 %v1505_v9, %v1509_v24 }
0x11f5   :  { %v2680_v35 = vpop.eup %2679  ;;  %v1515_v16 = vmul.f32 1.442695, %v1513_v17 }
0x11f6   :  { %v1581_v37 = vsel %vm392_vm12, %v2680_v35, 0.0 }
0x11f7   :  { %2681 = vpow2.f32 %v1515_v16  ;;  %1582 = vadd.xlane.f32.xlu0 %v1581_v37  ;;  %1684 = vmax.xlane.f32.xlu1 %v1683_v61 }
0x11fd   :  { %v2682_v46 = vpop.eup %2681 }
0x11fe   :  { %v1519_v39 = vsel %vm392_vm12, %v2682_v46, 0.0 }
0x11ff   :  { %1520 = vadd.xlane.f32.xlu1 %v1519_v39  ;;  %1511 = vmax.xlane.f32.xlu0 %v1510_v6 }
0x1262   :  { %v1580_v40 = vpop.xlane.xlu1 %1579 }
0x1263   :  { %2683 = vrcp.f32 %v1580_v40  ;;  %v2536_v40 = vld [vmem:[%s3845_s4 + $0xf8] sm:$0xff] }
0x1264   :  { %1850 = vmatpush.msrb.mxu3 %v2536_v40 }
0x1269   :  { %v2684_v41 = vpop.eup %2683 }
0x126a   :  { %v1586_v27 = vmul.f32 %v2684_v41, %v2678_v19  ;;  %v1583_v44 = vpop.xlane.xlu0 %1582  ;;  %v1685_v32 = vpop.xlane.xlu1 %1684  ;;  %v2535_v41 = vld [vmem:[%s3845_s4 + $0xf0] sm:$0xff] }
0x126b   :  { %2685 = vrcp.f32 %v1583_v44  ;;  %v1689_v49 = vsub.f32 %v1681_v34, %v1685_v32  ;;  %1851 = vmatpush.msrb.mxu3 %v2535_v41 }
0x126c   :  { %2511 = vmatmul.msk.f32.vlgmr.msra.gmra.mxu1 %vm392_vm12, %v1586_v27 }
0x126d   :  { %v1691_v51 = vmul.f32 1.442695, %v1689_v49  ;;  %1921 = vmatpush.msra.mxu1 %v2546_v47 }
0x126f   :  { %2687 = vpow2.f32 %v1691_v51  ;;  %1922 = vmatpush.msra.mxu1 %v2545_v50 }
0x1271   :  { %v2686_v25 = vpop.eup %2685  ;;  %1923 = vmatpush.msra.mxu1 %v2544_v52 }
0x1272   :  { %v1521_v29 = vpop.xlane.xlu1 %1520  ;;  %v1587_v30 = vmul.f32 %v2686_v25, %v2680_v35  ;;  %v1512_v3 = vpop.xlane.xlu0 %1511  ;;  %v2534_v25 = vld [vmem:[%s3845_s4 + $0xe8] sm:$0xff] }
0x1273   :  { %2689 = vrcp.f32 %v1521_v29  ;;  %1924 = vmatpush.msra.mxu1 %v2543_v53  ;;  %1852 = vmatpush.msrb.mxu3 %v2534_v25  ;;  %v2533_v29 = vld [vmem:[%s3845_s4 + $0xe0] sm:$0xff] }
0x1274   :  { %2512 = vmatmul.msk.f32.gmra.mxu1 %vm392_vm12, %v1587_v30  ;;  %v2542_v30 = vld [vmem:[%s3846_s5 + $0x58] sm:$0xff] }
0x1275   :  { %v2688_v54 = vpop.eup %2687  ;;  %1853 = vmatpush.msrb.mxu3 %v2533_v29  ;;  %1894 = vmatpush.msra.mxu0 %v2542_v30 }
0x1276   :  { %v1695_v33 = vsel %vm392_vm12, %v2688_v54, 0.0 }
0x1277   :  { %1696 = vadd.xlane.f32.xlu1 %v1695_v33 }
0x1279   :  { %v2690_v57 = vpop.eup %2689 }
0x127a   :  { %v1527_v42 = vmul.f32 %v2690_v57, %v2682_v46 }
0x127c   :  { %2515 = vmatmul.msk.f32.vlgmr.msra.gmra.mxu2 %vm392_vm12, %v1527_v42  ;;  %2527 = vmatmul.msk.f32.vlgmr.msrb.gmra.mxu1 %vm84_vm0, %v3572_v36 }
0x1284   :  { %2528 = vmatmul.msk.f32.gmra.mxu1 %vm84_vm0, %v3578_v62  ;;  %v1676_v62 = vpop.f32.mrf.mxu3 }
0x1285   :  { %v1680_v1 = vmul.f32 0.35355338, %v1676_v62 }
0x1287   :  { %v1682_v12 = vadd.f32 %v2747_v10, %v1680_v1  ;;  %v3691_v1 = vld [vmem:[%s3852_s11 + $0x10] sm:$0xff] }
0x1289   :  { %v1686_v18 = vsel %vm392_vm12, %v1682_v12, -inf }
0x128c   :  { %2549 = vmatmul.msk.f32.vlgmr.msra.gmra.mxu1 %vm84_vm0, %v3539_v13  ;;  %v2746_v13 = vld [vmem:[%s3844_s3 + $0x30] sm:$0xff] }
0x1294   :  { %2550 = vmatmul.msk.f32.gmra.mxu1 %vm84_vm0, %v3543_v20  ;;  %v1514_v20 = vsub.f32 %v1506_v0, %v1512_v3 }
0x1296   :  { %v1517_v8 = vmul.f32 1.442695, %v1514_v20  ;;  %v2540_v20 = vld [vmem:[%s3846_s5 + $0x48] sm:$0xff] }
0x12e9   :  { %v3635_v45 = vpop.f32.mrf.mxu1 }
0x12ea   :  { %v1697_v63 = vpop.xlane.xlu1 %1696 }
0x12eb   :  { %2691 = vrcp.f32 %v1697_v63 }
0x12ec   :  { %2693 = vpow2.f32 %v1517_v8 }
0x12f1   :  { %v2692_v48 = vpop.eup %2691  ;;  %v3637_v5 = vpop.f32.mrf.mxu1 }
0x12f2   :  { %v1703_v60 = vmul.f32 %v2692_v48, %v2688_v54  ;;  %v2694_v56 = vpop.eup %2693  ;;  %v2541_v54 = vld [vmem:[%s3846_s5 + $0x50] sm:$0xff] }
0x12f3   :  { %v1522_v58 = vsel %vm392_vm12, %v2694_v56, 0.0  ;;  %1895 = vmatpush.msra.mxu0 %v2541_v54 }
0x12f4   :  { %2523 = vmatmul.msk.f32.vlgmr.msrb.gmra.mxu0 %vm392_vm12, %v1703_v60 }
0x12f5   :  { %1896 = vmatpush.msra.mxu0 %v2540_v20 }
0x12f9   :  { %v1763_v36 = vpop.f32.mrf.mxu1 }
0x12fa   :  { %v1769_v43 = vmul.f32 0.35355338, %v1763_v36 }
0x12fc   :  { %v1771_v4 = vadd.f32 %v2746_v13, %v1769_v43 }
0x12fe   :  { %v1773_v26 = vsel %vm392_vm12, %v1771_v4, -inf }
0x12ff   :  { %1774 = vmax.xlane.f32.xlu2 %v1773_v26  ;;  %v1640_v33 = vpop.f32.mrf.mxu2 }
0x1300   :  { %v1641_v63 = vadd.f32 %v1640_v33, %v3635_v45  ;;  %v2539_v45 = vld [vmem:[%s3846_s5 + $0x40] sm:$0xff] }
0x1301   :  { %v1766_v11 = vpop.f32.mrf.mxu1  ;;  %1897 = vmatpush.msra.mxu0 %v2539_v45  ;;  %v2576_v45 = vld [vmem:[%s3847_s6 + $0x70] sm:$0xff] }
0x1302   :  { %v1770_v9 = vmul.f32 0.35355338, %v1766_v11 }
0x1304   :  { %v1772_v15 = vadd.f32 %v2748_v55, %v1770_v9 }
0x1306   :  { %v1776_v21 = vsel %vm392_vm12, %v1772_v15, -inf }
0x1307   :  { %1687 = vmax.xlane.f32.xlu2 %v1686_v18  ;;  %1777 = vmax.xlane.f32.xlu0 %v1776_v21 }
0x1309   :  { %v1926_v10 = vpop.f32.mrf.mxu1 }
0x130f   :  { %1523 = vadd.xlane.f32.xlu0 %v1522_v58 }
0x1311   :  { %v1929_v18 = vpop.f32.mrf.mxu1 }
0x1371   :  { %v1728_v42 = vpop.f32.mrf.mxu0 }
0x1372   :  { %v1775_v19 = vpop.xlane.xlu2 %1774  ;;  %v1734_v48 = vadd.f32 %v1728_v42, %v1641_v63 }
0x1373   :  { %v1779_v22 = vsub.f32 %v1771_v4, %v1775_v19 }
0x1375   :  { %v1781_v59 = vmul.f32 1.442695, %v1779_v22 }
0x1377   :  { %2695 = vpow2.f32 %v1781_v59 }
0x137a   :  { %v1688_v23 = vpop.xlane.xlu2 %1687  ;;  %v1778_v24 = vpop.xlane.xlu0 %1777 }
0x137b   :  { %v1690_v31 = vsub.f32 %v1682_v12, %v1688_v23  ;;  %v1780_v34 = vsub.f32 %v1772_v15, %v1778_v24 }
0x137d   :  { %v2696_v17 = vpop.eup %2695  ;;  %v1693_v35 = vmul.f32 1.442695, %v1690_v31  ;;  %v1783_v16 = vmul.f32 1.442695, %v1780_v34  ;;  %v1875_v34 = vld [vmem:[#allocation5 + $0x58] sm:$0xff] }
0x137e   :  { %v1785_v28 = vsel %vm392_vm12, %v2696_v17, 0.0  ;;  %1989 = vmatpush.msra.mxu2 %v1875_v34 }
0x137f   :  { %2697 = vpow2.f32 %v1693_v35  ;;  %1786 = vadd.xlane.f32.xlu2 %v1785_v28  ;;  %v1873_v35 = vld [vmem:[#allocation5 + $0x48] sm:$0xff] }
0x1380   :  { %2699 = vpow2.f32 %v1783_v16  ;;  %v1872_v16 = vld [vmem:[#allocation5 + $0x40] sm:$0xff] }
0x1382   :  { %v1524_v37 = vpop.xlane.xlu0 %1523 }
0x1383   :  { %2701 = vrcp.f32 %v1524_v37 }
0x1385   :  { %v2698_v61 = vpop.eup %2697 }
0x1386   :  { %v2700_v38 = vpop.eup %2699  ;;  %v1698_v0 = vsel %vm392_vm12, %v2698_v61, 0.0 }
0x1387   :  { %1699 = vadd.xlane.f32.xlu2 %v1698_v0  ;;  %v1788_v46 = vsel %vm392_vm12, %v2700_v38, 0.0  ;;  %v1942_v0 = vperm.slane %v3691_v1, 6 }
0x1388   :  { %1789 = vadd.xlane.f32.xlu0 %v1788_v46 }
0x1389   :  { %v2702_v39 = vpop.eup %2701 }
0x138a   :  { %v1528_v6 = vmul.f32 %v2702_v39, %v2694_v56 }
0x138c   :  { %2516 = vmatmul.msk.f32.gmra.mxu2 %vm392_vm12, %v1528_v6 }
0x13f2   :  { %v1787_v27 = vpop.xlane.xlu2 %1786 }
0x13f3   :  { %2703 = vrcp.f32 %v1787_v27 }
0x13f9   :  { %v2704_v44 = vpop.eup %2703 }
0x13fa   :  { %v1793_v32 = vmul.f32 %v2704_v44, %v2696_v17  ;;  %v1700_v47 = vpop.xlane.xlu2 %1699  ;;  %v1874_v17 = vld [vmem:[#allocation5 + $0x50] sm:$0xff] }
0x13fb   :  { %2705 = vrcp.f32 %v1700_v47  ;;  %v1790_v49 = vpop.xlane.xlu0 %1789  ;;  %1990 = vmatpush.msra.mxu2 %v1874_v17 }
0x13fc   :  { %2707 = vrcp.f32 %v1790_v49  ;;  %2531 = vmatmul.msk.f32.vlgmr.msrb.gmra.mxu2 %vm392_vm12, %v1793_v32 }
0x13fd   :  { %1991 = vmatpush.msra.mxu2 %v1873_v35 }
0x13ff   :  { %1992 = vmatpush.msra.mxu2 %v1872_v16  ;;  %v2556_v16 = vld [vmem:[%s3849_s8 + $0x38] sm:$0xff] }
0x1400   :  { %2134 = vmatpush.msra.mxu3 %v2556_v16 }
0x1401   :  { %v2706_v50 = vpop.eup %2705 }
0x1402   :  { %v2708_v51 = vpop.eup %2707  ;;  %v1704_v52 = vmul.f32 %v2706_v50, %v2698_v61 }
0x1403   :  { %v1794_v53 = vmul.f32 %v2708_v51, %v2700_v38 }
0x1404   :  { %2524 = vmatmul.msk.f32.gmra.mxu0 %vm392_vm12, %v1704_v52 }
0x1405   :  { %2532 = vmatmul.msk.f32.gmra.mxu2 %vm392_vm12, %v1794_v53 }
0x140f   :  { %v1643_v57 = vpop.f32.mrf.mxu2 }
0x1410   :  { %v1644_v43 = vadd.f32 %v1643_v57, %v3637_v5  ;;  %v1831_v5 = vperm.slane %v3691_v1, 5 }
0x147f   :  { %v1818_v60 = vpop.f32.mrf.mxu2 }
0x1480   :  { %v1824_v36 = vadd.f32 %v1818_v60, %v1734_v48 }
0x1481   :  { %v1731_v3 = vpop.f32.mrf.mxu0 }
0x1482   :  { %2537 = vmatmul.msk.f32.vlgmr.msrb.gmra.mxu3 %vm84_vm0, %v1824_v36  ;;  %v1735_v62 = vadd.f32 %v1731_v3, %v1644_v43 }
0x1488   :  { %v1821_v13 = vpop.f32.mrf.mxu2 }
0x1489   :  { %v1825_v4 = vadd.f32 %v1821_v13, %v1735_v62 }
0x148b   :  { %2538 = vmatmul.msk.f32.gmra.mxu3 %vm84_vm0, %v1825_v4 }
0x1505   :  { %v1855_v26 = vpop.f32.mrf.mxu3 }
0x1506   :  { %v1856_v8 = vadd.f32 %v1855_v26, %v1831_v5 }
0x1508   :  { %2547 = vmatmul.msk.f32.vlgmr.msra.gmra.mxu0 %vm84_vm0, %v1856_v8 }
0x150e   :  { %v1858_v11 = vpop.f32.mrf.mxu3 }
0x150f   :  { %v1859_v9 = vadd.f32 %v1858_v11, %v1831_v5  ;;  %v2575_v5 = vld [vmem:[%s3847_s6 + $0x68] sm:$0xff] }
0x1511   :  { %2548 = vmatmul.msk.f32.gmra.mxu0 %vm84_vm0, %v1859_v9 }
0x1585   :  { %v1899_v12 = vpop.f32.mrf.mxu0 }
0x1586   :  { %v1932_v55 = vadd.f32 %v1926_v10, %v1899_v12 }
0x1588   :  { %v1934_v15 = vmul.f32 0.5, %v1932_v55 }
0x158a   :  { %2709 = vtanh.f32 %v1934_v15 }
0x158e   :  { %v1902_v21 = vpop.f32.mrf.mxu0 }
0x158f   :  { %v1933_v56 = vadd.f32 %v1929_v18, %v1902_v21 }
0x1590   :  { %v2710_v58 = vpop.eup %2709 }
0x1591   :  { %v1935_v19 = vmul.f32 0.5, %v1933_v56  ;;  %v1938_v22 = vadd.f32 1.0, %v2710_v58 }
0x1593   :  { %2711 = vtanh.f32 %v1935_v19  ;;  %v1940_v59 = vmul.f32 0.5, %v1938_v22  ;;  %v2088_v19 = vperm.slane %v3691_v1, 7 }
0x1595   :  { %1959 = vrot.lane.b32.xlu1 %v1940_v59, %s2833_s26 }
0x1599   :  { %v2712_v23 = vpop.eup %2711 }
0x159a   :  { %v1939_v24 = vadd.f32 1.0, %v2712_v23 }
0x159c   :  { %v1941_v31 = vmul.f32 0.5, %v1939_v24 }
0x159e   :  { %1961 = vrot.lane.b32.xlu0 %v1941_v31, %s2833_s26  ;;  %v3749_v31 = vld [vmem:[%s3852_s11 + $0x18] sm:$0x7] }
0x159f   :  { %v2095_v34 = vperm.slane %v3749_v31, 0 }
0x1607   :  { %v1960_v28 = vpop.permute.xlu1 %1959 }
0x1608   :  { %v1965_v37 = vmul.f32 %v1960_v28, %v3530_v2  ;;  %v2555_v28 = vld [vmem:[%s3849_s8 + $0x30] sm:$0xff] }
0x1609   :  { %2135 = vmatpush.msra.mxu3 %v2555_v28 }
0x160a   :  { %1969 = vrot.lane.b32.xlu2 %v1965_v37, %s2835_s2  ;;  %v2554_v37 = vld [vmem:[%s3849_s8 + $0x28] sm:$0xff] }
0x160b   :  { %2136 = vmatpush.msra.mxu3 %v2554_v37 }
0x1610   :  { %v1962_v61 = vpop.permute.xlu0 %1961 }
0x1611   :  { %v1966_v38 = vmul.f32 %v1962_v61, %v3535_v7 }
0x1613   :  { %1971 = vrot.lane.b32.xlu0 %v1966_v38, %s2835_s2 }
0x161b   :  { %1944 = vrot.lane.b32.xlu0 %v1942_v0, %s2833_s26  ;;  %v2553_v0 = vld [vmem:[%s3849_s8 + $0x20] sm:$0xff] }
0x161c   :  { %2137 = vmatpush.msra.mxu3 %v2553_v0  ;;  %v2283_v0 = vperm.slane %v3749_v31, 2 }
0x1664   :  { %v1970_v46 = vpop.permute.xlu2 %1969 }
0x1665   :  { %2551 = vmatmul.msk.f32.vlgmr.msra.gmra.mxu2 %vm84_vm0, %v1970_v46 }
0x1685   :  { %v1972_v39 = vpop.permute.xlu0 %1971 }
0x1686   :  { %2552 = vmatmul.msk.f32.gmra.mxu2 %vm84_vm0, %v1972_v39 }
0x168d   :  { %v1945_v50 = vpop.permute.xlu0 %1944 }
0x168e   :  { %v1948_v51 = vsub.f32 %v1933_v56, %v1945_v50  ;;  %v1947_v25 = vsub.f32 %v1932_v55, %v1945_v50 }
0x1690   :  { %v1950_v52 = vmul.f32 0.5, %v1948_v51  ;;  %v1949_v30 = vmul.f32 0.5, %v1947_v25 }
0x16e8   :  { %v1994_v6 = vpop.f32.mrf.mxu2 }
0x16e9   :  { %2002 = vrot.lane.b32.xlu1 %v1994_v6, %s2834_s27 }
0x1709   :  { %v1997_v40 = vpop.f32.mrf.mxu2 }
0x170a   :  { %2004 = vrot.lane.b32.xlu2 %v1997_v40, %s2834_s27 }
0x175b   :  { %v2003_v41 = vpop.permute.xlu1 %2002 }
0x175c   :  { %v2008_v27 = vadd.f32 %v2003_v41, %v1899_v12 }
0x175e   :  { %2713 = vtanh.f32 %v2008_v27 }
0x1764   :  { %v2714_v44 = vpop.eup %2713  ;;  %v2005_v32 = vpop.permute.xlu2 %2004 }
0x1765   :  { %v2009_v47 = vadd.f32 %v2005_v32, %v1902_v21  ;;  %2018 = vrot.lane.b32.xlu1 %v2714_v44, %s2835_s2 }
0x1767   :  { %2715 = vtanh.f32 %v2009_v47 }
0x1768   :  { %2717 = vtanh.f32 %v1950_v52 }
0x1769   :  { %2719 = vtanh.f32 %v1949_v30 }
0x176d   :  { %v2716_v49 = vpop.eup %2715 }
0x176e   :  { %2020 = vrot.lane.b32.xlu2 %v2716_v49, %s2835_s2  ;;  %v2718_v53 = vpop.eup %2717 }
0x176f   :  { %v1954_v29 = vadd.f32 1.0, %v2718_v53  ;;  %v2720_v42 = vpop.eup %2719 }
0x1770   :  { %v1953_v36 = vadd.f32 1.0, %v2720_v42 }
0x1771   :  { %v1956_v54 = vmul.f32 0.5, %v1954_v29 }
0x1772   :  { %v1955_v3 = vmul.f32 0.5, %v1953_v36 }
0x1773   :  { %v2013_v33 = vsub.f32 1.0, %v1956_v54 }
0x1774   :  { %v2012_v43 = vsub.f32 1.0, %v1955_v3 }
0x1775   :  { %v2015_v63 = vmul.f32 %v2013_v33, %v3535_v7  ;;  %v2577_v7 = vld [vmem:[%s3847_s6 + $0x78] sm:$0xff] }
0x1776   :  { %v2014_v13 = vmul.f32 %v2012_v43, %v3530_v2  ;;  %2262 = vmatpush.msrb.mxu2 %v2577_v7  ;;  %v2574_v2 = vld [vmem:[%s3847_s6 + $0x60] sm:$0xff]  ;;  %v2566_v43 = vld [vmem:[%s3851_s10 + $0x70] sm:$0xff] }
0x1777   :  { %v2562_v7 = vld [vmem:[%s3851_s10 + $0x50] sm:$0xff] }
0x1778   :  { %2263 = vmatpush.msrb.mxu2 %v2576_v45  ;;  %v2561_v45 = vld [vmem:[%s3851_s10 + $0x48] sm:$0xff] }
0x177a   :  { %2264 = vmatpush.msrb.mxu2 %v2575_v5  ;;  %v2560_v5 = vld [vmem:[%s3851_s10 + $0x40] sm:$0xff] }
0x177c   :  { %2265 = vmatpush.msrb.mxu2 %v2574_v2  ;;  %v2594_v2 = vld [vmem:[%s3850_s9 + $0x1] ss:$0 sm:$0xff] }
0x17c8   :  { %v2021_v57 = vpop.permute.xlu2 %2020 }
0x17c9   :  { %v2025_v48 = vmul.f32 %v2021_v57, %v1956_v54 }
0x17cb   :  { %v3711_v60 = vadd.f32 %v2025_v48, %v2015_v63 }
0x17cd   :  { %2032 = vrot.lane.b32.xlu1 %v3711_v60, %s2835_s2 }
0x17d7   :  { %v2019_v62 = vpop.permute.xlu1 %2018 }
0x17d8   :  { %v2024_v4 = vmul.f32 %v2019_v62, %v1955_v3  ;;  %v2567_v3 = vld [vmem:[%s3851_s10 + $0x78] sm:$0xff]  ;;  %v2565_v62 = vld [vmem:[%s3851_s10 + $0x68] sm:$0xff] }
0x17d9   :  { %2187 = vmatpush.msrb.mxu0 %v2567_v3  ;;  %v2213_v3 = vld [vmem:[#allocation5 + $0x60] sm:$0xff] }
0x17da   :  { %v3716_v20 = vadd.f32 %v2024_v4, %v2014_v13  ;;  %v2564_v13 = vld [vmem:[%s3851_s10 + $0x60] sm:$0xff]  ;;  %v2563_v4 = vld [vmem:[%s3851_s10 + $0x58] sm:$0xff] }
0x17db   :  { %2188 = vmatpush.msrb.mxu0 %v2566_v43 }
0x17dc   :  { %2030 = vrot.lane.b32.xlu0 %v3716_v20, %s2835_s2 }
0x17dd   :  { %2189 = vmatpush.msrb.mxu0 %v2565_v62 }
0x17df   :  { %2190 = vmatpush.msrb.mxu0 %v2564_v13 }
0x17e1   :  { %2191 = vmatpush.msrb.mxu0 %v2563_v4 }
0x17e3   :  { %2192 = vmatpush.msrb.mxu0 %v2562_v7 }
0x17e5   :  { %2193 = vmatpush.msrb.mxu0 %v2561_v45 }
0x17e7   :  { %2194 = vmatpush.msrb.mxu0 %v2560_v5 }
0x183f   :  { %v2033_v26 = vpop.permute.xlu1 %2032 }
0x1840   :  { %v2039_v8 = vsel %vm84_vm0, %v2033_v26, 0.0 }
0x1841   :  { %2040 = vadd.xlane.f32.xlu0 %v2039_v8  ;;  %v2573_v8 = vld [vmem:[%s3846_s5 + $0x78] sm:$0xff] }
0x1842   :  { %2235 = vmatpush.msrb.mxu1 %v2573_v8 }
0x184e   :  { %v2031_v11 = vpop.permute.xlu0 %2030 }
0x184f   :  { %2580 = vmatmul.msk.f32.vlgmr.msrb.gmra.mxu2 %vm84_vm0, %v2031_v11  ;;  %v2036_v9 = vsel %vm84_vm0, %v2031_v11, 0.0  ;;  %v2572_v11 = vld [vmem:[%s3846_s5 + $0x70] sm:$0xff] }
0x1850   :  { %2037 = vadd.xlane.f32.xlu2 %v2036_v9  ;;  %2236 = vmatpush.msrb.mxu1 %v2572_v11 }
0x1855   :  { %2090 = vrot.lane.b32.xlu0 %v2088_v19, %s2833_s26 }
0x1857   :  { %2581 = vmatmul.msk.f32.gmra.mxu2 %vm84_vm0, %v2033_v26 }
0x18b4   :  { %v2041_v55 = vpop.xlane.xlu0 %2040 }
0x18b5   :  { %v2043_v18 = vmul.f32 %v2041_v55, %v2930_v14 }
0x18b7   :  { %v2045_v56 = vsub.f32 %v3711_v60, %v2043_v18 }
0x18b9   :  { %v2047_v58 = vmul.f32 %v2045_v56, %v2045_v56 }
0x18c3   :  { %v2038_v10 = vpop.xlane.xlu2 %2037 }
0x18c4   :  { %v2042_v12 = vmul.f32 %v2038_v10, %v2930_v14 }
0x18c6   :  { %v2044_v15 = vsub.f32 %v3716_v20, %v2042_v12 }
0x18c7   :  { %v2091_v50 = vpop.permute.xlu0 %2090 }
0x18c8   :  { %v2046_v21 = vmul.f32 %v2044_v15, %v2044_v15 }
0x18ca   :  { %2050 = vrot.lane.b32.xlu1 %v2046_v21, %s2835_s2 }
0x18d2   :  { %2052 = vrot.lane.b32.xlu1 %v2047_v58, %s2835_s2 }
0x193c   :  { %v2051_v22 = vpop.permute.xlu1 %2050 }
0x193d   :  { %v2056_v59 = vsel %vm84_vm0, %v2051_v22, 0.0 }
0x193e   :  { %2057 = vadd.xlane.f32.xlu1 %v2056_v59 }
0x1944   :  { %v2053_v23 = vpop.permute.xlu1 %2052 }
0x1945   :  { %v2059_v24 = vsel %vm84_vm0, %v2053_v23, 0.0 }
0x1946   :  { %2060 = vadd.xlane.f32.xlu2 %v2059_v24 }
0x195e   :  { %2097 = vrot.lane.b32.xlu2 %v2095_v34, %s2833_s26 }
0x19b1   :  { %v2058_v1 = vpop.xlane.xlu1 %2057 }
0x19b2   :  { %v2062_v17 = vmul.f32 %v2058_v1, %v2930_v14 }
0x19b4   :  { %v2064_v35 = vadd.f32 1e-05, %v2062_v17 }
0x19b6   :  { %2721 = vrsqrt.f32 %v2064_v35  ;;  %vm2072_vm12 = vweird.f32 %v2064_v35 }
0x19b9   :  { %v2061_v61 = vpop.xlane.xlu2 %2060 }
0x19ba   :  { %v2063_v38 = vmul.f32 %v2061_v61, %v2930_v14  ;;  %v2571_v61 = vld [vmem:[%s3846_s5 + $0x68] sm:$0xff] }
0x19bb   :  { %2237 = vmatpush.msrb.mxu1 %v2571_v61 }
0x19bc   :  { %v2722_v46 = vpop.eup %2721  ;;  %v2065_v39 = vadd.f32 1e-05, %v2063_v38  ;;  %v2570_v38 = vld [vmem:[%s3846_s5 + $0x60] sm:$0xff]  ;;  %s2836_s5 = smov [#allocation7]  }
0x19bd   :  { %v2067_v6 = vmul.f32 %v2722_v46, %v2064_v35  ;;  %vm2073_vm11 = vweird.f32 %v2722_v46  ;;  %2238 = vmatpush.msrb.mxu1 %v2570_v38 }
0x19be   :  { %2723 = vrsqrt.f32 %v2065_v39  ;;  %vm2074_vm1 = vmor %vm2072_vm12, %vm2073_vm11  ;;  %vm2082_vm3 = vweird.f32 %v2065_v39 }
0x19bf   :  { %v2068_v40 = vmul.f32 %v2722_v46, %v2067_v6 }
0x19c1   :  { %v2069_v41 = vmul.f32 0.5, %v2068_v40  ;;  %v2098_v53 = vpop.permute.xlu2 %2097 }
0x19c3   :  { %v2070_v27 = vsub.f32 1.5, %v2069_v41 }
0x19c4   :  { %v2724_v44 = vpop.eup %2723 }
0x19c5   :  { %v2077_v32 = vmul.f32 %v2724_v44, %v2065_v39  ;;  %v2071_v47 = vmul.f32 %v2722_v46, %v2070_v27  ;;  %vm2083_vm2 = vweird.f32 %v2724_v44  ;;  %v2267_v27 = vpop.f32.mrf.mxu2 }
0x19c6   :  { %vm2084_vm4 = vmor %vm2082_vm3, %vm2083_vm2 }
0x19c7   :  { %v2078_v14 = vmul.f32 %v2724_v44, %v2077_v32  ;;  %v2075_v49 = vsel %vm2074_vm1, %v2722_v46, %v2071_v47  ;;  %v2172_v46 = vperm.slane %v3749_v31, 1 }
0x19c8   :  { %v2086_v51 = vmul.f32 %v2075_v49, %v2044_v15 }
0x19c9   :  { %v2079_v52 = vmul.f32 0.5, %v2078_v14 }
0x19ca   :  { %v2093_v25 = vmul.f32 %v2091_v50, %v2086_v51 }
0x19cb   :  { %v2080_v29 = vsub.f32 1.5, %v2079_v52 }
0x19cc   :  { %v2100_v30 = vadd.f32 %v2098_v53, %v2093_v25 }
0x19cd   :  { %v2081_v54 = vmul.f32 %v2724_v44, %v2080_v29  ;;  %v2270_v14 = vpop.f32.mrf.mxu2 }
0x19ce   :  { %2114 = vrot.lane.b32.xlu0 %v2100_v30, %s2835_s2 }
0x19cf   :  { %v2085_v33 = vsel %vm2084_vm4, %v2724_v44, %v2081_v54 }
0x19d0   :  { %v2087_v57 = vmul.f32 %v2085_v33, %v2045_v56 }
0x19d2   :  { %v2094_v42 = vmul.f32 %v2091_v50, %v2087_v57 }
0x19d4   :  { %v2101_v63 = vadd.f32 %v2098_v53, %v2094_v42 }
0x19d6   :  { %2116 = vrot.lane.b32.xlu1 %v2101_v63, %s2835_s2  ;;  %v2216_v63 = vld [vmem:[#allocation5 + $0x78] sm:$0xff] }
0x19d7   :  { %2330 = vmatpush.msrb.mxu3 %v2216_v63 }
0x19de   :  { %2285 = vrot.lane.b32.xlu1 %v2283_v0, %s2833_s26 }
0x1a40   :  { %v2115_v48 = vpop.permute.xlu0 %2114 }
0x1a41   :  { %2558 = vmatmul.msk.f32.vlgmr.msra.gmra.mxu3 %vm84_vm0, %v2115_v48  ;;  %v2215_v48 = vld [vmem:[#allocation5 + $0x70] sm:$0xff] }
0x1a42   :  { %2331 = vmatpush.msrb.mxu3 %v2215_v48 }
0x1a48   :  { %v2117_v36 = vpop.permute.xlu1 %2116 }
0x1a49   :  { %2559 = vmatmul.msk.f32.gmra.mxu3 %vm84_vm0, %v2117_v36  ;;  %v2214_v36 = vld [vmem:[#allocation5 + $0x68] sm:$0xff] }
0x1a4a   :  { %2332 = vmatpush.msrb.mxu3 %v2214_v36 }
0x1a4c   :  { %2333 = vmatpush.msrb.mxu3 %v2213_v3 }
0x1a50   :  { %v2286_v11 = vpop.permute.xlu1 %2285 }
0x1ac4   :  { %v2139_v26 = vpop.f32.mrf.mxu3 }
0x1ac5   :  { %v2140_v9 = vadd.f32 %v2594_v2, %v2139_v26 }
0x1ac7   :  { %v2147_v10 = vmul.f32 0.044715, %v2140_v9  ;;  %v2145_v34 = vmul.f32 0.5, %v2140_v9 }
0x1ac9   :  { %v2149_v12 = vmul.f32 %v2147_v10, %v2140_v9 }
0x1acb   :  { %v2151_v55 = vmul.f32 %v2149_v12, %v2140_v9 }
0x1acc   :  { %v2142_v15 = vpop.f32.mrf.mxu3 }
0x1acd   :  { %v2153_v18 = vadd.f32 %v2151_v55, %v2140_v9  ;;  %v2143_v21 = vadd.f32 %v2594_v2, %v2142_v15 }
0x1acf   :  { %v2155_v56 = vmul.f32 0.7978846, %v2153_v18  ;;  %v2148_v58 = vmul.f32 0.044715, %v2143_v21  ;;  %v2146_v16 = vmul.f32 0.5, %v2143_v21 }
0x1ad1   :  { %2725 = vtanh.f32 %v2155_v56  ;;  %v2150_v19 = vmul.f32 %v2148_v58, %v2143_v21 }
0x1ad3   :  { %v2152_v22 = vmul.f32 %v2150_v19, %v2143_v21 }
0x1ad5   :  { %v2154_v59 = vadd.f32 %v2152_v22, %v2143_v21 }
0x1ad7   :  { %v2726_v23 = vpop.eup %2725  ;;  %v2156_v24 = vmul.f32 0.7978846, %v2154_v59 }
0x1ad8   :  { %v2159_v1 = vadd.f32 1.0, %v2726_v23 }
0x1ad9   :  { %2727 = vtanh.f32 %v2156_v24 }
0x1ada   :  { %v2161_v17 = vmul.f32 %v2159_v1, %v2145_v34 }
0x1adc   :  { %2568 = vmatmul.msk.f32.vlgmr.msrb.gmra.mxu0 %vm1073_vm9, %v2161_v17 }
0x1adf   :  { %v2728_v35 = vpop.eup %2727 }
0x1ae0   :  { %v2160_v28 = vadd.f32 1.0, %v2728_v35 }
0x1ae2   :  { %v2162_v37 = vmul.f32 %v2160_v28, %v2146_v16 }
0x1ae4   :  { %2569 = vmatmul.msk.f32.gmra.mxu0 %vm1073_vm9, %v2162_v37 }
0x1b59   :  { %v2196_v39 = vpop.f32.mrf.mxu0 }
0x1b5a   :  { %v2197_v6 = vadd.f32 %v2196_v39, %v2172_v46 }
0x1b5c   :  { %2578 = vmatmul.msk.f32.vlgmr.msrb.gmra.mxu1 %vm84_vm0, %v2197_v6 }
0x1b61   :  { %v2199_v40 = vpop.f32.mrf.mxu0 }
0x1b62   :  { %v2200_v41 = vadd.f32 %v2199_v40, %v2172_v46 }
0x1b64   :  { %2579 = vmatmul.msk.f32.gmra.mxu1 %vm84_vm0, %v2200_v41 }
0x1bd9   :  { %v2240_v44 = vpop.f32.mrf.mxu1 }
0x1bda   :  { %v2273_v32 = vadd.f32 %v2267_v27, %v2240_v44 }
0x1bdc   :  { %v2275_v47 = vmul.f32 0.5, %v2273_v32  ;;  %v2288_v22 = vsub.f32 %v2273_v32, %v2286_v11 }
0x1bde   :  { %2729 = vtanh.f32 %v2275_v47  ;;  %v2290_v59 = vmul.f32 0.5, %v2288_v22 }
0x1be1   :  { %v2243_v49 = vpop.f32.mrf.mxu1 }
0x1be2   :  { %v2274_v50 = vadd.f32 %v2270_v14, %v2243_v49 }
0x1be4   :  { %v2730_v51 = vpop.eup %2729  ;;  %v2276_v52 = vmul.f32 0.5, %v2274_v50  ;;  %v2289_v9 = vsub.f32 %v2274_v50, %v2286_v11 }
0x1be5   :  { %v2279_v53 = vadd.f32 1.0, %v2730_v51 }
0x1be6   :  { %2731 = vtanh.f32 %v2276_v52  ;;  %v2291_v10 = vmul.f32 0.5, %v2289_v9 }
0x1be7   :  { %v2281_v31 = vmul.f32 0.5, %v2279_v53 }
0x1be9   :  { %2300 = vrot.lane.b32.xlu0 %v2281_v31, %s2833_s26 }
0x1bec   :  { %v2732_v25 = vpop.eup %2731 }
0x1bed   :  { %v2280_v29 = vadd.f32 1.0, %v2732_v25 }
0x1bef   :  { %v2282_v30 = vmul.f32 0.5, %v2280_v29 }
0x1bf1   :  { %2302 = vrot.lane.b32.xlu2 %v2282_v30, %s2833_s26  ;;  %s2383_s26 = sshll.u32 %s2836_s5, 4  ;;  %s2384_s26 = int_to_ptr.vmem [resolvable:$true] %s2383_s26 }
0x1c4b   :  { %v2303_v54 = vpop.permute.xlu2 %2302 }
0x1c4c   :  { %v2307_v33 = vmul.f32 %v2303_v54, %v3711_v60 }
0x1c4e   :  { %2312 = vrot.lane.b32.xlu2 %v2307_v33, %s2835_s2 }
0x1c5b   :  { %v2301_v57 = vpop.permute.xlu0 %2300 }
0x1c5c   :  { %v2306_v42 = vmul.f32 %v2301_v57, %v3716_v20 }
0x1c5e   :  { %2310 = vrot.lane.b32.xlu0 %v2306_v42, %s2835_s2 }
0x1ca8   :  { %v2313_v62 = vpop.permute.xlu2 %2312 }
0x1cd0   :  { %v2311_v43 = vpop.permute.xlu0 %2310 }
0x1cd1   :  { %2582 = vmatmul.msk.f32.vlgmr.msrb.gmra.mxu3 %vm84_vm0, %v2311_v43 }
0x1cd9   :  { %2583 = vmatmul.msk.f32.gmra.mxu3 %vm84_vm0, %v2313_v62 }
0x1d54   :  { %v2335_v13 = vpop.f32.mrf.mxu3 }
0x1d55   :  { %2343 = vrot.lane.b32.xlu0 %v2335_v13, %s2834_s27 }
0x1d5c   :  { %v2338_v4 = vpop.f32.mrf.mxu3 }
0x1d5d   :  { %2345 = vrot.lane.b32.xlu2 %v2338_v4, %s2834_s27 }
0x1db7   :  { %v2346_v7 = vpop.permute.xlu2 %2345 }
0x1db8   :  { %v2350_v45 = vadd.f32 %v2346_v7, %v2243_v49 }
0x1dba   :  { %2733 = vtanh.f32 %v2350_v45 }
0x1dc0   :  { %v2734_v5 = vpop.eup %2733 }
0x1dc1   :  { %2361 = vrot.lane.b32.xlu2 %v2734_v5, %s2835_s2 }
0x1dc7   :  { %v2344_v2 = vpop.permute.xlu0 %2343 }
0x1dc8   :  { %v2349_v26 = vadd.f32 %v2344_v2, %v2240_v44 }
0x1dca   :  { %2735 = vtanh.f32 %v2349_v26 }
0x1dcb   :  { %2737 = vtanh.f32 %v2291_v10 }
0x1dcc   :  { %2739 = vtanh.f32 %v2290_v59 }
0x1dd0   :  { %v2736_v8 = vpop.eup %2735 }
0x1dd1   :  { %2359 = vrot.lane.b32.xlu0 %v2736_v8, %s2835_s2  ;;  %v2738_v12 = vpop.eup %2737 }
0x1dd2   :  { %v2295_v55 = vadd.f32 1.0, %v2738_v12  ;;  %v2740_v23 = vpop.eup %2739 }
0x1dd3   :  { %v2294_v24 = vadd.f32 1.0, %v2740_v23 }
0x1dd4   :  { %v2297_v15 = vmul.f32 0.5, %v2295_v55 }
0x1dd5   :  { %v2296_v34 = vmul.f32 0.5, %v2294_v24 }
0x1dd6   :  { %v2354_v18 = vsub.f32 1.0, %v2297_v15 }
0x1dd7   :  { %v2353_v1 = vsub.f32 1.0, %v2296_v34 }
0x1dd8   :  { %v2356_v56 = vmul.f32 %v2354_v18, %v3711_v60 }
0x1dd9   :  { %v2355_v35 = vmul.f32 %v2353_v1, %v3716_v20 }
0x1e1b   :  { %v2362_v21 = vpop.permute.xlu2 %2361 }
0x1e1c   :  { %v2366_v58 = vmul.f32 %v2362_v21, %v2297_v15 }
0x1e1e   :  { %v2368_v19 = vadd.f32 %v2366_v58, %v2356_v56 }
0x1e20   :  { %2373 = vrot.lane.b32.xlu0 %v2368_v19, %s2835_s2 }
0x1e43   :  { %v2360_v17 = vpop.permute.xlu0 %2359 }
0x1e44   :  { %v2365_v16 = vmul.f32 %v2360_v17, %v2296_v34 }
0x1e46   :  { %v2367_v28 = vadd.f32 %v2365_v16, %v2355_v35 }
0x1e48   :  { %2371 = vrot.lane.b32.xlu1 %v2367_v28, %s2835_s2 }
0x1e92   :  { %v2374_v37 = vpop.permute.xlu0 %2373 }
0x1e93   :  { %2378 = vst.msk [vmem:[#allocation7 + $0x8] sm:$0xff] %vm84_vm0, %v2374_v37 }
0x1eba   :  { %v2372_v60 = vpop.permute.xlu1 %2371 }
0x1ebb   :  { %2377 = vst.msk [vmem:[#allocation7] sm:$0xff] %vm84_vm0, %v2372_v60 }
0x1ebc   :  { %2391 = dma.vmem_to_hbm [thread:$0]  %s2384_s26, 256, %s2386_s0, [#allocation4], %s2829_s29, %s2829_s29, %s2830_s30  }
0x1ebd   :  { %2826 = dma.done.wait [#allocation4], 256  }
0x1ebe   :  { %2827 = vsyncadd [#allocation4], 4294967040 }
0x1ebf   :  { %2396 = vsyncpa [#allocation3], 1 }
0x1ec0   :  { %2397 = vsyncpa [#allocation6], 1 }
0x1ec1   :  { %2398 = vsyncpa [#allocation4], 1 }

</bundles_post_ra>
